<compile_context>
chip_gen: v7x
topology: tpu7x:2x2x1
jax: 0.10.0
libtpu: 0.0.40
codegen_flags: <defaults>
</compile_context>

<pallas_src>
import jax
import jax.numpy as jnp
from jax.experimental import pallas as pl
from jax.experimental.pallas import tpu as pltpu

# ---------------- config (mirrors the PyTorch `config` object) ----------------
EMBED_DIM = 8                          # config.embed_dim
PROFILE_DIM = 8                        # profile feature size
INPUT_DIM = EMBED_DIM + PROFILE_DIM    # `input_dim` ctor arg (embed ++ profile)
LSTM_HIDDEN = 16                       # config.lstm_hidden_dim
LSTM_NUM_LAYERS = 1                    # config.lstm_num_layers (module doubles it)
NUM_LSTM_LAYERS = LSTM_NUM_LAYERS * 2
KERNEL_NUM = 16                        # config.kernel_num
NUM_LABELS = 3                         # config.num_labels
VOCAB = 26                             # len(config.IUPAC_VOCAB)
CNN_LSTM_LEN = LSTM_HIDDEN * 2 + KERNEL_NUM           # 48
HIDDEN_HALF = CNN_LSTM_LEN // 2                       # 24
CONV_DEFS = ((1, 0), (3, 1), (3, 1), (5, 2))          # (kernel_size, padding)
MAX_PAD = max(p for _, p in CONV_DEFS)                # 2


# ------------------------------ fused Pallas kernel ----------------------------
def _dot3(a, w):
    # (T, BB, Cin) x (Cin, Cout) -> (T, BB, Cout), f32 accumulation on the MXU.
    return jax.lax.dot_general(
        a, w, dimension_numbers=(((2,), (0,)), ((), ())),
        preferred_element_type=jnp.float32)


def ssenet_fused_kernel(
        x_ref,                                          # (T, BB, INPUT_DIM) f32
        wih0_ref, whh0_ref, bl0_ref,                    # LSTM layer 0 (fwd/bwd stacked)
        wih1_ref, whh1_ref, bl1_ref,                    # LSTM layer 1 (fwd/bwd stacked)
        wc0_ref, bc0_ref, wc1_ref, bc1_ref,             # conv stack (flattened taps)
        wc2_ref, bc2_ref, wc3_ref, bc3_ref,
        wh1_ref, bh1_ref, wh2_ref, bh2_ref,             # classifier head
        o_ref,                                          # (T, BB, NUM_LABELS)
        gxf_scr, gxb_scr, hf_scr, hb_scr, pad_scr):     # VMEM scratch
    T, BB, _ = x_ref.shape
    H = LSTM_HIDDEN

    x = x_ref[...]                                      # (T, BB, INPUT_DIM) f32
    x_bf = x.astype(jnp.bfloat16)

    # ---------------- bidirectional 2-layer LSTM (PyTorch gate order i,f,g,o) ----
    def run_direction(gx_ref, hout_ref, whh, bias, reverse):
        # Per-step: one tiny (BB,H)@(H,4H) f32 matmul + VPU/EUP gate math.
        def step(t, carry):
            h, c = carry
            gates = (gx_ref[t]
                     + jnp.dot(h, whh, preferred_element_type=jnp.float32)
                     + bias)                            # (BB, 4H)
            ig = jax.nn.sigmoid(gates[:, 0:H])
            fg = jax.nn.sigmoid(gates[:, H:2 * H])
            gg = jnp.tanh(gates[:, 2 * H:3 * H])
            og = jax.nn.sigmoid(gates[:, 3 * H:4 * H])
            c_new = fg * c + ig * gg
            h_new = og * jnp.tanh(c_new)
            hout_ref[t] = h_new
            return (h_new, c_new)

        carry = (jnp.zeros((BB, H), jnp.float32), jnp.zeros((BB, H), jnp.float32))
        if T <= 32:
            # Short static T: fully unroll so the scheduler sees across steps
            # and all ref indices become static.
            for t in (range(T - 1, -1, -1) if reverse else range(T)):
                carry = step(t, carry)
        else:
            def body(i, c):
                return step((T - 1 - i) if reverse else i, c)
            jax.lax.fori_loop(0, T, body, carry)

    def bilstm_layer(xin_bf, wih_ref, whh_ref, b_ref):
        # Hoisted input projection: one MXU matmul per direction instead of T
        # tiny matmuls inside the time loop.
        gxf_scr[...] = _dot3(xin_bf, wih_ref[0])
        gxb_scr[...] = _dot3(xin_bf, wih_ref[1])
        run_direction(gxf_scr, hf_scr, whh_ref[0], b_ref[0], reverse=False)
        run_direction(gxb_scr, hb_scr, whh_ref[1], b_ref[1], reverse=True)
        return jnp.concatenate([hf_scr[...], hb_scr[...]], axis=-1)   # (T, BB, 2H)

    l0 = bilstm_layer(x_bf, wih0_ref, whh0_ref, bl0_ref)
    lstm_out = bilstm_layer(l0.astype(jnp.bfloat16), wih1_ref, whh1_ref, bl1_ref)

    # ---------------- conv(+ReLU) stack, fused in VMEM, taps collapsed ----------
    def conv_relu(h, w_ref, b_ref, ksize, pad):
        if ksize == 1:
            win = h                                     # pointwise conv
        else:
            # Zero-padded slab in VMEM scratch, then im2col via lane concat so
            # the K taps collapse into a single MXU matmul (contraction K*Cin).
            pad_scr[...] = jnp.zeros_like(pad_scr)
            pad_scr[pl.ds(MAX_PAD, T), :, :] = h
            start = MAX_PAD - pad
            win = jnp.concatenate(
                [pad_scr[pl.ds(start + k, T), :, :] for k in range(ksize)],
                axis=-1)                                # (T, BB, K*Cin)
        y = _dot3(win.astype(jnp.bfloat16), w_ref[...]) + b_ref[...]
        return jnp.maximum(y, 0.0)                      # fused ReLU

    c = x
    for (w_ref, b_ref), (ksize, pad) in zip(
            ((wc0_ref, bc0_ref), (wc1_ref, bc1_ref),
             (wc2_ref, bc2_ref), (wc3_ref, bc3_ref)), CONV_DEFS):
        c = conv_relu(c, w_ref, b_ref, ksize, pad)      # (T, BB, KERNEL_NUM)

    # ---------------- classifier head, fused on in-VMEM concat features ---------
    feats = jnp.maximum(jnp.concatenate([c, lstm_out], axis=-1), 0.0)   # (T,BB,48)
    hmid = jnp.maximum(
        _dot3(feats.astype(jnp.bfloat16), wh1_ref[...]) + bh1_ref[...], 0.0)
    # nn.Dropout is identity at inference time.
    logits = _dot3(hmid.astype(jnp.bfloat16), wh2_ref[...]) + bh2_ref[...]
    # NUM_LABELS=3 output is lane-sparse but tiny; keeping it direct avoids a
    # 128-wide padded writeback that would cost more HBM bytes than it saves.
    o_ref[...] = logits.astype(o_ref.dtype)


# ------------------------------ kernel wrapper ---------------------------------
def _full_spec(arr):
    nd = arr.ndim
    return pl.BlockSpec(arr.shape, lambda b: (0,) * nd)


def _pick_batch_block(B):
    # Sublane-aligned batch blocks: bounds VMEM use and gives the grid >=2
    # steps to shard across v7x's two TensorCores when B allows it.
    if B % 8 != 0:
        return B                     # tiny / odd batches: single block
    for bb in (64, 32, 16, 8):
        if B % bb == 0 and B // bb >= 2:
            return bb
    return 8


def fused_forward(x_tb, pp):
    # x_tb: (T, B, INPUT_DIM) f32 time-major; pp: packed params.
    T, B, Din = x_tb.shape
    BB = _pick_batch_block(B)
    H4 = 4 * LSTM_HIDDEN

    (wih0, whh0, bl0), (wih1, whh1, bl1) = pp['lstm']
    args = [x_tb, wih0, whh0, bl0, wih1, whh1, bl1]
    for (wf, br) in pp['convs']:
        args += [wf, br]
    args += [pp['w1'], pp['b1'], pp['w2'], pp['b2']]

    in_specs = [pl.BlockSpec((T, BB, Din), lambda b: (0, b, 0))]
    in_specs += [_full_spec(a) for a in args[1:]]

    return pl.pallas_call(
        ssenet_fused_kernel,
        out_shape=jax.ShapeDtypeStruct((T, B, NUM_LABELS), jnp.float32),
        grid=(B // BB,),
        in_specs=in_specs,
        out_specs=pl.BlockSpec((T, BB, NUM_LABELS), lambda b: (0, b, 0)),
        scratch_shapes=[
            pltpu.VMEM((T, BB, H4), jnp.float32),                    # gx fwd
            pltpu.VMEM((T, BB, H4), jnp.float32),                    # gx bwd
            pltpu.VMEM((T, BB, LSTM_HIDDEN), jnp.float32),           # h fwd seq
            pltpu.VMEM((T, BB, LSTM_HIDDEN), jnp.float32),           # h bwd seq
            pltpu.VMEM((T + 2 * MAX_PAD, BB, KERNEL_NUM), jnp.float32),  # conv pad slab
        ],
        compiler_params=pltpu.CompilerParams(
            dimension_semantics=("parallel",)),
    )(*args)                                             # (T, B, NUM_LABELS)


# ------------------------------ parameters -------------------------------------
def init_params(key):
    keys = iter(jax.random.split(key, 32))

    def nrm(shape, scale=0.1):
        return scale * jax.random.normal(next(keys), shape, dtype=jnp.float32)

    params = {}
    embed = nrm((VOCAB, EMBED_DIM))
    # nn.Embedding(padding_idx=-1) -> last row is the zeroed padding row.
    params['embed'] = embed.at[VOCAB - 1].set(0.0)

    # conv weight layout (K, Cin, Cout); transpose from PyTorch's (Cout, Cin, K)
    # if loading pretrained weights.
    conv_chans = [(1, INPUT_DIM, KERNEL_NUM), (3, KERNEL_NUM, KERNEL_NUM),
                  (3, KERNEL_NUM, KERNEL_NUM), (5, KERNEL_NUM, KERNEL_NUM)]
    params['convs'] = [(nrm((k, cin, cout)), nrm((cout,), 0.01))
                       for (k, cin, cout) in conv_chans]

    lstm = []
    in_dim = INPUT_DIM
    for _ in range(NUM_LSTM_LAYERS):
        layer = {}
        for d in ('fwd', 'bwd'):
            layer[d] = dict(wih=nrm((in_dim, 4 * LSTM_HIDDEN)),
                            whh=nrm((LSTM_HIDDEN, 4 * LSTM_HIDDEN)),
                            b=nrm((4 * LSTM_HIDDEN,), 0.01))   # b_ih + b_hh combined
        lstm.append(layer)
        in_dim = 2 * LSTM_HIDDEN
    params['lstm'] = lstm

    params['w1'] = nrm((CNN_LSTM_LEN, HIDDEN_HALF))
    params['b1'] = nrm((HIDDEN_HALF,), 0.01)
    params['w2'] = nrm((HIDDEN_HALF, NUM_LABELS))
    params['b2'] = nrm((NUM_LABELS,), 0.01)
    return params


def pack_params(params):
    """Stack/flatten/cast weights into the layout the fused kernel expects."""
    packed = {}
    lstm = []
    for layer in params['lstm']:
        wih = jnp.stack([layer['fwd']['wih'],
                         layer['bwd']['wih']]).astype(jnp.bfloat16)   # (2, D, 4H)
        whh = jnp.stack([layer['fwd']['whh'], layer['bwd']['whh']])   # (2, H, 4H) f32
        b = jnp.stack([layer['fwd']['b'], layer['bwd']['b']])[:, None, :]  # (2,1,4H)
        lstm.append((wih, whh, b))
    packed['lstm'] = lstm

    convs = []
    for (w, b) in params['convs']:
        k, cin, cout = w.shape
        convs.append((w.reshape(k * cin, cout).astype(jnp.bfloat16),  # collapsed taps
                      b.reshape(1, cout)))
    packed['convs'] = convs

    packed['w1'] = params['w1'].astype(jnp.bfloat16)
    packed['b1'] = params['b1'].reshape(1, -1)
    packed['w2'] = params['w2'].astype(jnp.bfloat16)
    packed['b2'] = params['b2'].reshape(1, -1)
    return packed


# ------------------------------ full forward -----------------------------------
def ssenet_cnn_forward(sequence, profile, params):
    # sequence: (B, T) int32, profile: (B, T, P) float32 -> (B, T, NUM_LABELS)
    seq_tb = jnp.transpose(sequence, (1, 0))              # (T, B)
    prof_tb = jnp.transpose(profile, (1, 0, 2))           # (T, B, P)
    # TODO(synk): embedding gather has no dedicated Pallas fast path; plain JAX glue.
    embed = jnp.take(params['embed'], seq_tb, axis=0)     # (T, B, E)
    x_tb = jnp.concatenate([embed, prof_tb], axis=2)      # (T, B, INPUT_DIM)

    packed = pack_params(params)
    logits_tb = fused_forward(x_tb, packed)               # (T, B, NUM_LABELS)
    return jnp.transpose(logits_tb, (1, 0, 2))            # (B, T, NUM_LABELS)


if __name__ == "__main__":
    key = jax.random.PRNGKey(0)
    k_seq, k_prof, k_par = jax.random.split(key, 3)
    B, T = 2, 8
    sequence = jax.random.randint(k_seq, (B, T), 0, VOCAB, dtype=jnp.int32)
    profile = jax.random.normal(k_prof, (B, T, PROFILE_DIM), dtype=jnp.float32)
    params = init_params(k_par)

    out = ssenet_cnn_forward(sequence, profile, params)
    out = jax.block_until_ready(out)
    assert out.shape == (B, T, NUM_LABELS), out.shape
    assert out.dtype == jnp.float32
    print("KERNEL_OK")
</pallas_src>

<mosaic_0001>
module attributes {stable_mosaic.version = 11 : i64} {
  func.func @ssenet_fused_kernel(%arg0: i32, %arg1: memref<8x2x16xf32, #tpu.memory_space<vmem>>, %arg2: memref<2x16x64xbf16, #tpu.memory_space<vmem>>, %arg3: memref<2x16x64xf32, #tpu.memory_space<vmem>>, %arg4: memref<2x1x64xf32, #tpu.memory_space<vmem>>, %arg5: memref<2x32x64xbf16, #tpu.memory_space<vmem>>, %arg6: memref<2x16x64xf32, #tpu.memory_space<vmem>>, %arg7: memref<2x1x64xf32, #tpu.memory_space<vmem>>, %arg8: memref<16x16xbf16, #tpu.memory_space<vmem>>, %arg9: memref<1x16xf32, #tpu.memory_space<vmem>>, %arg10: memref<48x16xbf16, #tpu.memory_space<vmem>>, %arg11: memref<1x16xf32, #tpu.memory_space<vmem>>, %arg12: memref<48x16xbf16, #tpu.memory_space<vmem>>, %arg13: memref<1x16xf32, #tpu.memory_space<vmem>>, %arg14: memref<80x16xbf16, #tpu.memory_space<vmem>>, %arg15: memref<1x16xf32, #tpu.memory_space<vmem>>, %arg16: memref<48x24xbf16, #tpu.memory_space<vmem>>, %arg17: memref<1x24xf32, #tpu.memory_space<vmem>>, %arg18: memref<24x3xbf16, #tpu.memory_space<vmem>>, %arg19: memref<1x3xf32, #tpu.memory_space<vmem>>, %arg20: memref<8x2x3xf32, #tpu.memory_space<vmem>>, %arg21: memref<8x2x64xf32, #tpu.memory_space<vmem>>, %arg22: memref<8x2x64xf32, #tpu.memory_space<vmem>>, %arg23: memref<8x2x16xf32, #tpu.memory_space<vmem>>, %arg24: memref<8x2x16xf32, #tpu.memory_space<vmem>>, %arg25: memref<12x2x16xf32, #tpu.memory_space<vmem>>) attributes {dimension_semantics = [#tpu.dimension_semantics<parallel>], iteration_bounds = array<i64: 1>, scalar_prefetch = 0 : i64, scratch_operands = 5 : i64, tpu.core_type = #tpu.core_type<tc>, window_params = [{transform_indices = @transform_0, window_bounds = array<i64: 8, 2, 16>}, {pipeline_mode = #tpu.pipeline_mode<synchronous>, transform_indices = @transform_1, window_bounds = array<i64: 2, 16, 64>}, {pipeline_mode = #tpu.pipeline_mode<synchronous>, transform_indices = @transform_2, window_bounds = array<i64: 2, 16, 64>}, {pipeline_mode = #tpu.pipeline_mode<synchronous>, transform_indices = @transform_3, window_bounds = array<i64: 2, 1, 64>}, {pipeline_mode = #tpu.pipeline_mode<synchronous>, transform_indices = @transform_4, window_bounds = array<i64: 2, 32, 64>}, {pipeline_mode = #tpu.pipeline_mode<synchronous>, transform_indices = @transform_5, window_bounds = array<i64: 2, 16, 64>}, {pipeline_mode = #tpu.pipeline_mode<synchronous>, transform_indices = @transform_6, window_bounds = array<i64: 2, 1, 64>}, {pipeline_mode = #tpu.pipeline_mode<synchronous>, transform_indices = @transform_7, window_bounds = array<i64: 16, 16>}, {pipeline_mode = #tpu.pipeline_mode<synchronous>, transform_indices = @transform_8, window_bounds = array<i64: 1, 16>}, {pipeline_mode = #tpu.pipeline_mode<synchronous>, transform_indices = @transform_9, window_bounds = array<i64: 48, 16>}, {pipeline_mode = #tpu.pipeline_mode<synchronous>, transform_indices = @transform_10, window_bounds = array<i64: 1, 16>}, {pipeline_mode = #tpu.pipeline_mode<synchronous>, transform_indices = @transform_11, window_bounds = array<i64: 48, 16>}, {pipeline_mode = #tpu.pipeline_mode<synchronous>, transform_indices = @transform_12, window_bounds = array<i64: 1, 16>}, {pipeline_mode = #tpu.pipeline_mode<synchronous>, transform_indices = @transform_13, window_bounds = array<i64: 80, 16>}, {pipeline_mode = #tpu.pipeline_mode<synchronous>, transform_indices = @transform_14, window_bounds = array<i64: 1, 16>}, {pipeline_mode = #tpu.pipeline_mode<synchronous>, transform_indices = @transform_15, window_bounds = array<i64: 48, 24>}, {pipeline_mode = #tpu.pipeline_mode<synchronous>, transform_indices = @transform_16, window_bounds = array<i64: 1, 24>}, {pipeline_mode = #tpu.pipeline_mode<synchronous>, transform_indices = @transform_17, window_bounds = array<i64: 24, 3>}, {pipeline_mode = #tpu.pipeline_mode<synchronous>, transform_indices = @transform_18, window_bounds = array<i64: 1, 3>}, {transform_indices = @transform_19, window_bounds = array<i64: 8, 2, 3>}]} {
    %c0 = arith.constant 0 : index
    %c0_0 = arith.constant 0 : index
    %c0_1 = arith.constant 0 : index
    %0 = vector.load %arg1[%c0, %c0_0, %c0_1] : memref<8x2x16xf32, #tpu.memory_space<vmem>>, vector<8x2x16xf32>
    %1 = arith.truncf %0 : vector<8x2x16xf32> to vector<8x2x16xbf16>
    %c0_2 = arith.constant 0 : index
    %c0_3 = arith.constant 0 : index
    %c0_4 = arith.constant 0 : index
    %2 = vector.load %arg2[%c0_2, %c0_3, %c0_4] : memref<2x16x64xbf16, #tpu.memory_space<vmem>>, vector<1x16x64xbf16>
    %3 = vector.shape_cast %2 : vector<1x16x64xbf16> to vector<16x64xbf16>
    %cst = arith.constant dense<0.000000e+00> : vector<8x2x64xf32>
    %4 = tpu.matmul %1, %3, %cst {dimension_numbers = #tpu.dot_dimension_numbers<[2], [0], [0, 1], [1], [0, 0, 0, 1, 1, 1], [], []>} : vector<8x2x16xbf16>, vector<16x64xbf16>, vector<8x2x64xf32> -> vector<8x2x64xf32>
    %c0_5 = arith.constant 0 : index
    %c0_6 = arith.constant 0 : index
    %c0_7 = arith.constant 0 : index
    %5 = vector.load %arg21[%c0_5, %c0_6, %c0_7] : memref<8x2x64xf32, #tpu.memory_space<vmem>>, vector<8x2x64xf32>
    tpu.vector_store %arg21[%c0_5, %c0_6, %c0_7], %4 {strides = array<i32>} : memref<8x2x64xf32, #tpu.memory_space<vmem>>, vector<8x2x64xf32>,
    %c1 = arith.constant 1 : index
    %c0_8 = arith.constant 0 : index
    %c0_9 = arith.constant 0 : index
    %6 = vector.load %arg2[%c1, %c0_8, %c0_9] : memref<2x16x64xbf16, #tpu.memory_space<vmem>>, vector<1x16x64xbf16>
    %7 = vector.shape_cast %6 : vector<1x16x64xbf16> to vector<16x64xbf16>
    %cst_10 = arith.constant dense<0.000000e+00> : vector<8x2x64xf32>
    %8 = tpu.matmul %1, %7, %cst_10 {dimension_numbers = #tpu.dot_dimension_numbers<[2], [0], [0, 1], [1], [0, 0, 0, 1, 1, 1], [], []>} : vector<8x2x16xbf16>, vector<16x64xbf16>, vector<8x2x64xf32> -> vector<8x2x64xf32>
    %c0_11 = arith.constant 0 : index
    %c0_12 = arith.constant 0 : index
    %c0_13 = arith.constant 0 : index
    %9 = vector.load %arg22[%c0_11, %c0_12, %c0_13] : memref<8x2x64xf32, #tpu.memory_space<vmem>>, vector<8x2x64xf32>
    tpu.vector_store %arg22[%c0_11, %c0_12, %c0_13], %8 {strides = array<i32>} : memref<8x2x64xf32, #tpu.memory_space<vmem>>, vector<8x2x64xf32>,
    %c0_14 = arith.constant 0 : index
    %c0_15 = arith.constant 0 : index
    %c0_16 = arith.constant 0 : index
    %10 = vector.load %arg3[%c0_14, %c0_15, %c0_16] : memref<2x16x64xf32, #tpu.memory_space<vmem>>, vector<1x16x64xf32>
    %11 = vector.shape_cast %10 : vector<1x16x64xf32> to vector<16x64xf32>
    %c0_17 = arith.constant 0 : index
    %c0_18 = arith.constant 0 : index
    %c0_19 = arith.constant 0 : index
    %12 = vector.load %arg4[%c0_17, %c0_18, %c0_19] : memref<2x1x64xf32, #tpu.memory_space<vmem>>, vector<1x1x64xf32>
    %13 = vector.shape_cast %12 : vector<1x1x64xf32> to vector<1x64xf32>
    %cst_20 = arith.constant 0.000000e+00 : f32
    %14 = vector.broadcast %cst_20 : f32 to vector<2x16xf32>
    %cst_21 = arith.constant 0.000000e+00 : f32
    %15 = vector.broadcast %cst_21 : f32 to vector<2x16xf32>
    %c0_22 = arith.constant 0 : index
    %c0_23 = arith.constant 0 : index
    %c0_24 = arith.constant 0 : index
    %16 = vector.load %arg21[%c0_22, %c0_23, %c0_24] : memref<8x2x64xf32, #tpu.memory_space<vmem>>, vector<1x2x64xf32>
    %17 = vector.shape_cast %16 : vector<1x2x64xf32> to vector<2x64xf32>
    %cst_25 = arith.constant dense<0.000000e+00> : vector<2x64xf32>
    %18 = tpu.matmul %14, %11, %cst_25 {dimension_numbers = #tpu.dot_dimension_numbers<[1], [0], [0], [1], [0, 0, 1, 1], [], []>} : vector<2x16xf32>, vector<16x64xf32>, vector<2x64xf32> -> vector<2x64xf32>
    %19 = arith.addf %17, %18 : vector<2x64xf32>
    %20 = vector.broadcast %13 : vector<1x64xf32> to vector<2x64xf32>
    %21 = arith.addf %19, %20 : vector<2x64xf32>
    %22 = vector.extract_strided_slice %21 {offsets = [0, 0], sizes = [2, 16], strides = [1, 1]} : vector<2x64xf32> to vector<2x16xf32>
    %23 = arith.negf %22 : vector<2x16xf32>
    %24 = math.exp %23 : vector<2x16xf32>
    %cst_26 = arith.constant 1.000000e+00 : f32
    %25 = vector.broadcast %cst_26 : f32 to vector<2x16xf32>
    %26 = arith.addf %25, %24 : vector<2x16xf32>
    %27 = arith.divf %25, %26 : vector<2x16xf32>
    %28 = vector.extract_strided_slice %21 {offsets = [0, 16], sizes = [2, 16], strides = [1, 1]} : vector<2x64xf32> to vector<2x16xf32>
    %29 = arith.negf %28 : vector<2x16xf32>
    %30 = math.exp %29 : vector<2x16xf32>
    %cst_27 = arith.constant 1.000000e+00 : f32
    %31 = vector.broadcast %cst_27 : f32 to vector<2x16xf32>
    %32 = arith.addf %31, %30 : vector<2x16xf32>
    %33 = arith.divf %31, %32 : vector<2x16xf32>
    %34 = vector.extract_strided_slice %21 {offsets = [0, 32], sizes = [2, 16], strides = [1, 1]} : vector<2x64xf32> to vector<2x16xf32>
    %35 = math.tanh %34 : vector<2x16xf32>
    %36 = vector.extract_strided_slice %21 {offsets = [0, 48], sizes = [2, 16], strides = [1, 1]} : vector<2x64xf32> to vector<2x16xf32>
    %37 = arith.negf %36 : vector<2x16xf32>
    %38 = math.exp %37 : vector<2x16xf32>
    %cst_28 = arith.constant 1.000000e+00 : f32
    %39 = vector.broadcast %cst_28 : f32 to vector<2x16xf32>
    %40 = arith.addf %39, %38 : vector<2x16xf32>
    %41 = arith.divf %39, %40 : vector<2x16xf32>
    %42 = arith.mulf %33, %15 : vector<2x16xf32>
    %43 = arith.mulf %27, %35 : vector<2x16xf32>
    %44 = arith.addf %42, %43 : vector<2x16xf32>
    %45 = math.tanh %44 : vector<2x16xf32>
    %46 = arith.mulf %41, %45 : vector<2x16xf32>
    %c0_29 = arith.constant 0 : index
    %c0_30 = arith.constant 0 : index
    %c0_31 = arith.constant 0 : index
    %47 = vector.load %arg23[%c0_29, %c0_30, %c0_31] : memref<8x2x16xf32, #tpu.memory_space<vmem>>, vector<1x2x16xf32>
    %48 = vector.shape_cast %47 : vector<1x2x16xf32> to vector<2x16xf32>
    %49 = vector.shape_cast %46 : vector<2x16xf32> to vector<1x2x16xf32>
    tpu.vector_store %arg23[%c0_29, %c0_30, %c0_31], %49 {strides = array<i32>} : memref<8x2x16xf32, #tpu.memory_space<vmem>>, vector<1x2x16xf32>,
    %c1_32 = arith.constant 1 : index
    %c0_33 = arith.constant 0 : index
    %c0_34 = arith.constant 0 : index
    %50 = vector.load %arg21[%c1_32, %c0_33, %c0_34] : memref<8x2x64xf32, #tpu.memory_space<vmem>>, vector<1x2x64xf32>
    %51 = vector.shape_cast %50 : vector<1x2x64xf32> to vector<2x64xf32>
    %cst_35 = arith.constant dense<0.000000e+00> : vector<2x64xf32>
    %52 = tpu.matmul %46, %11, %cst_35 {dimension_numbers = #tpu.dot_dimension_numbers<[1], [0], [0], [1], [0, 0, 1, 1], [], []>} : vector<2x16xf32>, vector<16x64xf32>, vector<2x64xf32> -> vector<2x64xf32>
    %53 = arith.addf %51, %52 : vector<2x64xf32>
    %54 = vector.broadcast %13 : vector<1x64xf32> to vector<2x64xf32>
    %55 = arith.addf %53, %54 : vector<2x64xf32>
    %56 = vector.extract_strided_slice %55 {offsets = [0, 0], sizes = [2, 16], strides = [1, 1]} : vector<2x64xf32> to vector<2x16xf32>
    %57 = arith.negf %56 : vector<2x16xf32>
    %58 = math.exp %57 : vector<2x16xf32>
    %cst_36 = arith.constant 1.000000e+00 : f32
    %59 = vector.broadcast %cst_36 : f32 to vector<2x16xf32>
    %60 = arith.addf %59, %58 : vector<2x16xf32>
    %61 = arith.divf %59, %60 : vector<2x16xf32>
    %62 = vector.extract_strided_slice %55 {offsets = [0, 16], sizes = [2, 16], strides = [1, 1]} : vector<2x64xf32> to vector<2x16xf32>
    %63 = arith.negf %62 : vector<2x16xf32>
    %64 = math.exp %63 : vector<2x16xf32>
    %cst_37 = arith.constant 1.000000e+00 : f32
    %65 = vector.broadcast %cst_37 : f32 to vector<2x16xf32>
    %66 = arith.addf %65, %64 : vector<2x16xf32>
    %67 = arith.divf %65, %66 : vector<2x16xf32>
    %68 = vector.extract_strided_slice %55 {offsets = [0, 32], sizes = [2, 16], strides = [1, 1]} : vector<2x64xf32> to vector<2x16xf32>
    %69 = math.tanh %68 : vector<2x16xf32>
    %70 = vector.extract_strided_slice %55 {offsets = [0, 48], sizes = [2, 16], strides = [1, 1]} : vector<2x64xf32> to vector<2x16xf32>
    %71 = arith.negf %70 : vector<2x16xf32>
    %72 = math.exp %71 : vector<2x16xf32>
    %cst_38 = arith.constant 1.000000e+00 : f32
    %73 = vector.broadcast %cst_38 : f32 to vector<2x16xf32>
    %74 = arith.addf %73, %72 : vector<2x16xf32>
    %75 = arith.divf %73, %74 : vector<2x16xf32>
    %76 = arith.mulf %67, %44 : vector<2x16xf32>
    %77 = arith.mulf %61, %69 : vector<2x16xf32>
    %78 = arith.addf %76, %77 : vector<2x16xf32>
    %79 = math.tanh %78 : vector<2x16xf32>
    %80 = arith.mulf %75, %79 : vector<2x16xf32>
    %c1_39 = arith.constant 1 : index
    %c0_40 = arith.constant 0 : index
    %c0_41 = arith.constant 0 : index
    %81 = vector.load %arg23[%c1_39, %c0_40, %c0_41] : memref<8x2x16xf32, #tpu.memory_space<vmem>>, vector<1x2x16xf32>
    %82 = vector.shape_cast %81 : vector<1x2x16xf32> to vector<2x16xf32>
    %83 = vector.shape_cast %80 : vector<2x16xf32> to vector<1x2x16xf32>
    tpu.vector_store %arg23[%c1_39, %c0_40, %c0_41], %83 {strides = array<i32>} : memref<8x2x16xf32, #tpu.memory_space<vmem>>, vector<1x2x16xf32>,
    %c2 = arith.constant 2 : index
    %c0_42 = arith.constant 0 : index
    %c0_43 = arith.constant 0 : index
    %84 = vector.load %arg21[%c2, %c0_42, %c0_43] : memref<8x2x64xf32, #tpu.memory_space<vmem>>, vector<1x2x64xf32>
    %85 = vector.shape_cast %84 : vector<1x2x64xf32> to vector<2x64xf32>
    %cst_44 = arith.constant dense<0.000000e+00> : vector<2x64xf32>
    %86 = tpu.matmul %80, %11, %cst_44 {dimension_numbers = #tpu.dot_dimension_numbers<[1], [0], [0], [1], [0, 0, 1, 1], [], []>} : vector<2x16xf32>, vector<16x64xf32>, vector<2x64xf32> -> vector<2x64xf32>
    %87 = arith.addf %85, %86 : vector<2x64xf32>
    %88 = vector.broadcast %13 : vector<1x64xf32> to vector<2x64xf32>
    %89 = arith.addf %87, %88 : vector<2x64xf32>
    %90 = vector.extract_strided_slice %89 {offsets = [0, 0], sizes = [2, 16], strides = [1, 1]} : vector<2x64xf32> to vector<2x16xf32>
    %91 = arith.negf %90 : vector<2x16xf32>
    %92 = math.exp %91 : vector<2x16xf32>
    %cst_45 = arith.constant 1.000000e+00 : f32
    %93 = vector.broadcast %cst_45 : f32 to vector<2x16xf32>
    %94 = arith.addf %93, %92 : vector<2x16xf32>
    %95 = arith.divf %93, %94 : vector<2x16xf32>
    %96 = vector.extract_strided_slice %89 {offsets = [0, 16], sizes = [2, 16], strides = [1, 1]} : vector<2x64xf32> to vector<2x16xf32>
    %97 = arith.negf %96 : vector<2x16xf32>
    %98 = math.exp %97 : vector<2x16xf32>
    %cst_46 = arith.constant 1.000000e+00 : f32
    %99 = vector.broadcast %cst_46 : f32 to vector<2x16xf32>
    %100 = arith.addf %99, %98 : vector<2x16xf32>
    %101 = arith.divf %99, %100 : vector<2x16xf32>
    %102 = vector.extract_strided_slice %89 {offsets = [0, 32], sizes = [2, 16], strides = [1, 1]} : vector<2x64xf32> to vector<2x16xf32>
    %103 = math.tanh %102 : vector<2x16xf32>
    %104 = vector.extract_strided_slice %89 {offsets = [0, 48], sizes = [2, 16], strides = [1, 1]} : vector<2x64xf32> to vector<2x16xf32>
    %105 = arith.negf %104 : vector<2x16xf32>
    %106 = math.exp %105 : vector<2x16xf32>
    %cst_47 = arith.constant 1.000000e+00 : f32
    %107 = vector.broadcast %cst_47 : f32 to vector<2x16xf32>
    %108 = arith.addf %107, %106 : vector<2x16xf32>
    %109 = arith.divf %107, %108 : vector<2x16xf32>
    %110 = arith.mulf %101, %78 : vector<2x16xf32>
    %111 = arith.mulf %95, %103 : vector<2x16xf32>
    %112 = arith.addf %110, %111 : vector<2x16xf32>
    %113 = math.tanh %112 : vector<2x16xf32>
    %114 = arith.mulf %109, %113 : vector<2x16xf32>
    %c2_48 = arith.constant 2 : index
    %c0_49 = arith.constant 0 : index
    %c0_50 = arith.constant 0 : index
    %115 = vector.load %arg23[%c2_48, %c0_49, %c0_50] : memref<8x2x16xf32, #tpu.memory_space<vmem>>, vector<1x2x16xf32>
    %116 = vector.shape_cast %115 : vector<1x2x16xf32> to vector<2x16xf32>
    %117 = vector.shape_cast %114 : vector<2x16xf32> to vector<1x2x16xf32>
    tpu.vector_store %arg23[%c2_48, %c0_49, %c0_50], %117 {strides = array<i32>} : memref<8x2x16xf32, #tpu.memory_space<vmem>>, vector<1x2x16xf32>,
    %c3 = arith.constant 3 : index
    %c0_51 = arith.constant 0 : index
    %c0_52 = arith.constant 0 : index
    %118 = vector.load %arg21[%c3, %c0_51, %c0_52] : memref<8x2x64xf32, #tpu.memory_space<vmem>>, vector<1x2x64xf32>
    %119 = vector.shape_cast %118 : vector<1x2x64xf32> to vector<2x64xf32>
    %cst_53 = arith.constant dense<0.000000e+00> : vector<2x64xf32>
    %120 = tpu.matmul %114, %11, %cst_53 {dimension_numbers = #tpu.dot_dimension_numbers<[1], [0], [0], [1], [0, 0, 1, 1], [], []>} : vector<2x16xf32>, vector<16x64xf32>, vector<2x64xf32> -> vector<2x64xf32>
    %121 = arith.addf %119, %120 : vector<2x64xf32>
    %122 = vector.broadcast %13 : vector<1x64xf32> to vector<2x64xf32>
    %123 = arith.addf %121, %122 : vector<2x64xf32>
    %124 = vector.extract_strided_slice %123 {offsets = [0, 0], sizes = [2, 16], strides = [1, 1]} : vector<2x64xf32> to vector<2x16xf32>
    %125 = arith.negf %124 : vector<2x16xf32>
    %126 = math.exp %125 : vector<2x16xf32>
    %cst_54 = arith.constant 1.000000e+00 : f32
    %127 = vector.broadcast %cst_54 : f32 to vector<2x16xf32>
    %128 = arith.addf %127, %126 : vector<2x16xf32>
    %129 = arith.divf %127, %128 : vector<2x16xf32>
    %130 = vector.extract_strided_slice %123 {offsets = [0, 16], sizes = [2, 16], strides = [1, 1]} : vector<2x64xf32> to vector<2x16xf32>
    %131 = arith.negf %130 : vector<2x16xf32>
    %132 = math.exp %131 : vector<2x16xf32>
    %cst_55 = arith.constant 1.000000e+00 : f32
    %133 = vector.broadcast %cst_55 : f32 to vector<2x16xf32>
    %134 = arith.addf %133, %132 : vector<2x16xf32>
    %135 = arith.divf %133, %134 : vector<2x16xf32>
    %136 = vector.extract_strided_slice %123 {offsets = [0, 32], sizes = [2, 16], strides = [1, 1]} : vector<2x64xf32> to vector<2x16xf32>
    %137 = math.tanh %136 : vector<2x16xf32>
    %138 = vector.extract_strided_slice %123 {offsets = [0, 48], sizes = [2, 16], strides = [1, 1]} : vector<2x64xf32> to vector<2x16xf32>
    %139 = arith.negf %138 : vector<2x16xf32>
    %140 = math.exp %139 : vector<2x16xf32>
    %cst_56 = arith.constant 1.000000e+00 : f32
    %141 = vector.broadcast %cst_56 : f32 to vector<2x16xf32>
    %142 = arith.addf %141, %140 : vector<2x16xf32>
    %143 = arith.divf %141, %142 : vector<2x16xf32>
    %144 = arith.mulf %135, %112 : vector<2x16xf32>
    %145 = arith.mulf %129, %137 : vector<2x16xf32>
    %146 = arith.addf %144, %145 : vector<2x16xf32>
    %147 = math.tanh %146 : vector<2x16xf32>
    %148 = arith.mulf %143, %147 : vector<2x16xf32>
    %c3_57 = arith.constant 3 : index
    %c0_58 = arith.constant 0 : index
    %c0_59 = arith.constant 0 : index
    %149 = vector.load %arg23[%c3_57, %c0_58, %c0_59] : memref<8x2x16xf32, #tpu.memory_space<vmem>>, vector<1x2x16xf32>
    %150 = vector.shape_cast %149 : vector<1x2x16xf32> to vector<2x16xf32>
    %151 = vector.shape_cast %148 : vector<2x16xf32> to vector<1x2x16xf32>
    tpu.vector_store %arg23[%c3_57, %c0_58, %c0_59], %151 {strides = array<i32>} : memref<8x2x16xf32, #tpu.memory_space<vmem>>, vector<1x2x16xf32>,
    %c4 = arith.constant 4 : index
    %c0_60 = arith.constant 0 : index
    %c0_61 = arith.constant 0 : index
    %152 = vector.load %arg21[%c4, %c0_60, %c0_61] : memref<8x2x64xf32, #tpu.memory_space<vmem>>, vector<1x2x64xf32>
    %153 = vector.shape_cast %152 : vector<1x2x64xf32> to vector<2x64xf32>
    %cst_62 = arith.constant dense<0.000000e+00> : vector<2x64xf32>
    %154 = tpu.matmul %148, %11, %cst_62 {dimension_numbers = #tpu.dot_dimension_numbers<[1], [0], [0], [1], [0, 0, 1, 1], [], []>} : vector<2x16xf32>, vector<16x64xf32>, vector<2x64xf32> -> vector<2x64xf32>
    %155 = arith.addf %153, %154 : vector<2x64xf32>
    %156 = vector.broadcast %13 : vector<1x64xf32> to vector<2x64xf32>
    %157 = arith.addf %155, %156 : vector<2x64xf32>
    %158 = vector.extract_strided_slice %157 {offsets = [0, 0], sizes = [2, 16], strides = [1, 1]} : vector<2x64xf32> to vector<2x16xf32>
    %159 = arith.negf %158 : vector<2x16xf32>
    %160 = math.exp %159 : vector<2x16xf32>
    %cst_63 = arith.constant 1.000000e+00 : f32
    %161 = vector.broadcast %cst_63 : f32 to vector<2x16xf32>
    %162 = arith.addf %161, %160 : vector<2x16xf32>
    %163 = arith.divf %161, %162 : vector<2x16xf32>
    %164 = vector.extract_strided_slice %157 {offsets = [0, 16], sizes = [2, 16], strides = [1, 1]} : vector<2x64xf32> to vector<2x16xf32>
    %165 = arith.negf %164 : vector<2x16xf32>
    %166 = math.exp %165 : vector<2x16xf32>
    %cst_64 = arith.constant 1.000000e+00 : f32
    %167 = vector.broadcast %cst_64 : f32 to vector<2x16xf32>
    %168 = arith.addf %167, %166 : vector<2x16xf32>
    %169 = arith.divf %167, %168 : vector<2x16xf32>
    %170 = vector.extract_strided_slice %157 {offsets = [0, 32], sizes = [2, 16], strides = [1, 1]} : vector<2x64xf32> to vector<2x16xf32>
    %171 = math.tanh %170 : vector<2x16xf32>
    %172 = vector.extract_strided_slice %157 {offsets = [0, 48], sizes = [2, 16], strides = [1, 1]} : vector<2x64xf32> to vector<2x16xf32>
    %173 = arith.negf %172 : vector<2x16xf32>
    %174 = math.exp %173 : vector<2x16xf32>
    %cst_65 = arith.constant 1.000000e+00 : f32
    %175 = vector.broadcast %cst_65 : f32 to vector<2x16xf32>
    %176 = arith.addf %175, %174 : vector<2x16xf32>
    %177 = arith.divf %175, %176 : vector<2x16xf32>
    %178 = arith.mulf %169, %146 : vector<2x16xf32>
    %179 = arith.mulf %163, %171 : vector<2x16xf32>
    %180 = arith.addf %178, %179 : vector<2x16xf32>
    %181 = math.tanh %180 : vector<2x16xf32>
    %182 = arith.mulf %177, %181 : vector<2x16xf32>
    %c4_66 = arith.constant 4 : index
    %c0_67 = arith.constant 0 : index
    %c0_68 = arith.constant 0 : index
    %183 = vector.load %arg23[%c4_66, %c0_67, %c0_68] : memref<8x2x16xf32, #tpu.memory_space<vmem>>, vector<1x2x16xf32>
    %184 = vector.shape_cast %183 : vector<1x2x16xf32> to vector<2x16xf32>
    %185 = vector.shape_cast %182 : vector<2x16xf32> to vector<1x2x16xf32>
    tpu.vector_store %arg23[%c4_66, %c0_67, %c0_68], %185 {strides = array<i32>} : memref<8x2x16xf32, #tpu.memory_space<vmem>>, vector<1x2x16xf32>,
    %c5 = arith.constant 5 : index
    %c0_69 = arith.constant 0 : index
    %c0_70 = arith.constant 0 : index
    %186 = vector.load %arg21[%c5, %c0_69, %c0_70] : memref<8x2x64xf32, #tpu.memory_space<vmem>>, vector<1x2x64xf32>
    %187 = vector.shape_cast %186 : vector<1x2x64xf32> to vector<2x64xf32>
    %cst_71 = arith.constant dense<0.000000e+00> : vector<2x64xf32>
    %188 = tpu.matmul %182, %11, %cst_71 {dimension_numbers = #tpu.dot_dimension_numbers<[1], [0], [0], [1], [0, 0, 1, 1], [], []>} : vector<2x16xf32>, vector<16x64xf32>, vector<2x64xf32> -> vector<2x64xf32>
    %189 = arith.addf %187, %188 : vector<2x64xf32>
    %190 = vector.broadcast %13 : vector<1x64xf32> to vector<2x64xf32>
    %191 = arith.addf %189, %190 : vector<2x64xf32>
    %192 = vector.extract_strided_slice %191 {offsets = [0, 0], sizes = [2, 16], strides = [1, 1]} : vector<2x64xf32> to vector<2x16xf32>
    %193 = arith.negf %192 : vector<2x16xf32>
    %194 = math.exp %193 : vector<2x16xf32>
    %cst_72 = arith.constant 1.000000e+00 : f32
    %195 = vector.broadcast %cst_72 : f32 to vector<2x16xf32>
    %196 = arith.addf %195, %194 : vector<2x16xf32>
    %197 = arith.divf %195, %196 : vector<2x16xf32>
    %198 = vector.extract_strided_slice %191 {offsets = [0, 16], sizes = [2, 16], strides = [1, 1]} : vector<2x64xf32> to vector<2x16xf32>
    %199 = arith.negf %198 : vector<2x16xf32>
    %200 = math.exp %199 : vector<2x16xf32>
    %cst_73 = arith.constant 1.000000e+00 : f32
    %201 = vector.broadcast %cst_73 : f32 to vector<2x16xf32>
    %202 = arith.addf %201, %200 : vector<2x16xf32>
    %203 = arith.divf %201, %202 : vector<2x16xf32>
    %204 = vector.extract_strided_slice %191 {offsets = [0, 32], sizes = [2, 16], strides = [1, 1]} : vector<2x64xf32> to vector<2x16xf32>
    %205 = math.tanh %204 : vector<2x16xf32>
    %206 = vector.extract_strided_slice %191 {offsets = [0, 48], sizes = [2, 16], strides = [1, 1]} : vector<2x64xf32> to vector<2x16xf32>
    %207 = arith.negf %206 : vector<2x16xf32>
    %208 = math.exp %207 : vector<2x16xf32>
    %cst_74 = arith.constant 1.000000e+00 : f32
    %209 = vector.broadcast %cst_74 : f32 to vector<2x16xf32>
    %210 = arith.addf %209, %208 : vector<2x16xf32>
    %211 = arith.divf %209, %210 : vector<2x16xf32>
    %212 = arith.mulf %203, %180 : vector<2x16xf32>
    %213 = arith.mulf %197, %205 : vector<2x16xf32>
    %214 = arith.addf %212, %213 : vector<2x16xf32>
    %215 = math.tanh %214 : vector<2x16xf32>
    %216 = arith.mulf %211, %215 : vector<2x16xf32>
    %c5_75 = arith.constant 5 : index
    %c0_76 = arith.constant 0 : index
    %c0_77 = arith.constant 0 : index
    %217 = vector.load %arg23[%c5_75, %c0_76, %c0_77] : memref<8x2x16xf32, #tpu.memory_space<vmem>>, vector<1x2x16xf32>
    %218 = vector.shape_cast %217 : vector<1x2x16xf32> to vector<2x16xf32>
    %219 = vector.shape_cast %216 : vector<2x16xf32> to vector<1x2x16xf32>
    tpu.vector_store %arg23[%c5_75, %c0_76, %c0_77], %219 {strides = array<i32>} : memref<8x2x16xf32, #tpu.memory_space<vmem>>, vector<1x2x16xf32>,
    %c6 = arith.constant 6 : index
    %c0_78 = arith.constant 0 : index
    %c0_79 = arith.constant 0 : index
    %220 = vector.load %arg21[%c6, %c0_78, %c0_79] : memref<8x2x64xf32, #tpu.memory_space<vmem>>, vector<1x2x64xf32>
    %221 = vector.shape_cast %220 : vector<1x2x64xf32> to vector<2x64xf32>
    %cst_80 = arith.constant dense<0.000000e+00> : vector<2x64xf32>
    %222 = tpu.matmul %216, %11, %cst_80 {dimension_numbers = #tpu.dot_dimension_numbers<[1], [0], [0], [1], [0, 0, 1, 1], [], []>} : vector<2x16xf32>, vector<16x64xf32>, vector<2x64xf32> -> vector<2x64xf32>
    %223 = arith.addf %221, %222 : vector<2x64xf32>
    %224 = vector.broadcast %13 : vector<1x64xf32> to vector<2x64xf32>
    %225 = arith.addf %223, %224 : vector<2x64xf32>
    %226 = vector.extract_strided_slice %225 {offsets = [0, 0], sizes = [2, 16], strides = [1, 1]} : vector<2x64xf32> to vector<2x16xf32>
    %227 = arith.negf %226 : vector<2x16xf32>
    %228 = math.exp %227 : vector<2x16xf32>
    %cst_81 = arith.constant 1.000000e+00 : f32
    %229 = vector.broadcast %cst_81 : f32 to vector<2x16xf32>
    %230 = arith.addf %229, %228 : vector<2x16xf32>
    %231 = arith.divf %229, %230 : vector<2x16xf32>
    %232 = vector.extract_strided_slice %225 {offsets = [0, 16], sizes = [2, 16], strides = [1, 1]} : vector<2x64xf32> to vector<2x16xf32>
    %233 = arith.negf %232 : vector<2x16xf32>
    %234 = math.exp %233 : vector<2x16xf32>
    %cst_82 = arith.constant 1.000000e+00 : f32
    %235 = vector.broadcast %cst_82 : f32 to vector<2x16xf32>
    %236 = arith.addf %235, %234 : vector<2x16xf32>
    %237 = arith.divf %235, %236 : vector<2x16xf32>
    %238 = vector.extract_strided_slice %225 {offsets = [0, 32], sizes = [2, 16], strides = [1, 1]} : vector<2x64xf32> to vector<2x16xf32>
    %239 = math.tanh %238 : vector<2x16xf32>
    %240 = vector.extract_strided_slice %225 {offsets = [0, 48], sizes = [2, 16], strides = [1, 1]} : vector<2x64xf32> to vector<2x16xf32>
    %241 = arith.negf %240 : vector<2x16xf32>
    %242 = math.exp %241 : vector<2x16xf32>
    %cst_83 = arith.constant 1.000000e+00 : f32
    %243 = vector.broadcast %cst_83 : f32 to vector<2x16xf32>
    %244 = arith.addf %243, %242 : vector<2x16xf32>
    %245 = arith.divf %243, %244 : vector<2x16xf32>
    %246 = arith.mulf %237, %214 : vector<2x16xf32>
    %247 = arith.mulf %231, %239 : vector<2x16xf32>
    %248 = arith.addf %246, %247 : vector<2x16xf32>
    %249 = math.tanh %248 : vector<2x16xf32>
    %250 = arith.mulf %245, %249 : vector<2x16xf32>
    %c6_84 = arith.constant 6 : index
    %c0_85 = arith.constant 0 : index
    %c0_86 = arith.constant 0 : index
    %251 = vector.load %arg23[%c6_84, %c0_85, %c0_86] : memref<8x2x16xf32, #tpu.memory_space<vmem>>, vector<1x2x16xf32>
    %252 = vector.shape_cast %251 : vector<1x2x16xf32> to vector<2x16xf32>
    %253 = vector.shape_cast %250 : vector<2x16xf32> to vector<1x2x16xf32>
    tpu.vector_store %arg23[%c6_84, %c0_85, %c0_86], %253 {strides = array<i32>} : memref<8x2x16xf32, #tpu.memory_space<vmem>>, vector<1x2x16xf32>,
    %c7 = arith.constant 7 : index
    %c0_87 = arith.constant 0 : index
    %c0_88 = arith.constant 0 : index
    %254 = vector.load %arg21[%c7, %c0_87, %c0_88] : memref<8x2x64xf32, #tpu.memory_space<vmem>>, vector<1x2x64xf32>
    %255 = vector.shape_cast %254 : vector<1x2x64xf32> to vector<2x64xf32>
    %cst_89 = arith.constant dense<0.000000e+00> : vector<2x64xf32>
    %256 = tpu.matmul %250, %11, %cst_89 {dimension_numbers = #tpu.dot_dimension_numbers<[1], [0], [0], [1], [0, 0, 1, 1], [], []>} : vector<2x16xf32>, vector<16x64xf32>, vector<2x64xf32> -> vector<2x64xf32>
    %257 = arith.addf %255, %256 : vector<2x64xf32>
    %258 = vector.broadcast %13 : vector<1x64xf32> to vector<2x64xf32>
    %259 = arith.addf %257, %258 : vector<2x64xf32>
    %260 = vector.extract_strided_slice %259 {offsets = [0, 0], sizes = [2, 16], strides = [1, 1]} : vector<2x64xf32> to vector<2x16xf32>
    %261 = arith.negf %260 : vector<2x16xf32>
    %262 = math.exp %261 : vector<2x16xf32>
    %cst_90 = arith.constant 1.000000e+00 : f32
    %263 = vector.broadcast %cst_90 : f32 to vector<2x16xf32>
    %264 = arith.addf %263, %262 : vector<2x16xf32>
    %265 = arith.divf %263, %264 : vector<2x16xf32>
    %266 = vector.extract_strided_slice %259 {offsets = [0, 16], sizes = [2, 16], strides = [1, 1]} : vector<2x64xf32> to vector<2x16xf32>
    %267 = arith.negf %266 : vector<2x16xf32>
    %268 = math.exp %267 : vector<2x16xf32>
    %cst_91 = arith.constant 1.000000e+00 : f32
    %269 = vector.broadcast %cst_91 : f32 to vector<2x16xf32>
    %270 = arith.addf %269, %268 : vector<2x16xf32>
    %271 = arith.divf %269, %270 : vector<2x16xf32>
    %272 = vector.extract_strided_slice %259 {offsets = [0, 32], sizes = [2, 16], strides = [1, 1]} : vector<2x64xf32> to vector<2x16xf32>
    %273 = math.tanh %272 : vector<2x16xf32>
    %274 = vector.extract_strided_slice %259 {offsets = [0, 48], sizes = [2, 16], strides = [1, 1]} : vector<2x64xf32> to vector<2x16xf32>
    %275 = arith.negf %274 : vector<2x16xf32>
    %276 = math.exp %275 : vector<2x16xf32>
    %cst_92 = arith.constant 1.000000e+00 : f32
    %277 = vector.broadcast %cst_92 : f32 to vector<2x16xf32>
    %278 = arith.addf %277, %276 : vector<2x16xf32>
    %279 = arith.divf %277, %278 : vector<2x16xf32>
    %280 = arith.mulf %271, %248 : vector<2x16xf32>
    %281 = arith.mulf %265, %273 : vector<2x16xf32>
    %282 = arith.addf %280, %281 : vector<2x16xf32>
    %283 = math.tanh %282 : vector<2x16xf32>
    %284 = arith.mulf %279, %283 : vector<2x16xf32>
    %c7_93 = arith.constant 7 : index
    %c0_94 = arith.constant 0 : index
    %c0_95 = arith.constant 0 : index
    %285 = vector.load %arg23[%c7_93, %c0_94, %c0_95] : memref<8x2x16xf32, #tpu.memory_space<vmem>>, vector<1x2x16xf32>
    %286 = vector.shape_cast %285 : vector<1x2x16xf32> to vector<2x16xf32>
    %287 = vector.shape_cast %284 : vector<2x16xf32> to vector<1x2x16xf32>
    tpu.vector_store %arg23[%c7_93, %c0_94, %c0_95], %287 {strides = array<i32>} : memref<8x2x16xf32, #tpu.memory_space<vmem>>, vector<1x2x16xf32>,
    %c1_96 = arith.constant 1 : index
    %c0_97 = arith.constant 0 : index
    %c0_98 = arith.constant 0 : index
    %288 = vector.load %arg3[%c1_96, %c0_97, %c0_98] : memref<2x16x64xf32, #tpu.memory_space<vmem>>, vector<1x16x64xf32>
    %289 = vector.shape_cast %288 : vector<1x16x64xf32> to vector<16x64xf32>
    %c1_99 = arith.constant 1 : index
    %c0_100 = arith.constant 0 : index
    %c0_101 = arith.constant 0 : index
    %290 = vector.load %arg4[%c1_99, %c0_100, %c0_101] : memref<2x1x64xf32, #tpu.memory_space<vmem>>, vector<1x1x64xf32>
    %291 = vector.shape_cast %290 : vector<1x1x64xf32> to vector<1x64xf32>
    %cst_102 = arith.constant 0.000000e+00 : f32
    %292 = vector.broadcast %cst_102 : f32 to vector<2x16xf32>
    %cst_103 = arith.constant 0.000000e+00 : f32
    %293 = vector.broadcast %cst_103 : f32 to vector<2x16xf32>
    %c7_104 = arith.constant 7 : index
    %c0_105 = arith.constant 0 : index
    %c0_106 = arith.constant 0 : index
    %294 = vector.load %arg22[%c7_104, %c0_105, %c0_106] : memref<8x2x64xf32, #tpu.memory_space<vmem>>, vector<1x2x64xf32>
    %295 = vector.shape_cast %294 : vector<1x2x64xf32> to vector<2x64xf32>
    %cst_107 = arith.constant dense<0.000000e+00> : vector<2x64xf32>
    %296 = tpu.matmul %292, %289, %cst_107 {dimension_numbers = #tpu.dot_dimension_numbers<[1], [0], [0], [1], [0, 0, 1, 1], [], []>} : vector<2x16xf32>, vector<16x64xf32>, vector<2x64xf32> -> vector<2x64xf32>
    %297 = arith.addf %295, %296 : vector<2x64xf32>
    %298 = vector.broadcast %291 : vector<1x64xf32> to vector<2x64xf32>
    %299 = arith.addf %297, %298 : vector<2x64xf32>
    %300 = vector.extract_strided_slice %299 {offsets = [0, 0], sizes = [2, 16], strides = [1, 1]} : vector<2x64xf32> to vector<2x16xf32>
    %301 = arith.negf %300 : vector<2x16xf32>
    %302 = math.exp %301 : vector<2x16xf32>
    %cst_108 = arith.constant 1.000000e+00 : f32
    %303 = vector.broadcast %cst_108 : f32 to vector<2x16xf32>
    %304 = arith.addf %303, %302 : vector<2x16xf32>
    %305 = arith.divf %303, %304 : vector<2x16xf32>
    %306 = vector.extract_strided_slice %299 {offsets = [0, 16], sizes = [2, 16], strides = [1, 1]} : vector<2x64xf32> to vector<2x16xf32>
    %307 = arith.negf %306 : vector<2x16xf32>
    %308 = math.exp %307 : vector<2x16xf32>
    %cst_109 = arith.constant 1.000000e+00 : f32
    %309 = vector.broadcast %cst_109 : f32 to vector<2x16xf32>
    %310 = arith.addf %309, %308 : vector<2x16xf32>
    %311 = arith.divf %309, %310 : vector<2x16xf32>
    %312 = vector.extract_strided_slice %299 {offsets = [0, 32], sizes = [2, 16], strides = [1, 1]} : vector<2x64xf32> to vector<2x16xf32>
    %313 = math.tanh %312 : vector<2x16xf32>
    %314 = vector.extract_strided_slice %299 {offsets = [0, 48], sizes = [2, 16], strides = [1, 1]} : vector<2x64xf32> to vector<2x16xf32>
    %315 = arith.negf %314 : vector<2x16xf32>
    %316 = math.exp %315 : vector<2x16xf32>
    %cst_110 = arith.constant 1.000000e+00 : f32
    %317 = vector.broadcast %cst_110 : f32 to vector<2x16xf32>
    %318 = arith.addf %317, %316 : vector<2x16xf32>
    %319 = arith.divf %317, %318 : vector<2x16xf32>
    %320 = arith.mulf %311, %293 : vector<2x16xf32>
    %321 = arith.mulf %305, %313 : vector<2x16xf32>
    %322 = arith.addf %320, %321 : vector<2x16xf32>
    %323 = math.tanh %322 : vector<2x16xf32>
    %324 = arith.mulf %319, %323 : vector<2x16xf32>
    %c7_111 = arith.constant 7 : index
    %c0_112 = arith.constant 0 : index
    %c0_113 = arith.constant 0 : index
    %325 = vector.load %arg24[%c7_111, %c0_112, %c0_113] : memref<8x2x16xf32, #tpu.memory_space<vmem>>, vector<1x2x16xf32>
    %326 = vector.shape_cast %325 : vector<1x2x16xf32> to vector<2x16xf32>
    %327 = vector.shape_cast %324 : vector<2x16xf32> to vector<1x2x16xf32>
    tpu.vector_store %arg24[%c7_111, %c0_112, %c0_113], %327 {strides = array<i32>} : memref<8x2x16xf32, #tpu.memory_space<vmem>>, vector<1x2x16xf32>,
    %c6_114 = arith.constant 6 : index
    %c0_115 = arith.constant 0 : index
    %c0_116 = arith.constant 0 : index
    %328 = vector.load %arg22[%c6_114, %c0_115, %c0_116] : memref<8x2x64xf32, #tpu.memory_space<vmem>>, vector<1x2x64xf32>
    %329 = vector.shape_cast %328 : vector<1x2x64xf32> to vector<2x64xf32>
    %cst_117 = arith.constant dense<0.000000e+00> : vector<2x64xf32>
    %330 = tpu.matmul %324, %289, %cst_117 {dimension_numbers = #tpu.dot_dimension_numbers<[1], [0], [0], [1], [0, 0, 1, 1], [], []>} : vector<2x16xf32>, vector<16x64xf32>, vector<2x64xf32> -> vector<2x64xf32>
    %331 = arith.addf %329, %330 : vector<2x64xf32>
    %332 = vector.broadcast %291 : vector<1x64xf32> to vector<2x64xf32>
    %333 = arith.addf %331, %332 : vector<2x64xf32>
    %334 = vector.extract_strided_slice %333 {offsets = [0, 0], sizes = [2, 16], strides = [1, 1]} : vector<2x64xf32> to vector<2x16xf32>
    %335 = arith.negf %334 : vector<2x16xf32>
    %336 = math.exp %335 : vector<2x16xf32>
    %cst_118 = arith.constant 1.000000e+00 : f32
    %337 = vector.broadcast %cst_118 : f32 to vector<2x16xf32>
    %338 = arith.addf %337, %336 : vector<2x16xf32>
    %339 = arith.divf %337, %338 : vector<2x16xf32>
    %340 = vector.extract_strided_slice %333 {offsets = [0, 16], sizes = [2, 16], strides = [1, 1]} : vector<2x64xf32> to vector<2x16xf32>
    %341 = arith.negf %340 : vector<2x16xf32>
    %342 = math.exp %341 : vector<2x16xf32>
    %cst_119 = arith.constant 1.000000e+00 : f32
    %343 = vector.broadcast %cst_119 : f32 to vector<2x16xf32>
    %344 = arith.addf %343, %342 : vector<2x16xf32>
    %345 = arith.divf %343, %344 : vector<2x16xf32>
    %346 = vector.extract_strided_slice %333 {offsets = [0, 32], sizes = [2, 16], strides = [1, 1]} : vector<2x64xf32> to vector<2x16xf32>
    %347 = math.tanh %346 : vector<2x16xf32>
    %348 = vector.extract_strided_slice %333 {offsets = [0, 48], sizes = [2, 16], strides = [1, 1]} : vector<2x64xf32> to vector<2x16xf32>
    %349 = arith.negf %348 : vector<2x16xf32>
    %350 = math.exp %349 : vector<2x16xf32>
    %cst_120 = arith.constant 1.000000e+00 : f32
    %351 = vector.broadcast %cst_120 : f32 to vector<2x16xf32>
    %352 = arith.addf %351, %350 : vector<2x16xf32>
    %353 = arith.divf %351, %352 : vector<2x16xf32>
    %354 = arith.mulf %345, %322 : vector<2x16xf32>
    %355 = arith.mulf %339, %347 : vector<2x16xf32>
    %356 = arith.addf %354, %355 : vector<2x16xf32>
    %357 = math.tanh %356 : vector<2x16xf32>
    %358 = arith.mulf %353, %357 : vector<2x16xf32>
    %c6_121 = arith.constant 6 : index
    %c0_122 = arith.constant 0 : index
    %c0_123 = arith.constant 0 : index
    %359 = vector.load %arg24[%c6_121, %c0_122, %c0_123] : memref<8x2x16xf32, #tpu.memory_space<vmem>>, vector<1x2x16xf32>
    %360 = vector.shape_cast %359 : vector<1x2x16xf32> to vector<2x16xf32>
    %361 = vector.shape_cast %358 : vector<2x16xf32> to vector<1x2x16xf32>
    tpu.vector_store %arg24[%c6_121, %c0_122, %c0_123], %361 {strides = array<i32>} : memref<8x2x16xf32, #tpu.memory_space<vmem>>, vector<1x2x16xf32>,
    %c5_124 = arith.constant 5 : index
    %c0_125 = arith.constant 0 : index
    %c0_126 = arith.constant 0 : index
    %362 = vector.load %arg22[%c5_124, %c0_125, %c0_126] : memref<8x2x64xf32, #tpu.memory_space<vmem>>, vector<1x2x64xf32>
    %363 = vector.shape_cast %362 : vector<1x2x64xf32> to vector<2x64xf32>
    %cst_127 = arith.constant dense<0.000000e+00> : vector<2x64xf32>
    %364 = tpu.matmul %358, %289, %cst_127 {dimension_numbers = #tpu.dot_dimension_numbers<[1], [0], [0], [1], [0, 0, 1, 1], [], []>} : vector<2x16xf32>, vector<16x64xf32>, vector<2x64xf32> -> vector<2x64xf32>
    %365 = arith.addf %363, %364 : vector<2x64xf32>
    %366 = vector.broadcast %291 : vector<1x64xf32> to vector<2x64xf32>
    %367 = arith.addf %365, %366 : vector<2x64xf32>
    %368 = vector.extract_strided_slice %367 {offsets = [0, 0], sizes = [2, 16], strides = [1, 1]} : vector<2x64xf32> to vector<2x16xf32>
    %369 = arith.negf %368 : vector<2x16xf32>
    %370 = math.exp %369 : vector<2x16xf32>
    %cst_128 = arith.constant 1.000000e+00 : f32
    %371 = vector.broadcast %cst_128 : f32 to vector<2x16xf32>
    %372 = arith.addf %371, %370 : vector<2x16xf32>
    %373 = arith.divf %371, %372 : vector<2x16xf32>
    %374 = vector.extract_strided_slice %367 {offsets = [0, 16], sizes = [2, 16], strides = [1, 1]} : vector<2x64xf32> to vector<2x16xf32>
    %375 = arith.negf %374 : vector<2x16xf32>
    %376 = math.exp %375 : vector<2x16xf32>
    %cst_129 = arith.constant 1.000000e+00 : f32
    %377 = vector.broadcast %cst_129 : f32 to vector<2x16xf32>
    %378 = arith.addf %377, %376 : vector<2x16xf32>
    %379 = arith.divf %377, %378 : vector<2x16xf32>
    %380 = vector.extract_strided_slice %367 {offsets = [0, 32], sizes = [2, 16], strides = [1, 1]} : vector<2x64xf32> to vector<2x16xf32>
    %381 = math.tanh %380 : vector<2x16xf32>
    %382 = vector.extract_strided_slice %367 {offsets = [0, 48], sizes = [2, 16], strides = [1, 1]} : vector<2x64xf32> to vector<2x16xf32>
    %383 = arith.negf %382 : vector<2x16xf32>
    %384 = math.exp %383 : vector<2x16xf32>
    %cst_130 = arith.constant 1.000000e+00 : f32
    %385 = vector.broadcast %cst_130 : f32 to vector<2x16xf32>
    %386 = arith.addf %385, %384 : vector<2x16xf32>
    %387 = arith.divf %385, %386 : vector<2x16xf32>
    %388 = arith.mulf %379, %356 : vector<2x16xf32>
    %389 = arith.mulf %373, %381 : vector<2x16xf32>
    %390 = arith.addf %388, %389 : vector<2x16xf32>
    %391 = math.tanh %390 : vector<2x16xf32>
    %392 = arith.mulf %387, %391 : vector<2x16xf32>
    %c5_131 = arith.constant 5 : index
    %c0_132 = arith.constant 0 : index
    %c0_133 = arith.constant 0 : index
    %393 = vector.load %arg24[%c5_131, %c0_132, %c0_133] : memref<8x2x16xf32, #tpu.memory_space<vmem>>, vector<1x2x16xf32>
    %394 = vector.shape_cast %393 : vector<1x2x16xf32> to vector<2x16xf32>
    %395 = vector.shape_cast %392 : vector<2x16xf32> to vector<1x2x16xf32>
    tpu.vector_store %arg24[%c5_131, %c0_132, %c0_133], %395 {strides = array<i32>} : memref<8x2x16xf32, #tpu.memory_space<vmem>>, vector<1x2x16xf32>,
    %c4_134 = arith.constant 4 : index
    %c0_135 = arith.constant 0 : index
    %c0_136 = arith.constant 0 : index
    %396 = vector.load %arg22[%c4_134, %c0_135, %c0_136] : memref<8x2x64xf32, #tpu.memory_space<vmem>>, vector<1x2x64xf32>
    %397 = vector.shape_cast %396 : vector<1x2x64xf32> to vector<2x64xf32>
    %cst_137 = arith.constant dense<0.000000e+00> : vector<2x64xf32>
    %398 = tpu.matmul %392, %289, %cst_137 {dimension_numbers = #tpu.dot_dimension_numbers<[1], [0], [0], [1], [0, 0, 1, 1], [], []>} : vector<2x16xf32>, vector<16x64xf32>, vector<2x64xf32> -> vector<2x64xf32>
    %399 = arith.addf %397, %398 : vector<2x64xf32>
    %400 = vector.broadcast %291 : vector<1x64xf32> to vector<2x64xf32>
    %401 = arith.addf %399, %400 : vector<2x64xf32>
    %402 = vector.extract_strided_slice %401 {offsets = [0, 0], sizes = [2, 16], strides = [1, 1]} : vector<2x64xf32> to vector<2x16xf32>
    %403 = arith.negf %402 : vector<2x16xf32>
    %404 = math.exp %403 : vector<2x16xf32>
    %cst_138 = arith.constant 1.000000e+00 : f32
    %405 = vector.broadcast %cst_138 : f32 to vector<2x16xf32>
    %406 = arith.addf %405, %404 : vector<2x16xf32>
    %407 = arith.divf %405, %406 : vector<2x16xf32>
    %408 = vector.extract_strided_slice %401 {offsets = [0, 16], sizes = [2, 16], strides = [1, 1]} : vector<2x64xf32> to vector<2x16xf32>
    %409 = arith.negf %408 : vector<2x16xf32>
    %410 = math.exp %409 : vector<2x16xf32>
    %cst_139 = arith.constant 1.000000e+00 : f32
    %411 = vector.broadcast %cst_139 : f32 to vector<2x16xf32>
    %412 = arith.addf %411, %410 : vector<2x16xf32>
    %413 = arith.divf %411, %412 : vector<2x16xf32>
    %414 = vector.extract_strided_slice %401 {offsets = [0, 32], sizes = [2, 16], strides = [1, 1]} : vector<2x64xf32> to vector<2x16xf32>
    %415 = math.tanh %414 : vector<2x16xf32>
    %416 = vector.extract_strided_slice %401 {offsets = [0, 48], sizes = [2, 16], strides = [1, 1]} : vector<2x64xf32> to vector<2x16xf32>
    %417 = arith.negf %416 : vector<2x16xf32>
    %418 = math.exp %417 : vector<2x16xf32>
    %cst_140 = arith.constant 1.000000e+00 : f32
    %419 = vector.broadcast %cst_140 : f32 to vector<2x16xf32>
    %420 = arith.addf %419, %418 : vector<2x16xf32>
    %421 = arith.divf %419, %420 : vector<2x16xf32>
    %422 = arith.mulf %413, %390 : vector<2x16xf32>
    %423 = arith.mulf %407, %415 : vector<2x16xf32>
    %424 = arith.addf %422, %423 : vector<2x16xf32>
    %425 = math.tanh %424 : vector<2x16xf32>
    %426 = arith.mulf %421, %425 : vector<2x16xf32>
    %c4_141 = arith.constant 4 : index
    %c0_142 = arith.constant 0 : index
    %c0_143 = arith.constant 0 : index
    %427 = vector.load %arg24[%c4_141, %c0_142, %c0_143] : memref<8x2x16xf32, #tpu.memory_space<vmem>>, vector<1x2x16xf32>
    %428 = vector.shape_cast %427 : vector<1x2x16xf32> to vector<2x16xf32>
    %429 = vector.shape_cast %426 : vector<2x16xf32> to vector<1x2x16xf32>
    tpu.vector_store %arg24[%c4_141, %c0_142, %c0_143], %429 {strides = array<i32>} : memref<8x2x16xf32, #tpu.memory_space<vmem>>, vector<1x2x16xf32>,
    %c3_144 = arith.constant 3 : index
    %c0_145 = arith.constant 0 : index
    %c0_146 = arith.constant 0 : index
    %430 = vector.load %arg22[%c3_144, %c0_145, %c0_146] : memref<8x2x64xf32, #tpu.memory_space<vmem>>, vector<1x2x64xf32>
    %431 = vector.shape_cast %430 : vector<1x2x64xf32> to vector<2x64xf32>
    %cst_147 = arith.constant dense<0.000000e+00> : vector<2x64xf32>
    %432 = tpu.matmul %426, %289, %cst_147 {dimension_numbers = #tpu.dot_dimension_numbers<[1], [0], [0], [1], [0, 0, 1, 1], [], []>} : vector<2x16xf32>, vector<16x64xf32>, vector<2x64xf32> -> vector<2x64xf32>
    %433 = arith.addf %431, %432 : vector<2x64xf32>
    %434 = vector.broadcast %291 : vector<1x64xf32> to vector<2x64xf32>
    %435 = arith.addf %433, %434 : vector<2x64xf32>
    %436 = vector.extract_strided_slice %435 {offsets = [0, 0], sizes = [2, 16], strides = [1, 1]} : vector<2x64xf32> to vector<2x16xf32>
    %437 = arith.negf %436 : vector<2x16xf32>
    %438 = math.exp %437 : vector<2x16xf32>
    %cst_148 = arith.constant 1.000000e+00 : f32
    %439 = vector.broadcast %cst_148 : f32 to vector<2x16xf32>
    %440 = arith.addf %439, %438 : vector<2x16xf32>
    %441 = arith.divf %439, %440 : vector<2x16xf32>
    %442 = vector.extract_strided_slice %435 {offsets = [0, 16], sizes = [2, 16], strides = [1, 1]} : vector<2x64xf32> to vector<2x16xf32>
    %443 = arith.negf %442 : vector<2x16xf32>
    %444 = math.exp %443 : vector<2x16xf32>
    %cst_149 = arith.constant 1.000000e+00 : f32
    %445 = vector.broadcast %cst_149 : f32 to vector<2x16xf32>
    %446 = arith.addf %445, %444 : vector<2x16xf32>
    %447 = arith.divf %445, %446 : vector<2x16xf32>
    %448 = vector.extract_strided_slice %435 {offsets = [0, 32], sizes = [2, 16], strides = [1, 1]} : vector<2x64xf32> to vector<2x16xf32>
    %449 = math.tanh %448 : vector<2x16xf32>
    %450 = vector.extract_strided_slice %435 {offsets = [0, 48], sizes = [2, 16], strides = [1, 1]} : vector<2x64xf32> to vector<2x16xf32>
    %451 = arith.negf %450 : vector<2x16xf32>
    %452 = math.exp %451 : vector<2x16xf32>
    %cst_150 = arith.constant 1.000000e+00 : f32
    %453 = vector.broadcast %cst_150 : f32 to vector<2x16xf32>
    %454 = arith.addf %453, %452 : vector<2x16xf32>
    %455 = arith.divf %453, %454 : vector<2x16xf32>
    %456 = arith.mulf %447, %424 : vector<2x16xf32>
    %457 = arith.mulf %441, %449 : vector<2x16xf32>
    %458 = arith.addf %456, %457 : vector<2x16xf32>
    %459 = math.tanh %458 : vector<2x16xf32>
    %460 = arith.mulf %455, %459 : vector<2x16xf32>
    %c3_151 = arith.constant 3 : index
    %c0_152 = arith.constant 0 : index
    %c0_153 = arith.constant 0 : index
    %461 = vector.load %arg24[%c3_151, %c0_152, %c0_153] : memref<8x2x16xf32, #tpu.memory_space<vmem>>, vector<1x2x16xf32>
    %462 = vector.shape_cast %461 : vector<1x2x16xf32> to vector<2x16xf32>
    %463 = vector.shape_cast %460 : vector<2x16xf32> to vector<1x2x16xf32>
    tpu.vector_store %arg24[%c3_151, %c0_152, %c0_153], %463 {strides = array<i32>} : memref<8x2x16xf32, #tpu.memory_space<vmem>>, vector<1x2x16xf32>,
    %c2_154 = arith.constant 2 : index
    %c0_155 = arith.constant 0 : index
    %c0_156 = arith.constant 0 : index
    %464 = vector.load %arg22[%c2_154, %c0_155, %c0_156] : memref<8x2x64xf32, #tpu.memory_space<vmem>>, vector<1x2x64xf32>
    %465 = vector.shape_cast %464 : vector<1x2x64xf32> to vector<2x64xf32>
    %cst_157 = arith.constant dense<0.000000e+00> : vector<2x64xf32>
    %466 = tpu.matmul %460, %289, %cst_157 {dimension_numbers = #tpu.dot_dimension_numbers<[1], [0], [0], [1], [0, 0, 1, 1], [], []>} : vector<2x16xf32>, vector<16x64xf32>, vector<2x64xf32> -> vector<2x64xf32>
    %467 = arith.addf %465, %466 : vector<2x64xf32>
    %468 = vector.broadcast %291 : vector<1x64xf32> to vector<2x64xf32>
    %469 = arith.addf %467, %468 : vector<2x64xf32>
    %470 = vector.extract_strided_slice %469 {offsets = [0, 0], sizes = [2, 16], strides = [1, 1]} : vector<2x64xf32> to vector<2x16xf32>
    %471 = arith.negf %470 : vector<2x16xf32>
    %472 = math.exp %471 : vector<2x16xf32>
    %cst_158 = arith.constant 1.000000e+00 : f32
    %473 = vector.broadcast %cst_158 : f32 to vector<2x16xf32>
    %474 = arith.addf %473, %472 : vector<2x16xf32>
    %475 = arith.divf %473, %474 : vector<2x16xf32>
    %476 = vector.extract_strided_slice %469 {offsets = [0, 16], sizes = [2, 16], strides = [1, 1]} : vector<2x64xf32> to vector<2x16xf32>
    %477 = arith.negf %476 : vector<2x16xf32>
    %478 = math.exp %477 : vector<2x16xf32>
    %cst_159 = arith.constant 1.000000e+00 : f32
    %479 = vector.broadcast %cst_159 : f32 to vector<2x16xf32>
    %480 = arith.addf %479, %478 : vector<2x16xf32>
    %481 = arith.divf %479, %480 : vector<2x16xf32>
    %482 = vector.extract_strided_slice %469 {offsets = [0, 32], sizes = [2, 16], strides = [1, 1]} : vector<2x64xf32> to vector<2x16xf32>
    %483 = math.tanh %482 : vector<2x16xf32>
    %484 = vector.extract_strided_slice %469 {offsets = [0, 48], sizes = [2, 16], strides = [1, 1]} : vector<2x64xf32> to vector<2x16xf32>
    %485 = arith.negf %484 : vector<2x16xf32>
    %486 = math.exp %485 : vector<2x16xf32>
    %cst_160 = arith.constant 1.000000e+00 : f32
    %487 = vector.broadcast %cst_160 : f32 to vector<2x16xf32>
    %488 = arith.addf %487, %486 : vector<2x16xf32>
    %489 = arith.divf %487, %488 : vector<2x16xf32>
    %490 = arith.mulf %481, %458 : vector<2x16xf32>
    %491 = arith.mulf %475, %483 : vector<2x16xf32>
    %492 = arith.addf %490, %491 : vector<2x16xf32>
    %493 = math.tanh %492 : vector<2x16xf32>
    %494 = arith.mulf %489, %493 : vector<2x16xf32>
    %c2_161 = arith.constant 2 : index
    %c0_162 = arith.constant 0 : index
    %c0_163 = arith.constant 0 : index
    %495 = vector.load %arg24[%c2_161, %c0_162, %c0_163] : memref<8x2x16xf32, #tpu.memory_space<vmem>>, vector<1x2x16xf32>
    %496 = vector.shape_cast %495 : vector<1x2x16xf32> to vector<2x16xf32>
    %497 = vector.shape_cast %494 : vector<2x16xf32> to vector<1x2x16xf32>
    tpu.vector_store %arg24[%c2_161, %c0_162, %c0_163], %497 {strides = array<i32>} : memref<8x2x16xf32, #tpu.memory_space<vmem>>, vector<1x2x16xf32>,
    %c1_164 = arith.constant 1 : index
    %c0_165 = arith.constant 0 : index
    %c0_166 = arith.constant 0 : index
    %498 = vector.load %arg22[%c1_164, %c0_165, %c0_166] : memref<8x2x64xf32, #tpu.memory_space<vmem>>, vector<1x2x64xf32>
    %499 = vector.shape_cast %498 : vector<1x2x64xf32> to vector<2x64xf32>
    %cst_167 = arith.constant dense<0.000000e+00> : vector<2x64xf32>
    %500 = tpu.matmul %494, %289, %cst_167 {dimension_numbers = #tpu.dot_dimension_numbers<[1], [0], [0], [1], [0, 0, 1, 1], [], []>} : vector<2x16xf32>, vector<16x64xf32>, vector<2x64xf32> -> vector<2x64xf32>
    %501 = arith.addf %499, %500 : vector<2x64xf32>
    %502 = vector.broadcast %291 : vector<1x64xf32> to vector<2x64xf32>
    %503 = arith.addf %501, %502 : vector<2x64xf32>
    %504 = vector.extract_strided_slice %503 {offsets = [0, 0], sizes = [2, 16], strides = [1, 1]} : vector<2x64xf32> to vector<2x16xf32>
    %505 = arith.negf %504 : vector<2x16xf32>
    %506 = math.exp %505 : vector<2x16xf32>
    %cst_168 = arith.constant 1.000000e+00 : f32
    %507 = vector.broadcast %cst_168 : f32 to vector<2x16xf32>
    %508 = arith.addf %507, %506 : vector<2x16xf32>
    %509 = arith.divf %507, %508 : vector<2x16xf32>
    %510 = vector.extract_strided_slice %503 {offsets = [0, 16], sizes = [2, 16], strides = [1, 1]} : vector<2x64xf32> to vector<2x16xf32>
    %511 = arith.negf %510 : vector<2x16xf32>
    %512 = math.exp %511 : vector<2x16xf32>
    %cst_169 = arith.constant 1.000000e+00 : f32
    %513 = vector.broadcast %cst_169 : f32 to vector<2x16xf32>
    %514 = arith.addf %513, %512 : vector<2x16xf32>
    %515 = arith.divf %513, %514 : vector<2x16xf32>
    %516 = vector.extract_strided_slice %503 {offsets = [0, 32], sizes = [2, 16], strides = [1, 1]} : vector<2x64xf32> to vector<2x16xf32>
    %517 = math.tanh %516 : vector<2x16xf32>
    %518 = vector.extract_strided_slice %503 {offsets = [0, 48], sizes = [2, 16], strides = [1, 1]} : vector<2x64xf32> to vector<2x16xf32>
    %519 = arith.negf %518 : vector<2x16xf32>
    %520 = math.exp %519 : vector<2x16xf32>
    %cst_170 = arith.constant 1.000000e+00 : f32
    %521 = vector.broadcast %cst_170 : f32 to vector<2x16xf32>
    %522 = arith.addf %521, %520 : vector<2x16xf32>
    %523 = arith.divf %521, %522 : vector<2x16xf32>
    %524 = arith.mulf %515, %492 : vector<2x16xf32>
    %525 = arith.mulf %509, %517 : vector<2x16xf32>
    %526 = arith.addf %524, %525 : vector<2x16xf32>
    %527 = math.tanh %526 : vector<2x16xf32>
    %528 = arith.mulf %523, %527 : vector<2x16xf32>
    %c1_171 = arith.constant 1 : index
    %c0_172 = arith.constant 0 : index
    %c0_173 = arith.constant 0 : index
    %529 = vector.load %arg24[%c1_171, %c0_172, %c0_173] : memref<8x2x16xf32, #tpu.memory_space<vmem>>, vector<1x2x16xf32>
    %530 = vector.shape_cast %529 : vector<1x2x16xf32> to vector<2x16xf32>
    %531 = vector.shape_cast %528 : vector<2x16xf32> to vector<1x2x16xf32>
    tpu.vector_store %arg24[%c1_171, %c0_172, %c0_173], %531 {strides = array<i32>} : memref<8x2x16xf32, #tpu.memory_space<vmem>>, vector<1x2x16xf32>,
    %c0_174 = arith.constant 0 : index
    %c0_175 = arith.constant 0 : index
    %c0_176 = arith.constant 0 : index
    %532 = vector.load %arg22[%c0_174, %c0_175, %c0_176] : memref<8x2x64xf32, #tpu.memory_space<vmem>>, vector<1x2x64xf32>
    %533 = vector.shape_cast %532 : vector<1x2x64xf32> to vector<2x64xf32>
    %cst_177 = arith.constant dense<0.000000e+00> : vector<2x64xf32>
    %534 = tpu.matmul %528, %289, %cst_177 {dimension_numbers = #tpu.dot_dimension_numbers<[1], [0], [0], [1], [0, 0, 1, 1], [], []>} : vector<2x16xf32>, vector<16x64xf32>, vector<2x64xf32> -> vector<2x64xf32>
    %535 = arith.addf %533, %534 : vector<2x64xf32>
    %536 = vector.broadcast %291 : vector<1x64xf32> to vector<2x64xf32>
    %537 = arith.addf %535, %536 : vector<2x64xf32>
    %538 = vector.extract_strided_slice %537 {offsets = [0, 0], sizes = [2, 16], strides = [1, 1]} : vector<2x64xf32> to vector<2x16xf32>
    %539 = arith.negf %538 : vector<2x16xf32>
    %540 = math.exp %539 : vector<2x16xf32>
    %cst_178 = arith.constant 1.000000e+00 : f32
    %541 = vector.broadcast %cst_178 : f32 to vector<2x16xf32>
    %542 = arith.addf %541, %540 : vector<2x16xf32>
    %543 = arith.divf %541, %542 : vector<2x16xf32>
    %544 = vector.extract_strided_slice %537 {offsets = [0, 16], sizes = [2, 16], strides = [1, 1]} : vector<2x64xf32> to vector<2x16xf32>
    %545 = arith.negf %544 : vector<2x16xf32>
    %546 = math.exp %545 : vector<2x16xf32>
    %cst_179 = arith.constant 1.000000e+00 : f32
    %547 = vector.broadcast %cst_179 : f32 to vector<2x16xf32>
    %548 = arith.addf %547, %546 : vector<2x16xf32>
    %549 = arith.divf %547, %548 : vector<2x16xf32>
    %550 = vector.extract_strided_slice %537 {offsets = [0, 32], sizes = [2, 16], strides = [1, 1]} : vector<2x64xf32> to vector<2x16xf32>
    %551 = math.tanh %550 : vector<2x16xf32>
    %552 = vector.extract_strided_slice %537 {offsets = [0, 48], sizes = [2, 16], strides = [1, 1]} : vector<2x64xf32> to vector<2x16xf32>
    %553 = arith.negf %552 : vector<2x16xf32>
    %554 = math.exp %553 : vector<2x16xf32>
    %cst_180 = arith.constant 1.000000e+00 : f32
    %555 = vector.broadcast %cst_180 : f32 to vector<2x16xf32>
    %556 = arith.addf %555, %554 : vector<2x16xf32>
    %557 = arith.divf %555, %556 : vector<2x16xf32>
    %558 = arith.mulf %549, %526 : vector<2x16xf32>
    %559 = arith.mulf %543, %551 : vector<2x16xf32>
    %560 = arith.addf %558, %559 : vector<2x16xf32>
    %561 = math.tanh %560 : vector<2x16xf32>
    %562 = arith.mulf %557, %561 : vector<2x16xf32>
    %c0_181 = arith.constant 0 : index
    %c0_182 = arith.constant 0 : index
    %c0_183 = arith.constant 0 : index
    %563 = vector.load %arg24[%c0_181, %c0_182, %c0_183] : memref<8x2x16xf32, #tpu.memory_space<vmem>>, vector<1x2x16xf32>
    %564 = vector.shape_cast %563 : vector<1x2x16xf32> to vector<2x16xf32>
    %565 = vector.shape_cast %562 : vector<2x16xf32> to vector<1x2x16xf32>
    tpu.vector_store %arg24[%c0_181, %c0_182, %c0_183], %565 {strides = array<i32>} : memref<8x2x16xf32, #tpu.memory_space<vmem>>, vector<1x2x16xf32>,
    %c0_184 = arith.constant 0 : index
    %c0_185 = arith.constant 0 : index
    %c0_186 = arith.constant 0 : index
    %566 = vector.load %arg23[%c0_184, %c0_185, %c0_186] : memref<8x2x16xf32, #tpu.memory_space<vmem>>, vector<8x2x16xf32>
    %c0_187 = arith.constant 0 : index
    %c0_188 = arith.constant 0 : index
    %c0_189 = arith.constant 0 : index
    %567 = vector.load %arg24[%c0_187, %c0_188, %c0_189] : memref<8x2x16xf32, #tpu.memory_space<vmem>>, vector<8x2x16xf32>
    %568 = tpu.concatenate %566, %567 in 2 : vector<8x2x16xf32>, vector<8x2x16xf32> -> vector<8x2x32xf32>
    %569 = arith.truncf %568 : vector<8x2x32xf32> to vector<8x2x32xbf16>
    %c0_190 = arith.constant 0 : index
    %c0_191 = arith.constant 0 : index
    %c0_192 = arith.constant 0 : index
    %570 = vector.load %arg5[%c0_190, %c0_191, %c0_192] : memref<2x32x64xbf16, #tpu.memory_space<vmem>>, vector<1x32x64xbf16>
    %571 = vector.shape_cast %570 : vector<1x32x64xbf16> to vector<32x64xbf16>
    %cst_193 = arith.constant dense<0.000000e+00> : vector<8x2x64xf32>
    %572 = tpu.matmul %569, %571, %cst_193 {dimension_numbers = #tpu.dot_dimension_numbers<[2], [0], [0, 1], [1], [0, 0, 0, 1, 1, 1], [], []>} : vector<8x2x32xbf16>, vector<32x64xbf16>, vector<8x2x64xf32> -> vector<8x2x64xf32>
    %c0_194 = arith.constant 0 : index
    %c0_195 = arith.constant 0 : index
    %c0_196 = arith.constant 0 : index
    %573 = vector.load %arg21[%c0_194, %c0_195, %c0_196] : memref<8x2x64xf32, #tpu.memory_space<vmem>>, vector<8x2x64xf32>
    tpu.vector_store %arg21[%c0_194, %c0_195, %c0_196], %572 {strides = array<i32>} : memref<8x2x64xf32, #tpu.memory_space<vmem>>, vector<8x2x64xf32>,
    %c1_197 = arith.constant 1 : index
    %c0_198 = arith.constant 0 : index
    %c0_199 = arith.constant 0 : index
    %574 = vector.load %arg5[%c1_197, %c0_198, %c0_199] : memref<2x32x64xbf16, #tpu.memory_space<vmem>>, vector<1x32x64xbf16>
    %575 = vector.shape_cast %574 : vector<1x32x64xbf16> to vector<32x64xbf16>
    %cst_200 = arith.constant dense<0.000000e+00> : vector<8x2x64xf32>
    %576 = tpu.matmul %569, %575, %cst_200 {dimension_numbers = #tpu.dot_dimension_numbers<[2], [0], [0, 1], [1], [0, 0, 0, 1, 1, 1], [], []>} : vector<8x2x32xbf16>, vector<32x64xbf16>, vector<8x2x64xf32> -> vector<8x2x64xf32>
    %c0_201 = arith.constant 0 : index
    %c0_202 = arith.constant 0 : index
    %c0_203 = arith.constant 0 : index
    %577 = vector.load %arg22[%c0_201, %c0_202, %c0_203] : memref<8x2x64xf32, #tpu.memory_space<vmem>>, vector<8x2x64xf32>
    tpu.vector_store %arg22[%c0_201, %c0_202, %c0_203], %576 {strides = array<i32>} : memref<8x2x64xf32, #tpu.memory_space<vmem>>, vector<8x2x64xf32>,
    %c0_204 = arith.constant 0 : index
    %c0_205 = arith.constant 0 : index
    %c0_206 = arith.constant 0 : index
    %578 = vector.load %arg6[%c0_204, %c0_205, %c0_206] : memref<2x16x64xf32, #tpu.memory_space<vmem>>, vector<1x16x64xf32>
    %579 = vector.shape_cast %578 : vector<1x16x64xf32> to vector<16x64xf32>
    %c0_207 = arith.constant 0 : index
    %c0_208 = arith.constant 0 : index
    %c0_209 = arith.constant 0 : index
    %580 = vector.load %arg7[%c0_207, %c0_208, %c0_209] : memref<2x1x64xf32, #tpu.memory_space<vmem>>, vector<1x1x64xf32>
    %581 = vector.shape_cast %580 : vector<1x1x64xf32> to vector<1x64xf32>
    %cst_210 = arith.constant 0.000000e+00 : f32
    %582 = vector.broadcast %cst_210 : f32 to vector<2x16xf32>
    %cst_211 = arith.constant 0.000000e+00 : f32
    %583 = vector.broadcast %cst_211 : f32 to vector<2x16xf32>
    %c0_212 = arith.constant 0 : index
    %c0_213 = arith.constant 0 : index
    %c0_214 = arith.constant 0 : index
    %584 = vector.load %arg21[%c0_212, %c0_213, %c0_214] : memref<8x2x64xf32, #tpu.memory_space<vmem>>, vector<1x2x64xf32>
    %585 = vector.shape_cast %584 : vector<1x2x64xf32> to vector<2x64xf32>
    %cst_215 = arith.constant dense<0.000000e+00> : vector<2x64xf32>
    %586 = tpu.matmul %582, %579, %cst_215 {dimension_numbers = #tpu.dot_dimension_numbers<[1], [0], [0], [1], [0, 0, 1, 1], [], []>} : vector<2x16xf32>, vector<16x64xf32>, vector<2x64xf32> -> vector<2x64xf32>
    %587 = arith.addf %585, %586 : vector<2x64xf32>
    %588 = vector.broadcast %581 : vector<1x64xf32> to vector<2x64xf32>
    %589 = arith.addf %587, %588 : vector<2x64xf32>
    %590 = vector.extract_strided_slice %589 {offsets = [0, 0], sizes = [2, 16], strides = [1, 1]} : vector<2x64xf32> to vector<2x16xf32>
    %591 = arith.negf %590 : vector<2x16xf32>
    %592 = math.exp %591 : vector<2x16xf32>
    %cst_216 = arith.constant 1.000000e+00 : f32
    %593 = vector.broadcast %cst_216 : f32 to vector<2x16xf32>
    %594 = arith.addf %593, %592 : vector<2x16xf32>
    %595 = arith.divf %593, %594 : vector<2x16xf32>
    %596 = vector.extract_strided_slice %589 {offsets = [0, 16], sizes = [2, 16], strides = [1, 1]} : vector<2x64xf32> to vector<2x16xf32>
    %597 = arith.negf %596 : vector<2x16xf32>
    %598 = math.exp %597 : vector<2x16xf32>
    %cst_217 = arith.constant 1.000000e+00 : f32
    %599 = vector.broadcast %cst_217 : f32 to vector<2x16xf32>
    %600 = arith.addf %599, %598 : vector<2x16xf32>
    %601 = arith.divf %599, %600 : vector<2x16xf32>
    %602 = vector.extract_strided_slice %589 {offsets = [0, 32], sizes = [2, 16], strides = [1, 1]} : vector<2x64xf32> to vector<2x16xf32>
    %603 = math.tanh %602 : vector<2x16xf32>
    %604 = vector.extract_strided_slice %589 {offsets = [0, 48], sizes = [2, 16], strides = [1, 1]} : vector<2x64xf32> to vector<2x16xf32>
    %605 = arith.negf %604 : vector<2x16xf32>
    %606 = math.exp %605 : vector<2x16xf32>
    %cst_218 = arith.constant 1.000000e+00 : f32
    %607 = vector.broadcast %cst_218 : f32 to vector<2x16xf32>
    %608 = arith.addf %607, %606 : vector<2x16xf32>
    %609 = arith.divf %607, %608 : vector<2x16xf32>
    %610 = arith.mulf %601, %583 : vector<2x16xf32>
    %611 = arith.mulf %595, %603 : vector<2x16xf32>
    %612 = arith.addf %610, %611 : vector<2x16xf32>
    %613 = math.tanh %612 : vector<2x16xf32>
    %614 = arith.mulf %609, %613 : vector<2x16xf32>
    %c0_219 = arith.constant 0 : index
    %c0_220 = arith.constant 0 : index
    %c0_221 = arith.constant 0 : index
    %615 = vector.load %arg23[%c0_219, %c0_220, %c0_221] : memref<8x2x16xf32, #tpu.memory_space<vmem>>, vector<1x2x16xf32>
    %616 = vector.shape_cast %615 : vector<1x2x16xf32> to vector<2x16xf32>
    %617 = vector.shape_cast %614 : vector<2x16xf32> to vector<1x2x16xf32>
    tpu.vector_store %arg23[%c0_219, %c0_220, %c0_221], %617 {strides = array<i32>} : memref<8x2x16xf32, #tpu.memory_space<vmem>>, vector<1x2x16xf32>,
    %c1_222 = arith.constant 1 : index
    %c0_223 = arith.constant 0 : index
    %c0_224 = arith.constant 0 : index
    %618 = vector.load %arg21[%c1_222, %c0_223, %c0_224] : memref<8x2x64xf32, #tpu.memory_space<vmem>>, vector<1x2x64xf32>
    %619 = vector.shape_cast %618 : vector<1x2x64xf32> to vector<2x64xf32>
    %cst_225 = arith.constant dense<0.000000e+00> : vector<2x64xf32>
    %620 = tpu.matmul %614, %579, %cst_225 {dimension_numbers = #tpu.dot_dimension_numbers<[1], [0], [0], [1], [0, 0, 1, 1], [], []>} : vector<2x16xf32>, vector<16x64xf32>, vector<2x64xf32> -> vector<2x64xf32>
    %621 = arith.addf %619, %620 : vector<2x64xf32>
    %622 = vector.broadcast %581 : vector<1x64xf32> to vector<2x64xf32>
    %623 = arith.addf %621, %622 : vector<2x64xf32>
    %624 = vector.extract_strided_slice %623 {offsets = [0, 0], sizes = [2, 16], strides = [1, 1]} : vector<2x64xf32> to vector<2x16xf32>
    %625 = arith.negf %624 : vector<2x16xf32>
    %626 = math.exp %625 : vector<2x16xf32>
    %cst_226 = arith.constant 1.000000e+00 : f32
    %627 = vector.broadcast %cst_226 : f32 to vector<2x16xf32>
    %628 = arith.addf %627, %626 : vector<2x16xf32>
    %629 = arith.divf %627, %628 : vector<2x16xf32>
    %630 = vector.extract_strided_slice %623 {offsets = [0, 16], sizes = [2, 16], strides = [1, 1]} : vector<2x64xf32> to vector<2x16xf32>
    %631 = arith.negf %630 : vector<2x16xf32>
    %632 = math.exp %631 : vector<2x16xf32>
    %cst_227 = arith.constant 1.000000e+00 : f32
    %633 = vector.broadcast %cst_227 : f32 to vector<2x16xf32>
    %634 = arith.addf %633, %632 : vector<2x16xf32>
    %635 = arith.divf %633, %634 : vector<2x16xf32>
    %636 = vector.extract_strided_slice %623 {offsets = [0, 32], sizes = [2, 16], strides = [1, 1]} : vector<2x64xf32> to vector<2x16xf32>
    %637 = math.tanh %636 : vector<2x16xf32>
    %638 = vector.extract_strided_slice %623 {offsets = [0, 48], sizes = [2, 16], strides = [1, 1]} : vector<2x64xf32> to vector<2x16xf32>
    %639 = arith.negf %638 : vector<2x16xf32>
    %640 = math.exp %639 : vector<2x16xf32>
    %cst_228 = arith.constant 1.000000e+00 : f32
    %641 = vector.broadcast %cst_228 : f32 to vector<2x16xf32>
    %642 = arith.addf %641, %640 : vector<2x16xf32>
    %643 = arith.divf %641, %642 : vector<2x16xf32>
    %644 = arith.mulf %635, %612 : vector<2x16xf32>
    %645 = arith.mulf %629, %637 : vector<2x16xf32>
    %646 = arith.addf %644, %645 : vector<2x16xf32>
    %647 = math.tanh %646 : vector<2x16xf32>
    %648 = arith.mulf %643, %647 : vector<2x16xf32>
    %c1_229 = arith.constant 1 : index
    %c0_230 = arith.constant 0 : index
    %c0_231 = arith.constant 0 : index
    %649 = vector.load %arg23[%c1_229, %c0_230, %c0_231] : memref<8x2x16xf32, #tpu.memory_space<vmem>>, vector<1x2x16xf32>
    %650 = vector.shape_cast %649 : vector<1x2x16xf32> to vector<2x16xf32>
    %651 = vector.shape_cast %648 : vector<2x16xf32> to vector<1x2x16xf32>
    tpu.vector_store %arg23[%c1_229, %c0_230, %c0_231], %651 {strides = array<i32>} : memref<8x2x16xf32, #tpu.memory_space<vmem>>, vector<1x2x16xf32>,
    %c2_232 = arith.constant 2 : index
    %c0_233 = arith.constant 0 : index
    %c0_234 = arith.constant 0 : index
    %652 = vector.load %arg21[%c2_232, %c0_233, %c0_234] : memref<8x2x64xf32, #tpu.memory_space<vmem>>, vector<1x2x64xf32>
    %653 = vector.shape_cast %652 : vector<1x2x64xf32> to vector<2x64xf32>
    %cst_235 = arith.constant dense<0.000000e+00> : vector<2x64xf32>
    %654 = tpu.matmul %648, %579, %cst_235 {dimension_numbers = #tpu.dot_dimension_numbers<[1], [0], [0], [1], [0, 0, 1, 1], [], []>} : vector<2x16xf32>, vector<16x64xf32>, vector<2x64xf32> -> vector<2x64xf32>
    %655 = arith.addf %653, %654 : vector<2x64xf32>
    %656 = vector.broadcast %581 : vector<1x64xf32> to vector<2x64xf32>
    %657 = arith.addf %655, %656 : vector<2x64xf32>
    %658 = vector.extract_strided_slice %657 {offsets = [0, 0], sizes = [2, 16], strides = [1, 1]} : vector<2x64xf32> to vector<2x16xf32>
    %659 = arith.negf %658 : vector<2x16xf32>
    %660 = math.exp %659 : vector<2x16xf32>
    %cst_236 = arith.constant 1.000000e+00 : f32
    %661 = vector.broadcast %cst_236 : f32 to vector<2x16xf32>
    %662 = arith.addf %661, %660 : vector<2x16xf32>
    %663 = arith.divf %661, %662 : vector<2x16xf32>
    %664 = vector.extract_strided_slice %657 {offsets = [0, 16], sizes = [2, 16], strides = [1, 1]} : vector<2x64xf32> to vector<2x16xf32>
    %665 = arith.negf %664 : vector<2x16xf32>
    %666 = math.exp %665 : vector<2x16xf32>
    %cst_237 = arith.constant 1.000000e+00 : f32
    %667 = vector.broadcast %cst_237 : f32 to vector<2x16xf32>
    %668 = arith.addf %667, %666 : vector<2x16xf32>
    %669 = arith.divf %667, %668 : vector<2x16xf32>
    %670 = vector.extract_strided_slice %657 {offsets = [0, 32], sizes = [2, 16], strides = [1, 1]} : vector<2x64xf32> to vector<2x16xf32>
    %671 = math.tanh %670 : vector<2x16xf32>
    %672 = vector.extract_strided_slice %657 {offsets = [0, 48], sizes = [2, 16], strides = [1, 1]} : vector<2x64xf32> to vector<2x16xf32>
    %673 = arith.negf %672 : vector<2x16xf32>
    %674 = math.exp %673 : vector<2x16xf32>
    %cst_238 = arith.constant 1.000000e+00 : f32
    %675 = vector.broadcast %cst_238 : f32 to vector<2x16xf32>
    %676 = arith.addf %675, %674 : vector<2x16xf32>
    %677 = arith.divf %675, %676 : vector<2x16xf32>
    %678 = arith.mulf %669, %646 : vector<2x16xf32>
    %679 = arith.mulf %663, %671 : vector<2x16xf32>
    %680 = arith.addf %678, %679 : vector<2x16xf32>
    %681 = math.tanh %680 : vector<2x16xf32>
    %682 = arith.mulf %677, %681 : vector<2x16xf32>
    %c2_239 = arith.constant 2 : index
    %c0_240 = arith.constant 0 : index
    %c0_241 = arith.constant 0 : index
    %683 = vector.load %arg23[%c2_239, %c0_240, %c0_241] : memref<8x2x16xf32, #tpu.memory_space<vmem>>, vector<1x2x16xf32>
    %684 = vector.shape_cast %683 : vector<1x2x16xf32> to vector<2x16xf32>
    %685 = vector.shape_cast %682 : vector<2x16xf32> to vector<1x2x16xf32>
    tpu.vector_store %arg23[%c2_239, %c0_240, %c0_241], %685 {strides = array<i32>} : memref<8x2x16xf32, #tpu.memory_space<vmem>>, vector<1x2x16xf32>,
    %c3_242 = arith.constant 3 : index
    %c0_243 = arith.constant 0 : index
    %c0_244 = arith.constant 0 : index
    %686 = vector.load %arg21[%c3_242, %c0_243, %c0_244] : memref<8x2x64xf32, #tpu.memory_space<vmem>>, vector<1x2x64xf32>
    %687 = vector.shape_cast %686 : vector<1x2x64xf32> to vector<2x64xf32>
    %cst_245 = arith.constant dense<0.000000e+00> : vector<2x64xf32>
    %688 = tpu.matmul %682, %579, %cst_245 {dimension_numbers = #tpu.dot_dimension_numbers<[1], [0], [0], [1], [0, 0, 1, 1], [], []>} : vector<2x16xf32>, vector<16x64xf32>, vector<2x64xf32> -> vector<2x64xf32>
    %689 = arith.addf %687, %688 : vector<2x64xf32>
    %690 = vector.broadcast %581 : vector<1x64xf32> to vector<2x64xf32>
    %691 = arith.addf %689, %690 : vector<2x64xf32>
    %692 = vector.extract_strided_slice %691 {offsets = [0, 0], sizes = [2, 16], strides = [1, 1]} : vector<2x64xf32> to vector<2x16xf32>
    %693 = arith.negf %692 : vector<2x16xf32>
    %694 = math.exp %693 : vector<2x16xf32>
    %cst_246 = arith.constant 1.000000e+00 : f32
    %695 = vector.broadcast %cst_246 : f32 to vector<2x16xf32>
    %696 = arith.addf %695, %694 : vector<2x16xf32>
    %697 = arith.divf %695, %696 : vector<2x16xf32>
    %698 = vector.extract_strided_slice %691 {offsets = [0, 16], sizes = [2, 16], strides = [1, 1]} : vector<2x64xf32> to vector<2x16xf32>
    %699 = arith.negf %698 : vector<2x16xf32>
    %700 = math.exp %699 : vector<2x16xf32>
    %cst_247 = arith.constant 1.000000e+00 : f32
    %701 = vector.broadcast %cst_247 : f32 to vector<2x16xf32>
    %702 = arith.addf %701, %700 : vector<2x16xf32>
    %703 = arith.divf %701, %702 : vector<2x16xf32>
    %704 = vector.extract_strided_slice %691 {offsets = [0, 32], sizes = [2, 16], strides = [1, 1]} : vector<2x64xf32> to vector<2x16xf32>
    %705 = math.tanh %704 : vector<2x16xf32>
    %706 = vector.extract_strided_slice %691 {offsets = [0, 48], sizes = [2, 16], strides = [1, 1]} : vector<2x64xf32> to vector<2x16xf32>
    %707 = arith.negf %706 : vector<2x16xf32>
    %708 = math.exp %707 : vector<2x16xf32>
    %cst_248 = arith.constant 1.000000e+00 : f32
    %709 = vector.broadcast %cst_248 : f32 to vector<2x16xf32>
    %710 = arith.addf %709, %708 : vector<2x16xf32>
    %711 = arith.divf %709, %710 : vector<2x16xf32>
    %712 = arith.mulf %703, %680 : vector<2x16xf32>
    %713 = arith.mulf %697, %705 : vector<2x16xf32>
    %714 = arith.addf %712, %713 : vector<2x16xf32>
    %715 = math.tanh %714 : vector<2x16xf32>
    %716 = arith.mulf %711, %715 : vector<2x16xf32>
    %c3_249 = arith.constant 3 : index
    %c0_250 = arith.constant 0 : index
    %c0_251 = arith.constant 0 : index
    %717 = vector.load %arg23[%c3_249, %c0_250, %c0_251] : memref<8x2x16xf32, #tpu.memory_space<vmem>>, vector<1x2x16xf32>
    %718 = vector.shape_cast %717 : vector<1x2x16xf32> to vector<2x16xf32>
    %719 = vector.shape_cast %716 : vector<2x16xf32> to vector<1x2x16xf32>
    tpu.vector_store %arg23[%c3_249, %c0_250, %c0_251], %719 {strides = array<i32>} : memref<8x2x16xf32, #tpu.memory_space<vmem>>, vector<1x2x16xf32>,
    %c4_252 = arith.constant 4 : index
    %c0_253 = arith.constant 0 : index
    %c0_254 = arith.constant 0 : index
    %720 = vector.load %arg21[%c4_252, %c0_253, %c0_254] : memref<8x2x64xf32, #tpu.memory_space<vmem>>, vector<1x2x64xf32>
    %721 = vector.shape_cast %720 : vector<1x2x64xf32> to vector<2x64xf32>
    %cst_255 = arith.constant dense<0.000000e+00> : vector<2x64xf32>
    %722 = tpu.matmul %716, %579, %cst_255 {dimension_numbers = #tpu.dot_dimension_numbers<[1], [0], [0], [1], [0, 0, 1, 1], [], []>} : vector<2x16xf32>, vector<16x64xf32>, vector<2x64xf32> -> vector<2x64xf32>
    %723 = arith.addf %721, %722 : vector<2x64xf32>
    %724 = vector.broadcast %581 : vector<1x64xf32> to vector<2x64xf32>
    %725 = arith.addf %723, %724 : vector<2x64xf32>
    %726 = vector.extract_strided_slice %725 {offsets = [0, 0], sizes = [2, 16], strides = [1, 1]} : vector<2x64xf32> to vector<2x16xf32>
    %727 = arith.negf %726 : vector<2x16xf32>
    %728 = math.exp %727 : vector<2x16xf32>
    %cst_256 = arith.constant 1.000000e+00 : f32
    %729 = vector.broadcast %cst_256 : f32 to vector<2x16xf32>
    %730 = arith.addf %729, %728 : vector<2x16xf32>
    %731 = arith.divf %729, %730 : vector<2x16xf32>
    %732 = vector.extract_strided_slice %725 {offsets = [0, 16], sizes = [2, 16], strides = [1, 1]} : vector<2x64xf32> to vector<2x16xf32>
    %733 = arith.negf %732 : vector<2x16xf32>
    %734 = math.exp %733 : vector<2x16xf32>
    %cst_257 = arith.constant 1.000000e+00 : f32
    %735 = vector.broadcast %cst_257 : f32 to vector<2x16xf32>
    %736 = arith.addf %735, %734 : vector<2x16xf32>
    %737 = arith.divf %735, %736 : vector<2x16xf32>
    %738 = vector.extract_strided_slice %725 {offsets = [0, 32], sizes = [2, 16], strides = [1, 1]} : vector<2x64xf32> to vector<2x16xf32>
    %739 = math.tanh %738 : vector<2x16xf32>
    %740 = vector.extract_strided_slice %725 {offsets = [0, 48], sizes = [2, 16], strides = [1, 1]} : vector<2x64xf32> to vector<2x16xf32>
    %741 = arith.negf %740 : vector<2x16xf32>
    %742 = math.exp %741 : vector<2x16xf32>
    %cst_258 = arith.constant 1.000000e+00 : f32
    %743 = vector.broadcast %cst_258 : f32 to vector<2x16xf32>
    %744 = arith.addf %743, %742 : vector<2x16xf32>
    %745 = arith.divf %743, %744 : vector<2x16xf32>
    %746 = arith.mulf %737, %714 : vector<2x16xf32>
    %747 = arith.mulf %731, %739 : vector<2x16xf32>
    %748 = arith.addf %746, %747 : vector<2x16xf32>
    %749 = math.tanh %748 : vector<2x16xf32>
    %750 = arith.mulf %745, %749 : vector<2x16xf32>
    %c4_259 = arith.constant 4 : index
    %c0_260 = arith.constant 0 : index
    %c0_261 = arith.constant 0 : index
    %751 = vector.load %arg23[%c4_259, %c0_260, %c0_261] : memref<8x2x16xf32, #tpu.memory_space<vmem>>, vector<1x2x16xf32>
    %752 = vector.shape_cast %751 : vector<1x2x16xf32> to vector<2x16xf32>
    %753 = vector.shape_cast %750 : vector<2x16xf32> to vector<1x2x16xf32>
    tpu.vector_store %arg23[%c4_259, %c0_260, %c0_261], %753 {strides = array<i32>} : memref<8x2x16xf32, #tpu.memory_space<vmem>>, vector<1x2x16xf32>,
    %c5_262 = arith.constant 5 : index
    %c0_263 = arith.constant 0 : index
    %c0_264 = arith.constant 0 : index
    %754 = vector.load %arg21[%c5_262, %c0_263, %c0_264] : memref<8x2x64xf32, #tpu.memory_space<vmem>>, vector<1x2x64xf32>
    %755 = vector.shape_cast %754 : vector<1x2x64xf32> to vector<2x64xf32>
    %cst_265 = arith.constant dense<0.000000e+00> : vector<2x64xf32>
    %756 = tpu.matmul %750, %579, %cst_265 {dimension_numbers = #tpu.dot_dimension_numbers<[1], [0], [0], [1], [0, 0, 1, 1], [], []>} : vector<2x16xf32>, vector<16x64xf32>, vector<2x64xf32> -> vector<2x64xf32>
    %757 = arith.addf %755, %756 : vector<2x64xf32>
    %758 = vector.broadcast %581 : vector<1x64xf32> to vector<2x64xf32>
    %759 = arith.addf %757, %758 : vector<2x64xf32>
    %760 = vector.extract_strided_slice %759 {offsets = [0, 0], sizes = [2, 16], strides = [1, 1]} : vector<2x64xf32> to vector<2x16xf32>
    %761 = arith.negf %760 : vector<2x16xf32>
    %762 = math.exp %761 : vector<2x16xf32>
    %cst_266 = arith.constant 1.000000e+00 : f32
    %763 = vector.broadcast %cst_266 : f32 to vector<2x16xf32>
    %764 = arith.addf %763, %762 : vector<2x16xf32>
    %765 = arith.divf %763, %764 : vector<2x16xf32>
    %766 = vector.extract_strided_slice %759 {offsets = [0, 16], sizes = [2, 16], strides = [1, 1]} : vector<2x64xf32> to vector<2x16xf32>
    %767 = arith.negf %766 : vector<2x16xf32>
    %768 = math.exp %767 : vector<2x16xf32>
    %cst_267 = arith.constant 1.000000e+00 : f32
    %769 = vector.broadcast %cst_267 : f32 to vector<2x16xf32>
    %770 = arith.addf %769, %768 : vector<2x16xf32>
    %771 = arith.divf %769, %770 : vector<2x16xf32>
    %772 = vector.extract_strided_slice %759 {offsets = [0, 32], sizes = [2, 16], strides = [1, 1]} : vector<2x64xf32> to vector<2x16xf32>
    %773 = math.tanh %772 : vector<2x16xf32>
    %774 = vector.extract_strided_slice %759 {offsets = [0, 48], sizes = [2, 16], strides = [1, 1]} : vector<2x64xf32> to vector<2x16xf32>
    %775 = arith.negf %774 : vector<2x16xf32>
    %776 = math.exp %775 : vector<2x16xf32>
    %cst_268 = arith.constant 1.000000e+00 : f32
    %777 = vector.broadcast %cst_268 : f32 to vector<2x16xf32>
    %778 = arith.addf %777, %776 : vector<2x16xf32>
    %779 = arith.divf %777, %778 : vector<2x16xf32>
    %780 = arith.mulf %771, %748 : vector<2x16xf32>
    %781 = arith.mulf %765, %773 : vector<2x16xf32>
    %782 = arith.addf %780, %781 : vector<2x16xf32>
    %783 = math.tanh %782 : vector<2x16xf32>
    %784 = arith.mulf %779, %783 : vector<2x16xf32>
    %c5_269 = arith.constant 5 : index
    %c0_270 = arith.constant 0 : index
    %c0_271 = arith.constant 0 : index
    %785 = vector.load %arg23[%c5_269, %c0_270, %c0_271] : memref<8x2x16xf32, #tpu.memory_space<vmem>>, vector<1x2x16xf32>
    %786 = vector.shape_cast %785 : vector<1x2x16xf32> to vector<2x16xf32>
    %787 = vector.shape_cast %784 : vector<2x16xf32> to vector<1x2x16xf32>
    tpu.vector_store %arg23[%c5_269, %c0_270, %c0_271], %787 {strides = array<i32>} : memref<8x2x16xf32, #tpu.memory_space<vmem>>, vector<1x2x16xf32>,
    %c6_272 = arith.constant 6 : index
    %c0_273 = arith.constant 0 : index
    %c0_274 = arith.constant 0 : index
    %788 = vector.load %arg21[%c6_272, %c0_273, %c0_274] : memref<8x2x64xf32, #tpu.memory_space<vmem>>, vector<1x2x64xf32>
    %789 = vector.shape_cast %788 : vector<1x2x64xf32> to vector<2x64xf32>
    %cst_275 = arith.constant dense<0.000000e+00> : vector<2x64xf32>
    %790 = tpu.matmul %784, %579, %cst_275 {dimension_numbers = #tpu.dot_dimension_numbers<[1], [0], [0], [1], [0, 0, 1, 1], [], []>} : vector<2x16xf32>, vector<16x64xf32>, vector<2x64xf32> -> vector<2x64xf32>
    %791 = arith.addf %789, %790 : vector<2x64xf32>
    %792 = vector.broadcast %581 : vector<1x64xf32> to vector<2x64xf32>
    %793 = arith.addf %791, %792 : vector<2x64xf32>
    %794 = vector.extract_strided_slice %793 {offsets = [0, 0], sizes = [2, 16], strides = [1, 1]} : vector<2x64xf32> to vector<2x16xf32>
    %795 = arith.negf %794 : vector<2x16xf32>
    %796 = math.exp %795 : vector<2x16xf32>
    %cst_276 = arith.constant 1.000000e+00 : f32
    %797 = vector.broadcast %cst_276 : f32 to vector<2x16xf32>
    %798 = arith.addf %797, %796 : vector<2x16xf32>
    %799 = arith.divf %797, %798 : vector<2x16xf32>
    %800 = vector.extract_strided_slice %793 {offsets = [0, 16], sizes = [2, 16], strides = [1, 1]} : vector<2x64xf32> to vector<2x16xf32>
    %801 = arith.negf %800 : vector<2x16xf32>
    %802 = math.exp %801 : vector<2x16xf32>
    %cst_277 = arith.constant 1.000000e+00 : f32
    %803 = vector.broadcast %cst_277 : f32 to vector<2x16xf32>
    %804 = arith.addf %803, %802 : vector<2x16xf32>
    %805 = arith.divf %803, %804 : vector<2x16xf32>
    %806 = vector.extract_strided_slice %793 {offsets = [0, 32], sizes = [2, 16], strides = [1, 1]} : vector<2x64xf32> to vector<2x16xf32>
    %807 = math.tanh %806 : vector<2x16xf32>
    %808 = vector.extract_strided_slice %793 {offsets = [0, 48], sizes = [2, 16], strides = [1, 1]} : vector<2x64xf32> to vector<2x16xf32>
    %809 = arith.negf %808 : vector<2x16xf32>
    %810 = math.exp %809 : vector<2x16xf32>
    %cst_278 = arith.constant 1.000000e+00 : f32
    %811 = vector.broadcast %cst_278 : f32 to vector<2x16xf32>
    %812 = arith.addf %811, %810 : vector<2x16xf32>
    %813 = arith.divf %811, %812 : vector<2x16xf32>
    %814 = arith.mulf %805, %782 : vector<2x16xf32>
    %815 = arith.mulf %799, %807 : vector<2x16xf32>
    %816 = arith.addf %814, %815 : vector<2x16xf32>
    %817 = math.tanh %816 : vector<2x16xf32>
    %818 = arith.mulf %813, %817 : vector<2x16xf32>
    %c6_279 = arith.constant 6 : index
    %c0_280 = arith.constant 0 : index
    %c0_281 = arith.constant 0 : index
    %819 = vector.load %arg23[%c6_279, %c0_280, %c0_281] : memref<8x2x16xf32, #tpu.memory_space<vmem>>, vector<1x2x16xf32>
    %820 = vector.shape_cast %819 : vector<1x2x16xf32> to vector<2x16xf32>
    %821 = vector.shape_cast %818 : vector<2x16xf32> to vector<1x2x16xf32>
    tpu.vector_store %arg23[%c6_279, %c0_280, %c0_281], %821 {strides = array<i32>} : memref<8x2x16xf32, #tpu.memory_space<vmem>>, vector<1x2x16xf32>,
    %c7_282 = arith.constant 7 : index
    %c0_283 = arith.constant 0 : index
    %c0_284 = arith.constant 0 : index
    %822 = vector.load %arg21[%c7_282, %c0_283, %c0_284] : memref<8x2x64xf32, #tpu.memory_space<vmem>>, vector<1x2x64xf32>
    %823 = vector.shape_cast %822 : vector<1x2x64xf32> to vector<2x64xf32>
    %cst_285 = arith.constant dense<0.000000e+00> : vector<2x64xf32>
    %824 = tpu.matmul %818, %579, %cst_285 {dimension_numbers = #tpu.dot_dimension_numbers<[1], [0], [0], [1], [0, 0, 1, 1], [], []>} : vector<2x16xf32>, vector<16x64xf32>, vector<2x64xf32> -> vector<2x64xf32>
    %825 = arith.addf %823, %824 : vector<2x64xf32>
    %826 = vector.broadcast %581 : vector<1x64xf32> to vector<2x64xf32>
    %827 = arith.addf %825, %826 : vector<2x64xf32>
    %828 = vector.extract_strided_slice %827 {offsets = [0, 0], sizes = [2, 16], strides = [1, 1]} : vector<2x64xf32> to vector<2x16xf32>
    %829 = arith.negf %828 : vector<2x16xf32>
    %830 = math.exp %829 : vector<2x16xf32>
    %cst_286 = arith.constant 1.000000e+00 : f32
    %831 = vector.broadcast %cst_286 : f32 to vector<2x16xf32>
    %832 = arith.addf %831, %830 : vector<2x16xf32>
    %833 = arith.divf %831, %832 : vector<2x16xf32>
    %834 = vector.extract_strided_slice %827 {offsets = [0, 16], sizes = [2, 16], strides = [1, 1]} : vector<2x64xf32> to vector<2x16xf32>
    %835 = arith.negf %834 : vector<2x16xf32>
    %836 = math.exp %835 : vector<2x16xf32>
    %cst_287 = arith.constant 1.000000e+00 : f32
    %837 = vector.broadcast %cst_287 : f32 to vector<2x16xf32>
    %838 = arith.addf %837, %836 : vector<2x16xf32>
    %839 = arith.divf %837, %838 : vector<2x16xf32>
    %840 = vector.extract_strided_slice %827 {offsets = [0, 32], sizes = [2, 16], strides = [1, 1]} : vector<2x64xf32> to vector<2x16xf32>
    %841 = math.tanh %840 : vector<2x16xf32>
    %842 = vector.extract_strided_slice %827 {offsets = [0, 48], sizes = [2, 16], strides = [1, 1]} : vector<2x64xf32> to vector<2x16xf32>
    %843 = arith.negf %842 : vector<2x16xf32>
    %844 = math.exp %843 : vector<2x16xf32>
    %cst_288 = arith.constant 1.000000e+00 : f32
    %845 = vector.broadcast %cst_288 : f32 to vector<2x16xf32>
    %846 = arith.addf %845, %844 : vector<2x16xf32>
    %847 = arith.divf %845, %846 : vector<2x16xf32>
    %848 = arith.mulf %839, %816 : vector<2x16xf32>
    %849 = arith.mulf %833, %841 : vector<2x16xf32>
    %850 = arith.addf %848, %849 : vector<2x16xf32>
    %851 = math.tanh %850 : vector<2x16xf32>
    %852 = arith.mulf %847, %851 : vector<2x16xf32>
    %c7_289 = arith.constant 7 : index
    %c0_290 = arith.constant 0 : index
    %c0_291 = arith.constant 0 : index
    %853 = vector.load %arg23[%c7_289, %c0_290, %c0_291] : memref<8x2x16xf32, #tpu.memory_space<vmem>>, vector<1x2x16xf32>
    %854 = vector.shape_cast %853 : vector<1x2x16xf32> to vector<2x16xf32>
    %855 = vector.shape_cast %852 : vector<2x16xf32> to vector<1x2x16xf32>
    tpu.vector_store %arg23[%c7_289, %c0_290, %c0_291], %855 {strides = array<i32>} : memref<8x2x16xf32, #tpu.memory_space<vmem>>, vector<1x2x16xf32>,
    %c1_292 = arith.constant 1 : index
    %c0_293 = arith.constant 0 : index
    %c0_294 = arith.constant 0 : index
    %856 = vector.load %arg6[%c1_292, %c0_293, %c0_294] : memref<2x16x64xf32, #tpu.memory_space<vmem>>, vector<1x16x64xf32>
    %857 = vector.shape_cast %856 : vector<1x16x64xf32> to vector<16x64xf32>
    %c1_295 = arith.constant 1 : index
    %c0_296 = arith.constant 0 : index
    %c0_297 = arith.constant 0 : index
    %858 = vector.load %arg7[%c1_295, %c0_296, %c0_297] : memref<2x1x64xf32, #tpu.memory_space<vmem>>, vector<1x1x64xf32>
    %859 = vector.shape_cast %858 : vector<1x1x64xf32> to vector<1x64xf32>
    %cst_298 = arith.constant 0.000000e+00 : f32
    %860 = vector.broadcast %cst_298 : f32 to vector<2x16xf32>
    %cst_299 = arith.constant 0.000000e+00 : f32
    %861 = vector.broadcast %cst_299 : f32 to vector<2x16xf32>
    %c7_300 = arith.constant 7 : index
    %c0_301 = arith.constant 0 : index
    %c0_302 = arith.constant 0 : index
    %862 = vector.load %arg22[%c7_300, %c0_301, %c0_302] : memref<8x2x64xf32, #tpu.memory_space<vmem>>, vector<1x2x64xf32>
    %863 = vector.shape_cast %862 : vector<1x2x64xf32> to vector<2x64xf32>
    %cst_303 = arith.constant dense<0.000000e+00> : vector<2x64xf32>
    %864 = tpu.matmul %860, %857, %cst_303 {dimension_numbers = #tpu.dot_dimension_numbers<[1], [0], [0], [1], [0, 0, 1, 1], [], []>} : vector<2x16xf32>, vector<16x64xf32>, vector<2x64xf32> -> vector<2x64xf32>
    %865 = arith.addf %863, %864 : vector<2x64xf32>
    %866 = vector.broadcast %859 : vector<1x64xf32> to vector<2x64xf32>
    %867 = arith.addf %865, %866 : vector<2x64xf32>
    %868 = vector.extract_strided_slice %867 {offsets = [0, 0], sizes = [2, 16], strides = [1, 1]} : vector<2x64xf32> to vector<2x16xf32>
    %869 = arith.negf %868 : vector<2x16xf32>
    %870 = math.exp %869 : vector<2x16xf32>
    %cst_304 = arith.constant 1.000000e+00 : f32
    %871 = vector.broadcast %cst_304 : f32 to vector<2x16xf32>
    %872 = arith.addf %871, %870 : vector<2x16xf32>
    %873 = arith.divf %871, %872 : vector<2x16xf32>
    %874 = vector.extract_strided_slice %867 {offsets = [0, 16], sizes = [2, 16], strides = [1, 1]} : vector<2x64xf32> to vector<2x16xf32>
    %875 = arith.negf %874 : vector<2x16xf32>
    %876 = math.exp %875 : vector<2x16xf32>
    %cst_305 = arith.constant 1.000000e+00 : f32
    %877 = vector.broadcast %cst_305 : f32 to vector<2x16xf32>
    %878 = arith.addf %877, %876 : vector<2x16xf32>
    %879 = arith.divf %877, %878 : vector<2x16xf32>
    %880 = vector.extract_strided_slice %867 {offsets = [0, 32], sizes = [2, 16], strides = [1, 1]} : vector<2x64xf32> to vector<2x16xf32>
    %881 = math.tanh %880 : vector<2x16xf32>
    %882 = vector.extract_strided_slice %867 {offsets = [0, 48], sizes = [2, 16], strides = [1, 1]} : vector<2x64xf32> to vector<2x16xf32>
    %883 = arith.negf %882 : vector<2x16xf32>
    %884 = math.exp %883 : vector<2x16xf32>
    %cst_306 = arith.constant 1.000000e+00 : f32
    %885 = vector.broadcast %cst_306 : f32 to vector<2x16xf32>
    %886 = arith.addf %885, %884 : vector<2x16xf32>
    %887 = arith.divf %885, %886 : vector<2x16xf32>
    %888 = arith.mulf %879, %861 : vector<2x16xf32>
    %889 = arith.mulf %873, %881 : vector<2x16xf32>
    %890 = arith.addf %888, %889 : vector<2x16xf32>
    %891 = math.tanh %890 : vector<2x16xf32>
    %892 = arith.mulf %887, %891 : vector<2x16xf32>
    %c7_307 = arith.constant 7 : index
    %c0_308 = arith.constant 0 : index
    %c0_309 = arith.constant 0 : index
    %893 = vector.load %arg24[%c7_307, %c0_308, %c0_309] : memref<8x2x16xf32, #tpu.memory_space<vmem>>, vector<1x2x16xf32>
    %894 = vector.shape_cast %893 : vector<1x2x16xf32> to vector<2x16xf32>
    %895 = vector.shape_cast %892 : vector<2x16xf32> to vector<1x2x16xf32>
    tpu.vector_store %arg24[%c7_307, %c0_308, %c0_309], %895 {strides = array<i32>} : memref<8x2x16xf32, #tpu.memory_space<vmem>>, vector<1x2x16xf32>,
    %c6_310 = arith.constant 6 : index
    %c0_311 = arith.constant 0 : index
    %c0_312 = arith.constant 0 : index
    %896 = vector.load %arg22[%c6_310, %c0_311, %c0_312] : memref<8x2x64xf32, #tpu.memory_space<vmem>>, vector<1x2x64xf32>
    %897 = vector.shape_cast %896 : vector<1x2x64xf32> to vector<2x64xf32>
    %cst_313 = arith.constant dense<0.000000e+00> : vector<2x64xf32>
    %898 = tpu.matmul %892, %857, %cst_313 {dimension_numbers = #tpu.dot_dimension_numbers<[1], [0], [0], [1], [0, 0, 1, 1], [], []>} : vector<2x16xf32>, vector<16x64xf32>, vector<2x64xf32> -> vector<2x64xf32>
    %899 = arith.addf %897, %898 : vector<2x64xf32>
    %900 = vector.broadcast %859 : vector<1x64xf32> to vector<2x64xf32>
    %901 = arith.addf %899, %900 : vector<2x64xf32>
    %902 = vector.extract_strided_slice %901 {offsets = [0, 0], sizes = [2, 16], strides = [1, 1]} : vector<2x64xf32> to vector<2x16xf32>
    %903 = arith.negf %902 : vector<2x16xf32>
    %904 = math.exp %903 : vector<2x16xf32>
    %cst_314 = arith.constant 1.000000e+00 : f32
    %905 = vector.broadcast %cst_314 : f32 to vector<2x16xf32>
    %906 = arith.addf %905, %904 : vector<2x16xf32>
    %907 = arith.divf %905, %906 : vector<2x16xf32>
    %908 = vector.extract_strided_slice %901 {offsets = [0, 16], sizes = [2, 16], strides = [1, 1]} : vector<2x64xf32> to vector<2x16xf32>
    %909 = arith.negf %908 : vector<2x16xf32>
    %910 = math.exp %909 : vector<2x16xf32>
    %cst_315 = arith.constant 1.000000e+00 : f32
    %911 = vector.broadcast %cst_315 : f32 to vector<2x16xf32>
    %912 = arith.addf %911, %910 : vector<2x16xf32>
    %913 = arith.divf %911, %912 : vector<2x16xf32>
    %914 = vector.extract_strided_slice %901 {offsets = [0, 32], sizes = [2, 16], strides = [1, 1]} : vector<2x64xf32> to vector<2x16xf32>
    %915 = math.tanh %914 : vector<2x16xf32>
    %916 = vector.extract_strided_slice %901 {offsets = [0, 48], sizes = [2, 16], strides = [1, 1]} : vector<2x64xf32> to vector<2x16xf32>
    %917 = arith.negf %916 : vector<2x16xf32>
    %918 = math.exp %917 : vector<2x16xf32>
    %cst_316 = arith.constant 1.000000e+00 : f32
    %919 = vector.broadcast %cst_316 : f32 to vector<2x16xf32>
    %920 = arith.addf %919, %918 : vector<2x16xf32>
    %921 = arith.divf %919, %920 : vector<2x16xf32>
    %922 = arith.mulf %913, %890 : vector<2x16xf32>
    %923 = arith.mulf %907, %915 : vector<2x16xf32>
    %924 = arith.addf %922, %923 : vector<2x16xf32>
    %925 = math.tanh %924 : vector<2x16xf32>
    %926 = arith.mulf %921, %925 : vector<2x16xf32>
    %c6_317 = arith.constant 6 : index
    %c0_318 = arith.constant 0 : index
    %c0_319 = arith.constant 0 : index
    %927 = vector.load %arg24[%c6_317, %c0_318, %c0_319] : memref<8x2x16xf32, #tpu.memory_space<vmem>>, vector<1x2x16xf32>
    %928 = vector.shape_cast %927 : vector<1x2x16xf32> to vector<2x16xf32>
    %929 = vector.shape_cast %926 : vector<2x16xf32> to vector<1x2x16xf32>
    tpu.vector_store %arg24[%c6_317, %c0_318, %c0_319], %929 {strides = array<i32>} : memref<8x2x16xf32, #tpu.memory_space<vmem>>, vector<1x2x16xf32>,
    %c5_320 = arith.constant 5 : index
    %c0_321 = arith.constant 0 : index
    %c0_322 = arith.constant 0 : index
    %930 = vector.load %arg22[%c5_320, %c0_321, %c0_322] : memref<8x2x64xf32, #tpu.memory_space<vmem>>, vector<1x2x64xf32>
    %931 = vector.shape_cast %930 : vector<1x2x64xf32> to vector<2x64xf32>
    %cst_323 = arith.constant dense<0.000000e+00> : vector<2x64xf32>
    %932 = tpu.matmul %926, %857, %cst_323 {dimension_numbers = #tpu.dot_dimension_numbers<[1], [0], [0], [1], [0, 0, 1, 1], [], []>} : vector<2x16xf32>, vector<16x64xf32>, vector<2x64xf32> -> vector<2x64xf32>
    %933 = arith.addf %931, %932 : vector<2x64xf32>
    %934 = vector.broadcast %859 : vector<1x64xf32> to vector<2x64xf32>
    %935 = arith.addf %933, %934 : vector<2x64xf32>
    %936 = vector.extract_strided_slice %935 {offsets = [0, 0], sizes = [2, 16], strides = [1, 1]} : vector<2x64xf32> to vector<2x16xf32>
    %937 = arith.negf %936 : vector<2x16xf32>
    %938 = math.exp %937 : vector<2x16xf32>
    %cst_324 = arith.constant 1.000000e+00 : f32
    %939 = vector.broadcast %cst_324 : f32 to vector<2x16xf32>
    %940 = arith.addf %939, %938 : vector<2x16xf32>
    %941 = arith.divf %939, %940 : vector<2x16xf32>
    %942 = vector.extract_strided_slice %935 {offsets = [0, 16], sizes = [2, 16], strides = [1, 1]} : vector<2x64xf32> to vector<2x16xf32>
    %943 = arith.negf %942 : vector<2x16xf32>
    %944 = math.exp %943 : vector<2x16xf32>
    %cst_325 = arith.constant 1.000000e+00 : f32
    %945 = vector.broadcast %cst_325 : f32 to vector<2x16xf32>
    %946 = arith.addf %945, %944 : vector<2x16xf32>
    %947 = arith.divf %945, %946 : vector<2x16xf32>
    %948 = vector.extract_strided_slice %935 {offsets = [0, 32], sizes = [2, 16], strides = [1, 1]} : vector<2x64xf32> to vector<2x16xf32>
    %949 = math.tanh %948 : vector<2x16xf32>
    %950 = vector.extract_strided_slice %935 {offsets = [0, 48], sizes = [2, 16], strides = [1, 1]} : vector<2x64xf32> to vector<2x16xf32>
    %951 = arith.negf %950 : vector<2x16xf32>
    %952 = math.exp %951 : vector<2x16xf32>
    %cst_326 = arith.constant 1.000000e+00 : f32
    %953 = vector.broadcast %cst_326 : f32 to vector<2x16xf32>
    %954 = arith.addf %953, %952 : vector<2x16xf32>
    %955 = arith.divf %953, %954 : vector<2x16xf32>
    %956 = arith.mulf %947, %924 : vector<2x16xf32>
    %957 = arith.mulf %941, %949 : vector<2x16xf32>
    %958 = arith.addf %956, %957 : vector<2x16xf32>
    %959 = math.tanh %958 : vector<2x16xf32>
    %960 = arith.mulf %955, %959 : vector<2x16xf32>
    %c5_327 = arith.constant 5 : index
    %c0_328 = arith.constant 0 : index
    %c0_329 = arith.constant 0 : index
    %961 = vector.load %arg24[%c5_327, %c0_328, %c0_329] : memref<8x2x16xf32, #tpu.memory_space<vmem>>, vector<1x2x16xf32>
    %962 = vector.shape_cast %961 : vector<1x2x16xf32> to vector<2x16xf32>
    %963 = vector.shape_cast %960 : vector<2x16xf32> to vector<1x2x16xf32>
    tpu.vector_store %arg24[%c5_327, %c0_328, %c0_329], %963 {strides = array<i32>} : memref<8x2x16xf32, #tpu.memory_space<vmem>>, vector<1x2x16xf32>,
    %c4_330 = arith.constant 4 : index
    %c0_331 = arith.constant 0 : index
    %c0_332 = arith.constant 0 : index
    %964 = vector.load %arg22[%c4_330, %c0_331, %c0_332] : memref<8x2x64xf32, #tpu.memory_space<vmem>>, vector<1x2x64xf32>
    %965 = vector.shape_cast %964 : vector<1x2x64xf32> to vector<2x64xf32>
    %cst_333 = arith.constant dense<0.000000e+00> : vector<2x64xf32>
    %966 = tpu.matmul %960, %857, %cst_333 {dimension_numbers = #tpu.dot_dimension_numbers<[1], [0], [0], [1], [0, 0, 1, 1], [], []>} : vector<2x16xf32>, vector<16x64xf32>, vector<2x64xf32> -> vector<2x64xf32>
    %967 = arith.addf %965, %966 : vector<2x64xf32>
    %968 = vector.broadcast %859 : vector<1x64xf32> to vector<2x64xf32>
    %969 = arith.addf %967, %968 : vector<2x64xf32>
    %970 = vector.extract_strided_slice %969 {offsets = [0, 0], sizes = [2, 16], strides = [1, 1]} : vector<2x64xf32> to vector<2x16xf32>
    %971 = arith.negf %970 : vector<2x16xf32>
    %972 = math.exp %971 : vector<2x16xf32>
    %cst_334 = arith.constant 1.000000e+00 : f32
    %973 = vector.broadcast %cst_334 : f32 to vector<2x16xf32>
    %974 = arith.addf %973, %972 : vector<2x16xf32>
    %975 = arith.divf %973, %974 : vector<2x16xf32>
    %976 = vector.extract_strided_slice %969 {offsets = [0, 16], sizes = [2, 16], strides = [1, 1]} : vector<2x64xf32> to vector<2x16xf32>
    %977 = arith.negf %976 : vector<2x16xf32>
    %978 = math.exp %977 : vector<2x16xf32>
    %cst_335 = arith.constant 1.000000e+00 : f32
    %979 = vector.broadcast %cst_335 : f32 to vector<2x16xf32>
    %980 = arith.addf %979, %978 : vector<2x16xf32>
    %981 = arith.divf %979, %980 : vector<2x16xf32>
    %982 = vector.extract_strided_slice %969 {offsets = [0, 32], sizes = [2, 16], strides = [1, 1]} : vector<2x64xf32> to vector<2x16xf32>
    %983 = math.tanh %982 : vector<2x16xf32>
    %984 = vector.extract_strided_slice %969 {offsets = [0, 48], sizes = [2, 16], strides = [1, 1]} : vector<2x64xf32> to vector<2x16xf32>
    %985 = arith.negf %984 : vector<2x16xf32>
    %986 = math.exp %985 : vector<2x16xf32>
    %cst_336 = arith.constant 1.000000e+00 : f32
    %987 = vector.broadcast %cst_336 : f32 to vector<2x16xf32>
    %988 = arith.addf %987, %986 : vector<2x16xf32>
    %989 = arith.divf %987, %988 : vector<2x16xf32>
    %990 = arith.mulf %981, %958 : vector<2x16xf32>
    %991 = arith.mulf %975, %983 : vector<2x16xf32>
    %992 = arith.addf %990, %991 : vector<2x16xf32>
    %993 = math.tanh %992 : vector<2x16xf32>
    %994 = arith.mulf %989, %993 : vector<2x16xf32>
    %c4_337 = arith.constant 4 : index
    %c0_338 = arith.constant 0 : index
    %c0_339 = arith.constant 0 : index
    %995 = vector.load %arg24[%c4_337, %c0_338, %c0_339] : memref<8x2x16xf32, #tpu.memory_space<vmem>>, vector<1x2x16xf32>
    %996 = vector.shape_cast %995 : vector<1x2x16xf32> to vector<2x16xf32>
    %997 = vector.shape_cast %994 : vector<2x16xf32> to vector<1x2x16xf32>
    tpu.vector_store %arg24[%c4_337, %c0_338, %c0_339], %997 {strides = array<i32>} : memref<8x2x16xf32, #tpu.memory_space<vmem>>, vector<1x2x16xf32>,
    %c3_340 = arith.constant 3 : index
    %c0_341 = arith.constant 0 : index
    %c0_342 = arith.constant 0 : index
    %998 = vector.load %arg22[%c3_340, %c0_341, %c0_342] : memref<8x2x64xf32, #tpu.memory_space<vmem>>, vector<1x2x64xf32>
    %999 = vector.shape_cast %998 : vector<1x2x64xf32> to vector<2x64xf32>
    %cst_343 = arith.constant dense<0.000000e+00> : vector<2x64xf32>
    %1000 = tpu.matmul %994, %857, %cst_343 {dimension_numbers = #tpu.dot_dimension_numbers<[1], [0], [0], [1], [0, 0, 1, 1], [], []>} : vector<2x16xf32>, vector<16x64xf32>, vector<2x64xf32> -> vector<2x64xf32>
    %1001 = arith.addf %999, %1000 : vector<2x64xf32>
    %1002 = vector.broadcast %859 : vector<1x64xf32> to vector<2x64xf32>
    %1003 = arith.addf %1001, %1002 : vector<2x64xf32>
    %1004 = vector.extract_strided_slice %1003 {offsets = [0, 0], sizes = [2, 16], strides = [1, 1]} : vector<2x64xf32> to vector<2x16xf32>
    %1005 = arith.negf %1004 : vector<2x16xf32>
    %1006 = math.exp %1005 : vector<2x16xf32>
    %cst_344 = arith.constant 1.000000e+00 : f32
    %1007 = vector.broadcast %cst_344 : f32 to vector<2x16xf32>
    %1008 = arith.addf %1007, %1006 : vector<2x16xf32>
    %1009 = arith.divf %1007, %1008 : vector<2x16xf32>
    %1010 = vector.extract_strided_slice %1003 {offsets = [0, 16], sizes = [2, 16], strides = [1, 1]} : vector<2x64xf32> to vector<2x16xf32>
    %1011 = arith.negf %1010 : vector<2x16xf32>
    %1012 = math.exp %1011 : vector<2x16xf32>
    %cst_345 = arith.constant 1.000000e+00 : f32
    %1013 = vector.broadcast %cst_345 : f32 to vector<2x16xf32>
    %1014 = arith.addf %1013, %1012 : vector<2x16xf32>
    %1015 = arith.divf %1013, %1014 : vector<2x16xf32>
    %1016 = vector.extract_strided_slice %1003 {offsets = [0, 32], sizes = [2, 16], strides = [1, 1]} : vector<2x64xf32> to vector<2x16xf32>
    %1017 = math.tanh %1016 : vector<2x16xf32>
    %1018 = vector.extract_strided_slice %1003 {offsets = [0, 48], sizes = [2, 16], strides = [1, 1]} : vector<2x64xf32> to vector<2x16xf32>
    %1019 = arith.negf %1018 : vector<2x16xf32>
    %1020 = math.exp %1019 : vector<2x16xf32>
    %cst_346 = arith.constant 1.000000e+00 : f32
    %1021 = vector.broadcast %cst_346 : f32 to vector<2x16xf32>
    %1022 = arith.addf %1021, %1020 : vector<2x16xf32>
    %1023 = arith.divf %1021, %1022 : vector<2x16xf32>
    %1024 = arith.mulf %1015, %992 : vector<2x16xf32>
    %1025 = arith.mulf %1009, %1017 : vector<2x16xf32>
    %1026 = arith.addf %1024, %1025 : vector<2x16xf32>
    %1027 = math.tanh %1026 : vector<2x16xf32>
    %1028 = arith.mulf %1023, %1027 : vector<2x16xf32>
    %c3_347 = arith.constant 3 : index
    %c0_348 = arith.constant 0 : index
    %c0_349 = arith.constant 0 : index
    %1029 = vector.load %arg24[%c3_347, %c0_348, %c0_349] : memref<8x2x16xf32, #tpu.memory_space<vmem>>, vector<1x2x16xf32>
    %1030 = vector.shape_cast %1029 : vector<1x2x16xf32> to vector<2x16xf32>
    %1031 = vector.shape_cast %1028 : vector<2x16xf32> to vector<1x2x16xf32>
    tpu.vector_store %arg24[%c3_347, %c0_348, %c0_349], %1031 {strides = array<i32>} : memref<8x2x16xf32, #tpu.memory_space<vmem>>, vector<1x2x16xf32>,
    %c2_350 = arith.constant 2 : index
    %c0_351 = arith.constant 0 : index
    %c0_352 = arith.constant 0 : index
    %1032 = vector.load %arg22[%c2_350, %c0_351, %c0_352] : memref<8x2x64xf32, #tpu.memory_space<vmem>>, vector<1x2x64xf32>
    %1033 = vector.shape_cast %1032 : vector<1x2x64xf32> to vector<2x64xf32>
    %cst_353 = arith.constant dense<0.000000e+00> : vector<2x64xf32>
    %1034 = tpu.matmul %1028, %857, %cst_353 {dimension_numbers = #tpu.dot_dimension_numbers<[1], [0], [0], [1], [0, 0, 1, 1], [], []>} : vector<2x16xf32>, vector<16x64xf32>, vector<2x64xf32> -> vector<2x64xf32>
    %1035 = arith.addf %1033, %1034 : vector<2x64xf32>
    %1036 = vector.broadcast %859 : vector<1x64xf32> to vector<2x64xf32>
    %1037 = arith.addf %1035, %1036 : vector<2x64xf32>
    %1038 = vector.extract_strided_slice %1037 {offsets = [0, 0], sizes = [2, 16], strides = [1, 1]} : vector<2x64xf32> to vector<2x16xf32>
    %1039 = arith.negf %1038 : vector<2x16xf32>
    %1040 = math.exp %1039 : vector<2x16xf32>
    %cst_354 = arith.constant 1.000000e+00 : f32
    %1041 = vector.broadcast %cst_354 : f32 to vector<2x16xf32>
    %1042 = arith.addf %1041, %1040 : vector<2x16xf32>
    %1043 = arith.divf %1041, %1042 : vector<2x16xf32>
    %1044 = vector.extract_strided_slice %1037 {offsets = [0, 16], sizes = [2, 16], strides = [1, 1]} : vector<2x64xf32> to vector<2x16xf32>
    %1045 = arith.negf %1044 : vector<2x16xf32>
    %1046 = math.exp %1045 : vector<2x16xf32>
    %cst_355 = arith.constant 1.000000e+00 : f32
    %1047 = vector.broadcast %cst_355 : f32 to vector<2x16xf32>
    %1048 = arith.addf %1047, %1046 : vector<2x16xf32>
    %1049 = arith.divf %1047, %1048 : vector<2x16xf32>
    %1050 = vector.extract_strided_slice %1037 {offsets = [0, 32], sizes = [2, 16], strides = [1, 1]} : vector<2x64xf32> to vector<2x16xf32>
    %1051 = math.tanh %1050 : vector<2x16xf32>
    %1052 = vector.extract_strided_slice %1037 {offsets = [0, 48], sizes = [2, 16], strides = [1, 1]} : vector<2x64xf32> to vector<2x16xf32>
    %1053 = arith.negf %1052 : vector<2x16xf32>
    %1054 = math.exp %1053 : vector<2x16xf32>
    %cst_356 = arith.constant 1.000000e+00 : f32
    %1055 = vector.broadcast %cst_356 : f32 to vector<2x16xf32>
    %1056 = arith.addf %1055, %1054 : vector<2x16xf32>
    %1057 = arith.divf %1055, %1056 : vector<2x16xf32>
    %1058 = arith.mulf %1049, %1026 : vector<2x16xf32>
    %1059 = arith.mulf %1043, %1051 : vector<2x16xf32>
    %1060 = arith.addf %1058, %1059 : vector<2x16xf32>
    %1061 = math.tanh %1060 : vector<2x16xf32>
    %1062 = arith.mulf %1057, %1061 : vector<2x16xf32>
    %c2_357 = arith.constant 2 : index
    %c0_358 = arith.constant 0 : index
    %c0_359 = arith.constant 0 : index
    %1063 = vector.load %arg24[%c2_357, %c0_358, %c0_359] : memref<8x2x16xf32, #tpu.memory_space<vmem>>, vector<1x2x16xf32>
    %1064 = vector.shape_cast %1063 : vector<1x2x16xf32> to vector<2x16xf32>
    %1065 = vector.shape_cast %1062 : vector<2x16xf32> to vector<1x2x16xf32>
    tpu.vector_store %arg24[%c2_357, %c0_358, %c0_359], %1065 {strides = array<i32>} : memref<8x2x16xf32, #tpu.memory_space<vmem>>, vector<1x2x16xf32>,
    %c1_360 = arith.constant 1 : index
    %c0_361 = arith.constant 0 : index
    %c0_362 = arith.constant 0 : index
    %1066 = vector.load %arg22[%c1_360, %c0_361, %c0_362] : memref<8x2x64xf32, #tpu.memory_space<vmem>>, vector<1x2x64xf32>
    %1067 = vector.shape_cast %1066 : vector<1x2x64xf32> to vector<2x64xf32>
    %cst_363 = arith.constant dense<0.000000e+00> : vector<2x64xf32>
    %1068 = tpu.matmul %1062, %857, %cst_363 {dimension_numbers = #tpu.dot_dimension_numbers<[1], [0], [0], [1], [0, 0, 1, 1], [], []>} : vector<2x16xf32>, vector<16x64xf32>, vector<2x64xf32> -> vector<2x64xf32>
    %1069 = arith.addf %1067, %1068 : vector<2x64xf32>
    %1070 = vector.broadcast %859 : vector<1x64xf32> to vector<2x64xf32>
    %1071 = arith.addf %1069, %1070 : vector<2x64xf32>
    %1072 = vector.extract_strided_slice %1071 {offsets = [0, 0], sizes = [2, 16], strides = [1, 1]} : vector<2x64xf32> to vector<2x16xf32>
    %1073 = arith.negf %1072 : vector<2x16xf32>
    %1074 = math.exp %1073 : vector<2x16xf32>
    %cst_364 = arith.constant 1.000000e+00 : f32
    %1075 = vector.broadcast %cst_364 : f32 to vector<2x16xf32>
    %1076 = arith.addf %1075, %1074 : vector<2x16xf32>
    %1077 = arith.divf %1075, %1076 : vector<2x16xf32>
    %1078 = vector.extract_strided_slice %1071 {offsets = [0, 16], sizes = [2, 16], strides = [1, 1]} : vector<2x64xf32> to vector<2x16xf32>
    %1079 = arith.negf %1078 : vector<2x16xf32>
    %1080 = math.exp %1079 : vector<2x16xf32>
    %cst_365 = arith.constant 1.000000e+00 : f32
    %1081 = vector.broadcast %cst_365 : f32 to vector<2x16xf32>
    %1082 = arith.addf %1081, %1080 : vector<2x16xf32>
    %1083 = arith.divf %1081, %1082 : vector<2x16xf32>
    %1084 = vector.extract_strided_slice %1071 {offsets = [0, 32], sizes = [2, 16], strides = [1, 1]} : vector<2x64xf32> to vector<2x16xf32>
    %1085 = math.tanh %1084 : vector<2x16xf32>
    %1086 = vector.extract_strided_slice %1071 {offsets = [0, 48], sizes = [2, 16], strides = [1, 1]} : vector<2x64xf32> to vector<2x16xf32>
    %1087 = arith.negf %1086 : vector<2x16xf32>
    %1088 = math.exp %1087 : vector<2x16xf32>
    %cst_366 = arith.constant 1.000000e+00 : f32
    %1089 = vector.broadcast %cst_366 : f32 to vector<2x16xf32>
    %1090 = arith.addf %1089, %1088 : vector<2x16xf32>
    %1091 = arith.divf %1089, %1090 : vector<2x16xf32>
    %1092 = arith.mulf %1083, %1060 : vector<2x16xf32>
    %1093 = arith.mulf %1077, %1085 : vector<2x16xf32>
    %1094 = arith.addf %1092, %1093 : vector<2x16xf32>
    %1095 = math.tanh %1094 : vector<2x16xf32>
    %1096 = arith.mulf %1091, %1095 : vector<2x16xf32>
    %c1_367 = arith.constant 1 : index
    %c0_368 = arith.constant 0 : index
    %c0_369 = arith.constant 0 : index
    %1097 = vector.load %arg24[%c1_367, %c0_368, %c0_369] : memref<8x2x16xf32, #tpu.memory_space<vmem>>, vector<1x2x16xf32>
    %1098 = vector.shape_cast %1097 : vector<1x2x16xf32> to vector<2x16xf32>
    %1099 = vector.shape_cast %1096 : vector<2x16xf32> to vector<1x2x16xf32>
    tpu.vector_store %arg24[%c1_367, %c0_368, %c0_369], %1099 {strides = array<i32>} : memref<8x2x16xf32, #tpu.memory_space<vmem>>, vector<1x2x16xf32>,
    %c0_370 = arith.constant 0 : index
    %c0_371 = arith.constant 0 : index
    %c0_372 = arith.constant 0 : index
    %1100 = vector.load %arg22[%c0_370, %c0_371, %c0_372] : memref<8x2x64xf32, #tpu.memory_space<vmem>>, vector<1x2x64xf32>
    %1101 = vector.shape_cast %1100 : vector<1x2x64xf32> to vector<2x64xf32>
    %cst_373 = arith.constant dense<0.000000e+00> : vector<2x64xf32>
    %1102 = tpu.matmul %1096, %857, %cst_373 {dimension_numbers = #tpu.dot_dimension_numbers<[1], [0], [0], [1], [0, 0, 1, 1], [], []>} : vector<2x16xf32>, vector<16x64xf32>, vector<2x64xf32> -> vector<2x64xf32>
    %1103 = arith.addf %1101, %1102 : vector<2x64xf32>
    %1104 = vector.broadcast %859 : vector<1x64xf32> to vector<2x64xf32>
    %1105 = arith.addf %1103, %1104 : vector<2x64xf32>
    %1106 = vector.extract_strided_slice %1105 {offsets = [0, 0], sizes = [2, 16], strides = [1, 1]} : vector<2x64xf32> to vector<2x16xf32>
    %1107 = arith.negf %1106 : vector<2x16xf32>
    %1108 = math.exp %1107 : vector<2x16xf32>
    %cst_374 = arith.constant 1.000000e+00 : f32
    %1109 = vector.broadcast %cst_374 : f32 to vector<2x16xf32>
    %1110 = arith.addf %1109, %1108 : vector<2x16xf32>
    %1111 = arith.divf %1109, %1110 : vector<2x16xf32>
    %1112 = vector.extract_strided_slice %1105 {offsets = [0, 16], sizes = [2, 16], strides = [1, 1]} : vector<2x64xf32> to vector<2x16xf32>
    %1113 = arith.negf %1112 : vector<2x16xf32>
    %1114 = math.exp %1113 : vector<2x16xf32>
    %cst_375 = arith.constant 1.000000e+00 : f32
    %1115 = vector.broadcast %cst_375 : f32 to vector<2x16xf32>
    %1116 = arith.addf %1115, %1114 : vector<2x16xf32>
    %1117 = arith.divf %1115, %1116 : vector<2x16xf32>
    %1118 = vector.extract_strided_slice %1105 {offsets = [0, 32], sizes = [2, 16], strides = [1, 1]} : vector<2x64xf32> to vector<2x16xf32>
    %1119 = math.tanh %1118 : vector<2x16xf32>
    %1120 = vector.extract_strided_slice %1105 {offsets = [0, 48], sizes = [2, 16], strides = [1, 1]} : vector<2x64xf32> to vector<2x16xf32>
    %1121 = arith.negf %1120 : vector<2x16xf32>
    %1122 = math.exp %1121 : vector<2x16xf32>
    %cst_376 = arith.constant 1.000000e+00 : f32
    %1123 = vector.broadcast %cst_376 : f32 to vector<2x16xf32>
    %1124 = arith.addf %1123, %1122 : vector<2x16xf32>
    %1125 = arith.divf %1123, %1124 : vector<2x16xf32>
    %1126 = arith.mulf %1117, %1094 : vector<2x16xf32>
    %1127 = arith.mulf %1111, %1119 : vector<2x16xf32>
    %1128 = arith.addf %1126, %1127 : vector<2x16xf32>
    %1129 = math.tanh %1128 : vector<2x16xf32>
    %1130 = arith.mulf %1125, %1129 : vector<2x16xf32>
    %c0_377 = arith.constant 0 : index
    %c0_378 = arith.constant 0 : index
    %c0_379 = arith.constant 0 : index
    %1131 = vector.load %arg24[%c0_377, %c0_378, %c0_379] : memref<8x2x16xf32, #tpu.memory_space<vmem>>, vector<1x2x16xf32>
    %1132 = vector.shape_cast %1131 : vector<1x2x16xf32> to vector<2x16xf32>
    %1133 = vector.shape_cast %1130 : vector<2x16xf32> to vector<1x2x16xf32>
    tpu.vector_store %arg24[%c0_377, %c0_378, %c0_379], %1133 {strides = array<i32>} : memref<8x2x16xf32, #tpu.memory_space<vmem>>, vector<1x2x16xf32>,
    %c0_380 = arith.constant 0 : index
    %c0_381 = arith.constant 0 : index
    %c0_382 = arith.constant 0 : index
    %1134 = vector.load %arg23[%c0_380, %c0_381, %c0_382] : memref<8x2x16xf32, #tpu.memory_space<vmem>>, vector<8x2x16xf32>
    %c0_383 = arith.constant 0 : index
    %c0_384 = arith.constant 0 : index
    %c0_385 = arith.constant 0 : index
    %1135 = vector.load %arg24[%c0_383, %c0_384, %c0_385] : memref<8x2x16xf32, #tpu.memory_space<vmem>>, vector<8x2x16xf32>
    %1136 = tpu.concatenate %1134, %1135 in 2 : vector<8x2x16xf32>, vector<8x2x16xf32> -> vector<8x2x32xf32>
    %1137 = arith.truncf %0 : vector<8x2x16xf32> to vector<8x2x16xbf16>
    %c0_386 = arith.constant 0 : index
    %c0_387 = arith.constant 0 : index
    %1138 = vector.load %arg8[%c0_386, %c0_387] : memref<16x16xbf16, #tpu.memory_space<vmem>>, vector<16x16xbf16>
    %cst_388 = arith.constant dense<0.000000e+00> : vector<8x2x16xf32>
    %1139 = tpu.matmul %1137, %1138, %cst_388 {dimension_numbers = #tpu.dot_dimension_numbers<[2], [0], [0, 1], [1], [0, 0, 0, 1, 1, 1], [], []>} : vector<8x2x16xbf16>, vector<16x16xbf16>, vector<8x2x16xf32> -> vector<8x2x16xf32>
    %c0_389 = arith.constant 0 : index
    %c0_390 = arith.constant 0 : index
    %1140 = vector.load %arg9[%c0_389, %c0_390] : memref<1x16xf32, #tpu.memory_space<vmem>>, vector<1x16xf32>
    %1141 = vector.shape_cast %1140 : vector<1x16xf32> to vector<1x1x16xf32>
    %1142 = vector.broadcast %1141 : vector<1x1x16xf32> to vector<8x2x16xf32>
    %1143 = arith.addf %1139, %1142 : vector<8x2x16xf32>
    %cst_391 = arith.constant 0.000000e+00 : f32
    %1144 = vector.broadcast %cst_391 : f32 to vector<8x2x16xf32>
    %1145 = arith.maximumf %1143, %1144 : vector<8x2x16xf32>
    %cst_392 = arith.constant 0.000000e+00 : f32
    %1146 = vector.broadcast %cst_392 : f32 to vector<12x2x16xf32>
    %c0_393 = arith.constant 0 : index
    %c0_394 = arith.constant 0 : index
    %c0_395 = arith.constant 0 : index
    %1147 = vector.load %arg25[%c0_393, %c0_394, %c0_395] : memref<12x2x16xf32, #tpu.memory_space<vmem>>, vector<12x2x16xf32>
    tpu.vector_store %arg25[%c0_393, %c0_394, %c0_395], %1146 {strides = array<i32>} : memref<12x2x16xf32, #tpu.memory_space<vmem>>, vector<12x2x16xf32>,
    %c2_396 = arith.constant 2 : index
    %c0_397 = arith.constant 0 : index
    %c0_398 = arith.constant 0 : index
    %1148 = vector.load %arg25[%c2_396, %c0_397, %c0_398] : memref<12x2x16xf32, #tpu.memory_space<vmem>>, vector<8x2x16xf32>
    tpu.vector_store %arg25[%c2_396, %c0_397, %c0_398], %1145 {strides = array<i32>} : memref<12x2x16xf32, #tpu.memory_space<vmem>>, vector<8x2x16xf32>,
    %c1_399 = arith.constant 1 : index
    %c0_400 = arith.constant 0 : index
    %c0_401 = arith.constant 0 : index
    %1149 = vector.load %arg25[%c1_399, %c0_400, %c0_401] : memref<12x2x16xf32, #tpu.memory_space<vmem>>, vector<8x2x16xf32>
    %c2_402 = arith.constant 2 : index
    %c0_403 = arith.constant 0 : index
    %c0_404 = arith.constant 0 : index
    %1150 = vector.load %arg25[%c2_402, %c0_403, %c0_404] : memref<12x2x16xf32, #tpu.memory_space<vmem>>, vector<8x2x16xf32>
    %c3_405 = arith.constant 3 : index
    %c0_406 = arith.constant 0 : index
    %c0_407 = arith.constant 0 : index
    %1151 = vector.load %arg25[%c3_405, %c0_406, %c0_407] : memref<12x2x16xf32, #tpu.memory_space<vmem>>, vector<8x2x16xf32>
    %1152 = tpu.concatenate %1149, %1150, %1151 in 2 : vector<8x2x16xf32>, vector<8x2x16xf32>, vector<8x2x16xf32> -> vector<8x2x48xf32>
    %1153 = arith.truncf %1152 : vector<8x2x48xf32> to vector<8x2x48xbf16>
    %c0_408 = arith.constant 0 : index
    %c0_409 = arith.constant 0 : index
    %1154 = vector.load %arg10[%c0_408, %c0_409] : memref<48x16xbf16, #tpu.memory_space<vmem>>, vector<48x16xbf16>
    %cst_410 = arith.constant dense<0.000000e+00> : vector<8x2x16xf32>
    %1155 = tpu.matmul %1153, %1154, %cst_410 {dimension_numbers = #tpu.dot_dimension_numbers<[2], [0], [0, 1], [1], [0, 0, 0, 1, 1, 1], [], []>} : vector<8x2x48xbf16>, vector<48x16xbf16>, vector<8x2x16xf32> -> vector<8x2x16xf32>
    %c0_411 = arith.constant 0 : index
    %c0_412 = arith.constant 0 : index
    %1156 = vector.load %arg11[%c0_411, %c0_412] : memref<1x16xf32, #tpu.memory_space<vmem>>, vector<1x16xf32>
    %1157 = vector.shape_cast %1156 : vector<1x16xf32> to vector<1x1x16xf32>
    %1158 = vector.broadcast %1157 : vector<1x1x16xf32> to vector<8x2x16xf32>
    %1159 = arith.addf %1155, %1158 : vector<8x2x16xf32>
    %cst_413 = arith.constant 0.000000e+00 : f32
    %1160 = vector.broadcast %cst_413 : f32 to vector<8x2x16xf32>
    %1161 = arith.maximumf %1159, %1160 : vector<8x2x16xf32>
    %cst_414 = arith.constant 0.000000e+00 : f32
    %1162 = vector.broadcast %cst_414 : f32 to vector<12x2x16xf32>
    %c0_415 = arith.constant 0 : index
    %c0_416 = arith.constant 0 : index
    %c0_417 = arith.constant 0 : index
    %1163 = vector.load %arg25[%c0_415, %c0_416, %c0_417] : memref<12x2x16xf32, #tpu.memory_space<vmem>>, vector<12x2x16xf32>
    tpu.vector_store %arg25[%c0_415, %c0_416, %c0_417], %1162 {strides = array<i32>} : memref<12x2x16xf32, #tpu.memory_space<vmem>>, vector<12x2x16xf32>,
    %c2_418 = arith.constant 2 : index
    %c0_419 = arith.constant 0 : index
    %c0_420 = arith.constant 0 : index
    %1164 = vector.load %arg25[%c2_418, %c0_419, %c0_420] : memref<12x2x16xf32, #tpu.memory_space<vmem>>, vector<8x2x16xf32>
    tpu.vector_store %arg25[%c2_418, %c0_419, %c0_420], %1161 {strides = array<i32>} : memref<12x2x16xf32, #tpu.memory_space<vmem>>, vector<8x2x16xf32>,
    %c1_421 = arith.constant 1 : index
    %c0_422 = arith.constant 0 : index
    %c0_423 = arith.constant 0 : index
    %1165 = vector.load %arg25[%c1_421, %c0_422, %c0_423] : memref<12x2x16xf32, #tpu.memory_space<vmem>>, vector<8x2x16xf32>
    %c2_424 = arith.constant 2 : index
    %c0_425 = arith.constant 0 : index
    %c0_426 = arith.constant 0 : index
    %1166 = vector.load %arg25[%c2_424, %c0_425, %c0_426] : memref<12x2x16xf32, #tpu.memory_space<vmem>>, vector<8x2x16xf32>
    %c3_427 = arith.constant 3 : index
    %c0_428 = arith.constant 0 : index
    %c0_429 = arith.constant 0 : index
    %1167 = vector.load %arg25[%c3_427, %c0_428, %c0_429] : memref<12x2x16xf32, #tpu.memory_space<vmem>>, vector<8x2x16xf32>
    %1168 = tpu.concatenate %1165, %1166, %1167 in 2 : vector<8x2x16xf32>, vector<8x2x16xf32>, vector<8x2x16xf32> -> vector<8x2x48xf32>
    %1169 = arith.truncf %1168 : vector<8x2x48xf32> to vector<8x2x48xbf16>
    %c0_430 = arith.constant 0 : index
    %c0_431 = arith.constant 0 : index
    %1170 = vector.load %arg12[%c0_430, %c0_431] : memref<48x16xbf16, #tpu.memory_space<vmem>>, vector<48x16xbf16>
    %cst_432 = arith.constant dense<0.000000e+00> : vector<8x2x16xf32>
    %1171 = tpu.matmul %1169, %1170, %cst_432 {dimension_numbers = #tpu.dot_dimension_numbers<[2], [0], [0, 1], [1], [0, 0, 0, 1, 1, 1], [], []>} : vector<8x2x48xbf16>, vector<48x16xbf16>, vector<8x2x16xf32> -> vector<8x2x16xf32>
    %c0_433 = arith.constant 0 : index
    %c0_434 = arith.constant 0 : index
    %1172 = vector.load %arg13[%c0_433, %c0_434] : memref<1x16xf32, #tpu.memory_space<vmem>>, vector<1x16xf32>
    %1173 = vector.shape_cast %1172 : vector<1x16xf32> to vector<1x1x16xf32>
    %1174 = vector.broadcast %1173 : vector<1x1x16xf32> to vector<8x2x16xf32>
    %1175 = arith.addf %1171, %1174 : vector<8x2x16xf32>
    %cst_435 = arith.constant 0.000000e+00 : f32
    %1176 = vector.broadcast %cst_435 : f32 to vector<8x2x16xf32>
    %1177 = arith.maximumf %1175, %1176 : vector<8x2x16xf32>
    %cst_436 = arith.constant 0.000000e+00 : f32
    %1178 = vector.broadcast %cst_436 : f32 to vector<12x2x16xf32>
    %c0_437 = arith.constant 0 : index
    %c0_438 = arith.constant 0 : index
    %c0_439 = arith.constant 0 : index
    %1179 = vector.load %arg25[%c0_437, %c0_438, %c0_439] : memref<12x2x16xf32, #tpu.memory_space<vmem>>, vector<12x2x16xf32>
    tpu.vector_store %arg25[%c0_437, %c0_438, %c0_439], %1178 {strides = array<i32>} : memref<12x2x16xf32, #tpu.memory_space<vmem>>, vector<12x2x16xf32>,
    %c2_440 = arith.constant 2 : index
    %c0_441 = arith.constant 0 : index
    %c0_442 = arith.constant 0 : index
    %1180 = vector.load %arg25[%c2_440, %c0_441, %c0_442] : memref<12x2x16xf32, #tpu.memory_space<vmem>>, vector<8x2x16xf32>
    tpu.vector_store %arg25[%c2_440, %c0_441, %c0_442], %1177 {strides = array<i32>} : memref<12x2x16xf32, #tpu.memory_space<vmem>>, vector<8x2x16xf32>,
    %c0_443 = arith.constant 0 : index
    %c0_444 = arith.constant 0 : index
    %c0_445 = arith.constant 0 : index
    %1181 = vector.load %arg25[%c0_443, %c0_444, %c0_445] : memref<12x2x16xf32, #tpu.memory_space<vmem>>, vector<8x2x16xf32>
    %c1_446 = arith.constant 1 : index
    %c0_447 = arith.constant 0 : index
    %c0_448 = arith.constant 0 : index
    %1182 = vector.load %arg25[%c1_446, %c0_447, %c0_448] : memref<12x2x16xf32, #tpu.memory_space<vmem>>, vector<8x2x16xf32>
    %c2_449 = arith.constant 2 : index
    %c0_450 = arith.constant 0 : index
    %c0_451 = arith.constant 0 : index
    %1183 = vector.load %arg25[%c2_449, %c0_450, %c0_451] : memref<12x2x16xf32, #tpu.memory_space<vmem>>, vector<8x2x16xf32>
    %c3_452 = arith.constant 3 : index
    %c0_453 = arith.constant 0 : index
    %c0_454 = arith.constant 0 : index
    %1184 = vector.load %arg25[%c3_452, %c0_453, %c0_454] : memref<12x2x16xf32, #tpu.memory_space<vmem>>, vector<8x2x16xf32>
    %c4_455 = arith.constant 4 : index
    %c0_456 = arith.constant 0 : index
    %c0_457 = arith.constant 0 : index
    %1185 = vector.load %arg25[%c4_455, %c0_456, %c0_457] : memref<12x2x16xf32, #tpu.memory_space<vmem>>, vector<8x2x16xf32>
    %1186 = tpu.concatenate %1181, %1182, %1183, %1184, %1185 in 2 : vector<8x2x16xf32>, vector<8x2x16xf32>, vector<8x2x16xf32>, vector<8x2x16xf32>, vector<8x2x16xf32> -> vector<8x2x80xf32>
    %1187 = arith.truncf %1186 : vector<8x2x80xf32> to vector<8x2x80xbf16>
    %c0_458 = arith.constant 0 : index
    %c0_459 = arith.constant 0 : index
    %1188 = vector.load %arg14[%c0_458, %c0_459] : memref<80x16xbf16, #tpu.memory_space<vmem>>, vector<80x16xbf16>
    %cst_460 = arith.constant dense<0.000000e+00> : vector<8x2x16xf32>
    %1189 = tpu.matmul %1187, %1188, %cst_460 {dimension_numbers = #tpu.dot_dimension_numbers<[2], [0], [0, 1], [1], [0, 0, 0, 1, 1, 1], [], []>} : vector<8x2x80xbf16>, vector<80x16xbf16>, vector<8x2x16xf32> -> vector<8x2x16xf32>
    %c0_461 = arith.constant 0 : index
    %c0_462 = arith.constant 0 : index
    %1190 = vector.load %arg15[%c0_461, %c0_462] : memref<1x16xf32, #tpu.memory_space<vmem>>, vector<1x16xf32>
    %1191 = vector.shape_cast %1190 : vector<1x16xf32> to vector<1x1x16xf32>
    %1192 = vector.broadcast %1191 : vector<1x1x16xf32> to vector<8x2x16xf32>
    %1193 = arith.addf %1189, %1192 : vector<8x2x16xf32>
    %cst_463 = arith.constant 0.000000e+00 : f32
    %1194 = vector.broadcast %cst_463 : f32 to vector<8x2x16xf32>
    %1195 = arith.maximumf %1193, %1194 : vector<8x2x16xf32>
    %1196 = tpu.concatenate %1195, %1136 in 2 : vector<8x2x16xf32>, vector<8x2x32xf32> -> vector<8x2x48xf32>
    %cst_464 = arith.constant 0.000000e+00 : f32
    %1197 = vector.broadcast %cst_464 : f32 to vector<8x2x48xf32>
    %1198 = arith.maximumf %1196, %1197 : vector<8x2x48xf32>
    %1199 = arith.truncf %1198 : vector<8x2x48xf32> to vector<8x2x48xbf16>
    %c0_465 = arith.constant 0 : index
    %c0_466 = arith.constant 0 : index
    %1200 = vector.load %arg16[%c0_465, %c0_466] : memref<48x24xbf16, #tpu.memory_space<vmem>>, vector<48x24xbf16>
    %cst_467 = arith.constant dense<0.000000e+00> : vector<8x2x24xf32>
    %1201 = tpu.matmul %1199, %1200, %cst_467 {dimension_numbers = #tpu.dot_dimension_numbers<[2], [0], [0, 1], [1], [0, 0, 0, 1, 1, 1], [], []>} : vector<8x2x48xbf16>, vector<48x24xbf16>, vector<8x2x24xf32> -> vector<8x2x24xf32>
    %c0_468 = arith.constant 0 : index
    %c0_469 = arith.constant 0 : index
    %1202 = vector.load %arg17[%c0_468, %c0_469] : memref<1x24xf32, #tpu.memory_space<vmem>>, vector<1x24xf32>
    %1203 = vector.shape_cast %1202 : vector<1x24xf32> to vector<1x1x24xf32>
    %1204 = vector.broadcast %1203 : vector<1x1x24xf32> to vector<8x2x24xf32>
    %1205 = arith.addf %1201, %1204 : vector<8x2x24xf32>
    %cst_470 = arith.constant 0.000000e+00 : f32
    %1206 = vector.broadcast %cst_470 : f32 to vector<8x2x24xf32>
    %1207 = arith.maximumf %1205, %1206 : vector<8x2x24xf32>
    %1208 = arith.truncf %1207 : vector<8x2x24xf32> to vector<8x2x24xbf16>
    %c0_471 = arith.constant 0 : index
    %c0_472 = arith.constant 0 : index
    %1209 = vector.load %arg18[%c0_471, %c0_472] : memref<24x3xbf16, #tpu.memory_space<vmem>>, vector<24x3xbf16>
    %cst_473 = arith.constant dense<0.000000e+00> : vector<8x2x3xf32>
    %1210 = tpu.matmul %1208, %1209, %cst_473 {dimension_numbers = #tpu.dot_dimension_numbers<[2], [0], [0, 1], [1], [0, 0, 0, 1, 1, 1], [], []>} : vector<8x2x24xbf16>, vector<24x3xbf16>, vector<8x2x3xf32> -> vector<8x2x3xf32>
    %c0_474 = arith.constant 0 : index
    %c0_475 = arith.constant 0 : index
    %1211 = vector.load %arg19[%c0_474, %c0_475] : memref<1x3xf32, #tpu.memory_space<vmem>>, vector<1x3xf32>
    %1212 = vector.shape_cast %1211 : vector<1x3xf32> to vector<1x1x3xf32>
    %1213 = vector.broadcast %1212 : vector<1x1x3xf32> to vector<8x2x3xf32>
    %1214 = arith.addf %1210, %1213 : vector<8x2x3xf32>
    %c0_476 = arith.constant 0 : index
    %c0_477 = arith.constant 0 : index
    %c0_478 = arith.constant 0 : index
    %1215 = vector.load %arg20[%c0_476, %c0_477, %c0_478] : memref<8x2x3xf32, #tpu.memory_space<vmem>>, vector<8x2x3xf32>
    tpu.vector_store %arg20[%c0_476, %c0_477, %c0_478], %1214 {strides = array<i32>} : memref<8x2x3xf32, #tpu.memory_space<vmem>>, vector<8x2x3xf32>,
    return
  }
  func.func @transform_0(%arg0: i32) -> (i32, i32, i32) {
    %c0_i32 = arith.constant 0 : i32
    %c0_i32_0 = arith.constant 0 : i32
    %c0_i32_1 = arith.constant 0 : i32
    return %c0_i32, %arg0, %c0_i32_0 : i32, i32, i32
  }
  func.func @transform_1(%arg0: i32) -> (i32, i32, i32) {
    %c0_i32 = arith.constant 0 : i32
    %c0_i32_0 = arith.constant 0 : i32
    %c0_i32_1 = arith.constant 0 : i32
    %c0_i32_2 = arith.constant 0 : i32
    return %c0_i32, %c0_i32_0, %c0_i32_1 : i32, i32, i32
  }
  func.func @transform_2(%arg0: i32) -> (i32, i32, i32) {
    %c0_i32 = arith.constant 0 : i32
    %c0_i32_0 = arith.constant 0 : i32
    %c0_i32_1 = arith.constant 0 : i32
    %c0_i32_2 = arith.constant 0 : i32
    return %c0_i32, %c0_i32_0, %c0_i32_1 : i32, i32, i32
  }
  func.func @transform_3(%arg0: i32) -> (i32, i32, i32) {
    %c0_i32 = arith.constant 0 : i32
    %c0_i32_0 = arith.constant 0 : i32
    %c0_i32_1 = arith.constant 0 : i32
    %c0_i32_2 = arith.constant 0 : i32
    return %c0_i32, %c0_i32_0, %c0_i32_1 : i32, i32, i32
  }
  func.func @transform_4(%arg0: i32) -> (i32, i32, i32) {
    %c0_i32 = arith.constant 0 : i32
    %c0_i32_0 = arith.constant 0 : i32
    %c0_i32_1 = arith.constant 0 : i32
    %c0_i32_2 = arith.constant 0 : i32
    return %c0_i32, %c0_i32_0, %c0_i32_1 : i32, i32, i32
  }
  func.func @transform_5(%arg0: i32) -> (i32, i32, i32) {
    %c0_i32 = arith.constant 0 : i32
    %c0_i32_0 = arith.constant 0 : i32
    %c0_i32_1 = arith.constant 0 : i32
    %c0_i32_2 = arith.constant 0 : i32
    return %c0_i32, %c0_i32_0, %c0_i32_1 : i32, i32, i32
  }
  func.func @transform_6(%arg0: i32) -> (i32, i32, i32) {
    %c0_i32 = arith.constant 0 : i32
    %c0_i32_0 = arith.constant 0 : i32
    %c0_i32_1 = arith.constant 0 : i32
    %c0_i32_2 = arith.constant 0 : i32
    return %c0_i32, %c0_i32_0, %c0_i32_1 : i32, i32, i32
  }
  func.func @transform_7(%arg0: i32) -> (i32, i32) {
    %c0_i32 = arith.constant 0 : i32
    %c0_i32_0 = arith.constant 0 : i32
    %c0_i32_1 = arith.constant 0 : i32
    return %c0_i32, %c0_i32_0 : i32, i32
  }
  func.func @transform_8(%arg0: i32) -> (i32, i32) {
    %c0_i32 = arith.constant 0 : i32
    %c0_i32_0 = arith.constant 0 : i32
    %c0_i32_1 = arith.constant 0 : i32
    return %c0_i32, %c0_i32_0 : i32, i32
  }
  func.func @transform_9(%arg0: i32) -> (i32, i32) {
    %c0_i32 = arith.constant 0 : i32
    %c0_i32_0 = arith.constant 0 : i32
    %c0_i32_1 = arith.constant 0 : i32
    return %c0_i32, %c0_i32_0 : i32, i32
  }
  func.func @transform_10(%arg0: i32) -> (i32, i32) {
    %c0_i32 = arith.constant 0 : i32
    %c0_i32_0 = arith.constant 0 : i32
    %c0_i32_1 = arith.constant 0 : i32
    return %c0_i32, %c0_i32_0 : i32, i32
  }
  func.func @transform_11(%arg0: i32) -> (i32, i32) {
    %c0_i32 = arith.constant 0 : i32
    %c0_i32_0 = arith.constant 0 : i32
    %c0_i32_1 = arith.constant 0 : i32
    return %c0_i32, %c0_i32_0 : i32, i32
  }
  func.func @transform_12(%arg0: i32) -> (i32, i32) {
    %c0_i32 = arith.constant 0 : i32
    %c0_i32_0 = arith.constant 0 : i32
    %c0_i32_1 = arith.constant 0 : i32
    return %c0_i32, %c0_i32_0 : i32, i32
  }
  func.func @transform_13(%arg0: i32) -> (i32, i32) {
    %c0_i32 = arith.constant 0 : i32
    %c0_i32_0 = arith.constant 0 : i32
    %c0_i32_1 = arith.constant 0 : i32
    return %c0_i32, %c0_i32_0 : i32, i32
  }
  func.func @transform_14(%arg0: i32) -> (i32, i32) {
    %c0_i32 = arith.constant 0 : i32
    %c0_i32_0 = arith.constant 0 : i32
    %c0_i32_1 = arith.constant 0 : i32
    return %c0_i32, %c0_i32_0 : i32, i32
  }
  func.func @transform_15(%arg0: i32) -> (i32, i32) {
    %c0_i32 = arith.constant 0 : i32
    %c0_i32_0 = arith.constant 0 : i32
    %c0_i32_1 = arith.constant 0 : i32
    return %c0_i32, %c0_i32_0 : i32, i32
  }
  func.func @transform_16(%arg0: i32) -> (i32, i32) {
    %c0_i32 = arith.constant 0 : i32
    %c0_i32_0 = arith.constant 0 : i32
    %c0_i32_1 = arith.constant 0 : i32
    return %c0_i32, %c0_i32_0 : i32, i32
  }
  func.func @transform_17(%arg0: i32) -> (i32, i32) {
    %c0_i32 = arith.constant 0 : i32
    %c0_i32_0 = arith.constant 0 : i32
    %c0_i32_1 = arith.constant 0 : i32
    return %c0_i32, %c0_i32_0 : i32, i32
  }
  func.func @transform_18(%arg0: i32) -> (i32, i32) {
    %c0_i32 = arith.constant 0 : i32
    %c0_i32_0 = arith.constant 0 : i32
    %c0_i32_1 = arith.constant 0 : i32
    return %c0_i32, %c0_i32_0 : i32, i32
  }
  func.func @transform_19(%arg0: i32) -> (i32, i32, i32) {
    %c0_i32 = arith.constant 0 : i32
    %c0_i32_0 = arith.constant 0 : i32
    %c0_i32_1 = arith.constant 0 : i32
    return %c0_i32, %arg0, %c0_i32_0 : i32, i32, i32
  }
}

</mosaic_0001>

<bundles_post_ra>
// kernel: tpu_custom_call.1
= control target key start
LH: loop header
LB: loop body
LE: loop exit
PB: predicated region body
PF: predicated region fallthrough
CT: control target
= control target key end

     0   :  { %s8192_s0 = inlined_call_operand.vmem [shape: f32[8,2,16], index: 0, kind: input, shape index: {}]   ;;  %s8193_s1 = inlined_call_operand.vmem [shape: bf16[2,16,64], index: 1, kind: input, shape index: {}]   ;;  %s8194_s2 = inlined_call_operand.vmem [shape: f32[2,16,64], index: 2, kind: input, shape index: {}]   ;;  %s8195_s3 = inlined_call_operand.hbm [shape: f32[2,1,64], index: 3, kind: input, shape index: {}]   ;;  %s8196_s4 = inlined_call_operand.vmem [shape: bf16[2,32,64], index: 4, kind: input, shape index: {}]   ;;  %s8197_s5 = inlined_call_operand.vmem [shape: f32[2,16,64], index: 5, kind: input, shape index: {}]   ;;  %s8198_s6 = inlined_call_operand.vmem [shape: f32[2,1,64], index: 6, kind: input, shape index: {}]   ;;  %s8199_s7 = inlined_call_operand.vmem [shape: bf16[16,16], index: 7, kind: input, shape index: {}]   ;;  %s8200_s8 = inlined_call_operand.vmem [shape: f32[1,16], index: 8, kind: input, shape index: {}]   ;;  %s8201_s9 = inlined_call_operand.vmem [shape: bf16[48,16], index: 9, kind: input, shape index: {}]   ;;  %s8202_s10 = inlined_call_operand.vmem [shape: f32[1,16], index: 10, kind: input, shape index: {}]   ;;  %s8203_s11 = inlined_call_operand.vmem [shape: bf16[48,16], index: 11, kind: input, shape index: {}]   ;;  %s8204_s12 = inlined_call_operand.vmem [shape: f32[1,16], index: 12, kind: input, shape index: {}]   ;;  %s8205_s13 = inlined_call_operand.vmem [shape: bf16[80,16], index: 13, kind: input, shape index: {}]   ;;  %s8206_s14 = inlined_call_operand.vmem [shape: f32[1,16], index: 14, kind: input, shape index: {}]   ;;  %s8207_s15 = inlined_call_operand.vmem [shape: bf16[48,24], index: 15, kind: input, shape index: {}]   ;;  %s8208_s16 = inlined_call_operand.vmem [shape: f32[1,24], index: 16, kind: input, shape index: {}]   ;;  %s8209_s17 = inlined_call_operand.vmem [shape: bf16[24,3], index: 17, kind: input, shape index: {}]   ;;  %s8210_s18 = inlined_call_operand.vmem [shape: f32[1,3], index: 18, kind: input, shape index: {}]   ;;  %s8211_s19 = inlined_call_operand.vmem [shape: f32[8,2,3], index: 19, kind: output, shape index: {}]  }
   0x1   :  { %8216 = sst [smem:[#allocation10_spill]] %s8192_s0 }
   0x2   :  { %8217 = sst [smem:[#allocation11_spill]] %s8193_s1 }
   0x3   :  { %8218 = sst [smem:[#allocation12_spill]] %s8194_s2 }
   0x4   :  { %8219 = sst [smem:[#allocation13_spill]] %s8195_s3 }
   0x5   :  { %8220 = sst [smem:[#allocation14_spill]] %s8206_s14 }
   0x6   :  { %24 = vsyncpa [#allocation8], 0  ;;  %s7024_s0 = smov [#allocation7]   ;;  %s8221_s1 = sld [smem:[#allocation13_spill]] }
   0x7   :  { %s36_s30 = sshll.u32 %s7024_s0, 4  ;;  %s37_s30 = int_to_ptr.vmem [resolvable:$true] %s36_s30 }
   0xc   :  { %s7000_s22 = scalar_lea.hbm %s8221_s1, 32 }
   0xd   :  { %p7001_p0 = scmp.ne.s32.totalorder %s8221_s1, %s7000_s22  ;;  %p7004_p1 = scmp.lt.u32.totalorder %s7000_s22, %s8221_s1 }
   0xf   :  { %p7006_p2 = pnand %p7004_p1, %p7001_p0 }
  0x11   :  { %7009 = shalt.err (!%p7006_p2)
}
  0x12   :  { %s7010_s25 = scalar_lea.vmem %s37_s30, 32  ;;  %p7015_p4 = scmp.lt.s32.totalorder %s37_s30, %s37_s30 }
  0x13   :  { %p7011_p3 = scmp.ne.s32.totalorder %s37_s30, %s7010_s25  ;;  %p7016_p5 = scmp.lt.s32.totalorder %s7010_s25, %s7010_s25 }
  0x15   :  { %p7017_p6 = por %p7016_p5, %p7015_p4 }
  0x17   :  { %p7018_p7 = pnand %p7017_p6, %p7011_p3 }
  0x19   :  { %7021 = shalt.err (!%p7018_p7)
}
  0x1a   :  { %s7025_s3 = smov 16   ;;  %s7026_s26 = smov 1  }
  0x1b   :  { %42 = dma.hbm_to_vmem [thread:$0]  %s8221_s1, 32, %s37_s30, [#allocation8], %s7025_s3, %s7025_s3, %s7026_s26  }
  0x1c   :  { %7022 = dma.done.wait [#allocation8], 32  }
  0x1d   :  { %7023 = vsyncadd [#allocation8], 4294967264  ;;  %v110_v0 = vlaneseq  ;;  %v7027_v1 = vmov 0.0   ;;  %vm7028_vm0 = vmmov 0   ;;  %v7029_v2 = vmov 1966171168  }
  0x1e   :  { %6081 = vmatprep.subr.bf16.mxu0 %v7027_v1  ;;  %6083 = vmatprep.mubr.msk.bf16.mxu0 %vm7028_vm0, %v7027_v1  ;;  %v108_v3 = vunpack.c.l.s4 %v7029_v2  ;;  %s8222_s0 = sld [smem:[#allocation11_spill]]  ;;  %s8223_s21 = sld [smem:[#allocation10_spill]]  ;;  %v7030_v19 = vmov 0.0|0.0   ;;  %vm158_vm1 = vcmask 130048   ;;  %v7031_v33 = vmov 1983009808  }
  0x1f   :  { %6087 = vmatprep.subr.bf16.mxu1 %v7027_v1  ;;  %6089 = vmatprep.mubr.msk.bf16.mxu1 %vm7028_vm0, %v7027_v1  ;;  %v111_v5 = vshrl.u32 %v110_v0, 7  ;;  %s8224_s23 = sld [smem:[#allocation12_spill]]  ;;  %v207_v34 = vunpack.c.l.s4 %v7031_v33  ;;  %vm247_vm2 = vcmask 517120   ;;  %v7228_v53 = vld [vmem:[#allocation7] ss:$0 sm:$0xff]  ;;  %s7032_s25 = smov 96  }
  0x20   :  { %v109_v4 = vunpack.c.0.s8 %v108_v3  ;;  %vm471_vm3 = vcmask 123904   ;;  %s7034_s14 = smov 80   ;;  %vm2207_vm4 = vcmask 261120   ;;  %vm4499_vm5 = vcmask 392192   ;;  %s7036_s27 = smov 64  }
  0x21   :  { %v208_v35 = vunpack.c.0.s8 %v207_v34  ;;  %4267 = vst.msk [vmem:[#allocation6] sm:$0x3] %vm471_vm3, %v7027_v1  ;;  %4268 = vst.msk [vmem:[#allocation6 + $0x2] sm:$0x3] %vm471_vm3, %v7027_v1  ;;  %vm5134_vm6 = vcmask 523264   ;;  %vm5264_vm7 = vcmask 654336  }
  0x22   :  { %v7160_v7 = vsub.s32 %v109_v4, %v111_v5  ;;  %4269 = vst.msk [vmem:[#allocation6 + $0x4] sm:$0x3] %vm471_vm3, %v7027_v1  ;;  %4270 = vst.msk [vmem:[#allocation6 + $0x6] sm:$0x3] %vm471_vm3, %v7027_v1  ;;  %vm5707_vm8 = vcmask 1043456   ;;  %vm5703_vm9 = vcmask 195584  }
  0x23   :  { %v7214_v36 = vsub.s32 %v208_v35, %v111_v5  ;;  %4271 = vst.msk [vmem:[#allocation6 + $0x8] sm:$0x3] %vm471_vm3, %v7027_v1  ;;  %4272 = vst.msk [vmem:[#allocation6 + $0xa] sm:$0x3] %vm471_vm3, %v7027_v1  ;;  %vm5796_vm10 = vcmask 17408  }
  0x24   :  { %v6720_v6 = vld [vmem:[%s8222_s0] sm:$0xff]   ;;  %v81_v12 = vld [vmem:[%s8223_s21 + $0x8] sm:$0x3]  ;;  %v82_v13 = vld [vmem:[%s8223_s21 + $0xa] sm:$0x3] }
  0x25   :  { %v77_v8 = vld [vmem:[%s8223_s21] sm:$0x3]  ;;  %v78_v9 = vld [vmem:[%s8223_s21 + $0x2] sm:$0x3]  ;;  %v79_v10 = vld [vmem:[%s8223_s21 + $0x4] sm:$0x3]  ;;  %6082 = vmatpush3.bf16.msra.mxu0 %v6720_v6  ;;  %v5812_v18 = vpack.c.bf16 %v82_v13, %v81_v12 }
  0x26   :  { %v80_v11 = vld [vmem:[%s8223_s21 + $0x6] sm:$0x3]  ;;  %v5810_v14 = vpack.c.bf16 %v78_v9, %v77_v8  ;;  %v83_v15 = vld [vmem:[%s8223_s21 + $0xc] sm:$0x3]  ;;  %v84_v16 = vld [vmem:[%s8223_s21 + $0xe] sm:$0x3]  ;;  %6391 = vmatprep.subr.bf16.mxu0 %v7030_v19 }
  0x27   :  { %v5811_v17 = vpack.c.bf16 %v80_v11, %v79_v10  ;;  %v5813_v20 = vpack.c.bf16 %v84_v16, %v83_v15  ;;  %v127_v23 = vrot.slane %v5812_v18, %v7160_v7  ;;  %v358_v25 = vld [vmem:[%s8224_s23] sm:$0xff]  ;;  %v359_v26 = vld [vmem:[%s8224_s23 + $0x8] sm:$0xff]  ;;  %4273 = vst.msk [vmem:[#allocation6 + $0xc] sm:$0x3] %vm471_vm3, %v7027_v1  ;;  %4274 = vst.msk [vmem:[#allocation6 + $0xe] sm:$0x3] %vm471_vm3, %v7027_v1 }
  0x28   :  { %v113_v21 = vrot.slane %v5810_v14, %v7160_v7  ;;  %v7199_v31 = vpack.c.bf16 %v359_v26, %v358_v25  ;;  %v6721_v4 = vld [vmem:[%s8222_s0 + $0x8] sm:$0xff]   ;;  %4275 = vst.msk [vmem:[#allocation6 + $0x10] sm:$0x3] %vm471_vm3, %v7027_v1  ;;  %4276 = vst.msk [vmem:[#allocation6 + $0x12] sm:$0x3] %vm471_vm3, %v7027_v1  ;;  %s7033_s0 = smov 32  }
  0x29   :  { %v120_v22 = vrot.slane %v5811_v17, %v7160_v7  ;;  %v134_v24 = vrot.slane %v5813_v20, %v7160_v7  ;;  %4277 = vst.msk [vmem:[#allocation6 + $0x14] sm:$0x3] %vm471_vm3, %v7027_v1  ;;  %4278 = vst.msk [vmem:[#allocation6 + $0x16] sm:$0x3] %vm471_vm3, %v7027_v1  ;;  %6088 = vmatpush3.bf16.msra.mxu1 %v6721_v4 }
  0x2a   :  { %4596 = vst.msk [vmem:[#allocation6] sm:$0x3] %vm471_vm3, %v7027_v1  ;;  %4607 = vst.msk [vmem:[#allocation6 + $0x16] sm:$0x3] %vm471_vm3, %v7027_v1  ;;  %6394 = vmatprep.subr.bf16.mxu1 %v7030_v19 }
  0x2b   :  { %v135_v27 = vcombine.low %v113_v21, %v120_v22  ;;  %v136_v28 = vcombine.low %v127_v23, %v134_v24  ;;  %4921 = vst.msk [vmem:[#allocation6] sm:$0x3] %vm471_vm3, %v7027_v1  ;;  %4932 = vst.msk [vmem:[#allocation6 + $0x16] sm:$0x3] %vm471_vm3, %v7027_v1 }
  0x2d   :  { %v143_v29 = vrot.slane %v135_v27, %v7160_v7  ;;  %v150_v30 = vrot.slane %v136_v28, %v7160_v7 }
  0x2f   :  { %v7201_v32 = vcombine.low %v143_v29, %v150_v30 }
  0x31   :  { %6084 = vmatmul.mubr.msk.bf16.vlgmr.msra.gmra.mrb[0].mxu0 %vm158_vm1, %v7201_v32  ;;  %6090 = vmatmul.mubr.msk.bf16.vlgmr.msra.gmra.mrb[0].mxu1 %vm158_vm1, %v7201_v32 }
  0x32   :  { %6393 = vmatpush3.bf16.msra.mxu0 %v7199_v31  ;;  %6097 = vmatprep.mubr.msk.f32.mxu0 %vm7028_vm0, %v7027_v1 }
  0x33   :  { %6397 = vmatprep.subr.bf16.mxu0 %v7030_v19  ;;  %6396 = vmatpush3.bf16.msra.mxu1 %v7199_v31 }
  0x34   :  { %6104 = vmatprep.mubr.msk.f32.mxu1 %vm7028_vm0, %v7027_v1  ;;  %6400 = vmatprep.subr.bf16.mxu1 %v7030_v19 }
  0x39   :  { %6098 = vmatmul.mubr.f32.vlgmr.msra.gmra.mrb[4].mxu0 %v7027_v1 }
  0x3a   :  { %6399 = vmatpush3.bf16.msra.mxu0 %v7199_v31  ;;  %6111 = vmatprep.mubr.msk.f32.mxu0 %vm7028_vm0, %v7027_v1 }
  0x3b   :  { %6403 = vmatprep.subr.bf16.mxu0 %v7030_v19 }
 0x104   :  { %v196_v37 = vpop.f32.mrb[0].mxu0  ;;  %v299_v9 = vpop.f32.mrb[0].mxu1 }
 0x105   :  { %v205_v38 = vcombine.high %v196_v37, %v196_v37  ;;  %v212_v39 = vrot.slane %v196_v37, %v7214_v36  ;;  %v6085_v40 = vpop.f32.mrb[1].mxu0  ;;  %v308_v10 = vcombine.high %v299_v9, %v299_v9  ;;  %v315_v11 = vrot.slane %v299_v9, %v7214_v36  ;;  %v6091_v12 = vpop.f32.mrb[1].mxu1 }
 0x106   :  { %v199_v41 = vpop.f32.mrb[2].mxu0  ;;  %v302_v13 = vpop.f32.mrb[2].mxu1 }
 0x107   :  { %v219_v42 = vrot.slane %v205_v38, %v7214_v36  ;;  %v220_v43 = vcombine.high %v212_v39, %v212_v39  ;;  %248 = vst.msk [vmem:[#allocation2] sm:$0x3] %vm247_vm2, %v212_v39  ;;  %v222_v44 = vcombine.high %v199_v41, %v199_v41  ;;  %v229_v45 = vrot.slane %v199_v41, %v7214_v36  ;;  %v6086_v46 = vpop.f32.mrb[3].mxu0  ;;  %v6092_v18 = vpop.f32.mrb[3].mxu1 }
 0x108   :  { %v322_v14 = vrot.slane %v308_v10, %v7214_v36  ;;  %v323_v15 = vcombine.high %v315_v11, %v315_v11  ;;  %350 = vst.msk [vmem:[#allocation3] sm:$0x3] %vm247_vm2, %v315_v11  ;;  %v325_v16 = vcombine.high %v302_v13, %v302_v13  ;;  %v332_v17 = vrot.slane %v302_v13, %v7214_v36 }
 0x109   :  { %v221_v47 = vcombine.high %v219_v42, %v219_v42  ;;  %249 = vst.msk [vmem:[#allocation2 + $0x2] sm:$0x3] %vm247_vm2, %v220_v43  ;;  %250 = vst.msk [vmem:[#allocation2 + $0x4] sm:$0x3] %vm247_vm2, %v219_v42  ;;  %v236_v48 = vrot.slane %v222_v44, %v7214_v36  ;;  %v237_v49 = vcombine.high %v229_v45, %v229_v45 }
 0x10a   :  { %252 = vst.msk [vmem:[#allocation2 + $0x8] sm:$0x3] %vm247_vm2, %v229_v45  ;;  %v324_v20 = vcombine.high %v322_v14, %v322_v14  ;;  %351 = vst.msk [vmem:[#allocation3 + $0x2] sm:$0x3] %vm247_vm2, %v323_v15  ;;  %v339_v21 = vrot.slane %v325_v16, %v7214_v36  ;;  %v340_v22 = vcombine.high %v332_v17, %v332_v17 }
 0x10b   :  { %251 = vst.msk [vmem:[#allocation2 + $0x6] sm:$0x3] %vm247_vm2, %v221_v47  ;;  %v238_v50 = vcombine.high %v236_v48, %v236_v48  ;;  %253 = vst.msk [vmem:[#allocation2 + $0xa] sm:$0x3] %vm247_vm2, %v237_v49 }
 0x10c   :  { %254 = vst.msk [vmem:[#allocation2 + $0xc] sm:$0x3] %vm247_vm2, %v236_v48  ;;  %v431_v51 = vpop.f32.mrb[4].mxu0  ;;  %352 = vst.msk [vmem:[#allocation3 + $0x4] sm:$0x3] %vm247_vm2, %v322_v14  ;;  %v341_v23 = vcombine.high %v339_v21, %v339_v21 }
 0x10d   :  { %255 = vst.msk [vmem:[#allocation2 + $0xe] sm:$0x3] %vm247_vm2, %v238_v50  ;;  %v6099_v52 = vpop.f32.mrb[5].mxu0  ;;  %354 = vst.msk [vmem:[#allocation3 + $0x8] sm:$0x3] %vm247_vm2, %v332_v17 }
 0x10e   :  { %v361_v54 = vld [vmem:[#allocation2] sm:$0x3]  ;;  %353 = vst.msk [vmem:[#allocation3 + $0x6] sm:$0x3] %vm247_vm2, %v324_v20  ;;  %355 = vst.msk [vmem:[#allocation3 + $0xa] sm:$0x3] %vm247_vm2, %v340_v22 }
 0x10f   :  { %v435_v55 = vadd.f32 %v431_v51, %v361_v54  ;;  %356 = vst.msk [vmem:[#allocation3 + $0xc] sm:$0x3] %vm247_vm2, %v339_v21  ;;  %357 = vst.msk [vmem:[#allocation3 + $0xe] sm:$0x3] %vm247_vm2, %v341_v23 }
 0x110   :  { %v474_v25 = vld [vmem:[#allocation2 + $0x2] sm:$0x3]  ;;  %v580_v47 = vld [vmem:[#allocation2 + $0x4] sm:$0x3] }
 0x111   :  { %v442_v56 = vadd.f32 %v7228_v53, %v435_v55 }
 0x112   :  { %v686_v4 = vld [vmem:[#allocation2 + $0x6] sm:$0x3] }
 0x113   :  { %6743 = vtanh.f32 %v442_v56  ;;  %v5821_v58 = vmul.f32 -1.442695, %v442_v56 }
 0x115   :  { %6745 = vpow2.f32 %v5821_v58 }
 0x11d   :  { %v6744_v57 = vpop.eup %6743 }
 0x11e   :  { %452 = vrot.lane.b32.xlu0 %v6744_v57, %s7032_s25 }
 0x11f   :  { %v6746_v59 = vpop.eup %6745 }
 0x120   :  { %v446_v60 = vadd.f32 1.0, %v6746_v59 }
 0x122   :  { %6747 = vrcp.f32 %v446_v60 }
 0x12c   :  { %v6748_v61 = vpop.eup %6747 }
 0x12d   :  { %v450_v0 = vmul.f32 0.0, %v6748_v61 }
 0x190   :  { %v453_v62 = vpop.permute.xlu0 %452 }
 0x191   :  { %v455_v63 = vmul.f32 %v6748_v61, %v453_v62 }
 0x193   :  { %457 = vrot.lane.b32.xlu0 %v455_v63, %s7025_s3 }
 0x205   :  { %v458_v2 = vpop.permute.xlu0 %457 }
 0x206   :  { %v7233_v3 = vadd.f32 %v458_v2, %v450_v0 }
 0x208   :  { %6749 = vtanh.f32 %v7233_v3 }
 0x212   :  { %v6750_v5 = vpop.eup %6749 }
 0x213   :  { %463 = vrot.lane.b32.xlu1 %v6750_v5, %s7033_s0 }
 0x285   :  { %v464_v6 = vpop.permute.xlu1 %463 }
 0x286   :  { %v466_v8 = vmul.f32 %v6748_v61, %v464_v6 }
 0x288   :  { %468 = vrot.lane.b32.xlu1 %v466_v8, %s7034_s14 }
 0x2fa   :  { %v469_v24 = vpop.permute.xlu1 %468 }
 0x2fb   :  { %472 = vst.msk [vmem:[#allocation4] sm:$0x3] %vm471_vm3, %v469_v24  ;;  %6105 = vmatmul.mubr.msk.f32.vlgmr.msra.gmra.mrb[4].mxu1 %vm158_vm1, %v469_v24 }
 0x2fc   :  { %6402 = vmatpush3.bf16.msra.mxu1 %v7199_v31  ;;  %6118 = vmatprep.mubr.msk.f32.mxu1 %vm7028_vm0, %v7027_v1 }
 0x2fd   :  { %6406 = vmatprep.subr.bf16.mxu1 %v7030_v19 }
 0x3ce   :  { %v543_v26 = vpop.f32.mrb[4].mxu1 }
 0x3cf   :  { %v547_v27 = vadd.f32 %v543_v26, %v474_v25  ;;  %v6106_v28 = vpop.f32.mrb[5].mxu1  ;;  %v792_v25 = vld [vmem:[#allocation2 + $0x8] sm:$0x3] }
 0x3d1   :  { %v548_v29 = vadd.f32 %v7228_v53, %v547_v27 }
 0x3d3   :  { %6751 = vtanh.f32 %v548_v29  ;;  %v5823_v33 = vmul.f32 -1.442695, %v548_v29 }
 0x3d5   :  { %6753 = vpow2.f32 %v5823_v33 }
 0x3dd   :  { %v6752_v30 = vpop.eup %6751 }
 0x3de   :  { %558 = vrot.lane.b32.xlu0 %v6752_v30, %s7032_s25 }
 0x3df   :  { %v6754_v34 = vpop.eup %6753 }
 0x3e0   :  { %v552_v35 = vadd.f32 1.0, %v6754_v34 }
 0x3e2   :  { %6755 = vrcp.f32 %v552_v35 }
 0x3ec   :  { %v6756_v37 = vpop.eup %6755 }
 0x3ed   :  { %v556_v40 = vmul.f32 %v6756_v37, %v7233_v3 }
 0x450   :  { %v559_v38 = vpop.permute.xlu0 %558 }
 0x451   :  { %v561_v39 = vmul.f32 %v6756_v37, %v559_v38 }
 0x453   :  { %563 = vrot.lane.b32.xlu1 %v561_v39, %s7025_s3 }
 0x4c5   :  { %v564_v41 = vpop.permute.xlu1 %563 }
 0x4c6   :  { %v566_v42 = vadd.f32 %v564_v41, %v556_v40 }
 0x4c8   :  { %6757 = vtanh.f32 %v566_v42 }
 0x4d2   :  { %v6758_v43 = vpop.eup %6757 }
 0x4d3   :  { %569 = vrot.lane.b32.xlu0 %v6758_v43, %s7033_s0 }
 0x545   :  { %v570_v44 = vpop.permute.xlu0 %569 }
 0x546   :  { %v572_v45 = vmul.f32 %v6756_v37, %v570_v44 }
 0x548   :  { %574 = vrot.lane.b32.xlu1 %v572_v45, %s7034_s14 }
 0x5ba   :  { %v575_v46 = vpop.permute.xlu1 %574 }
 0x5bb   :  { %578 = vst.msk [vmem:[#allocation4 + $0x2] sm:$0x3] %vm471_vm3, %v575_v46  ;;  %6112 = vmatmul.mubr.msk.f32.vlgmr.msra.gmra.mrb[6].mxu0 %vm158_vm1, %v575_v46 }
 0x5bc   :  { %6405 = vmatpush3.bf16.msra.mxu0 %v7199_v31  ;;  %6125 = vmatprep.mubr.msk.f32.mxu0 %vm7028_vm0, %v7027_v1 }
 0x5bd   :  { %6409 = vmatprep.subr.bf16.mxu0 %v7030_v19 }
 0x68e   :  { %v649_v48 = vpop.f32.mrb[6].mxu0 }
 0x68f   :  { %v653_v49 = vadd.f32 %v649_v48, %v580_v47  ;;  %v6113_v50 = vpop.f32.mrb[7].mxu0  ;;  %v898_v47 = vld [vmem:[#allocation2 + $0xa] sm:$0x3] }
 0x691   :  { %v654_v51 = vadd.f32 %v7228_v53, %v653_v49 }
 0x693   :  { %6759 = vtanh.f32 %v654_v51  ;;  %v5825_v54 = vmul.f32 -1.442695, %v654_v51 }
 0x695   :  { %6761 = vpow2.f32 %v5825_v54 }
 0x69d   :  { %v6760_v52 = vpop.eup %6759 }
 0x69e   :  { %664 = vrot.lane.b32.xlu0 %v6760_v52, %s7032_s25 }
 0x69f   :  { %v6762_v55 = vpop.eup %6761 }
 0x6a0   :  { %v658_v56 = vadd.f32 1.0, %v6762_v55 }
 0x6a2   :  { %6763 = vrcp.f32 %v658_v56 }
 0x6ac   :  { %v6764_v57 = vpop.eup %6763 }
 0x6ad   :  { %v662_v60 = vmul.f32 %v6764_v57, %v566_v42 }
 0x710   :  { %v665_v58 = vpop.permute.xlu0 %664 }
 0x711   :  { %v667_v59 = vmul.f32 %v6764_v57, %v665_v58 }
 0x713   :  { %669 = vrot.lane.b32.xlu1 %v667_v59, %s7025_s3 }
 0x785   :  { %v670_v61 = vpop.permute.xlu1 %669 }
 0x786   :  { %v672_v62 = vadd.f32 %v670_v61, %v662_v60 }
 0x788   :  { %6765 = vtanh.f32 %v672_v62 }
 0x792   :  { %v6766_v63 = vpop.eup %6765 }
 0x793   :  { %675 = vrot.lane.b32.xlu0 %v6766_v63, %s7033_s0 }
 0x805   :  { %v676_v0 = vpop.permute.xlu0 %675 }
 0x806   :  { %v678_v2 = vmul.f32 %v6764_v57, %v676_v0 }
 0x808   :  { %680 = vrot.lane.b32.xlu1 %v678_v2, %s7034_s14  ;;  %v5836_v2 = vld [vmem:[%s8224_s23 + $0x10] sm:$0xff] }
 0x87a   :  { %v681_v3 = vpop.permute.xlu1 %680 }
 0x87b   :  { %684 = vst.msk [vmem:[#allocation4 + $0x4] sm:$0x3] %vm471_vm3, %v681_v3  ;;  %6119 = vmatmul.mubr.msk.f32.vlgmr.msra.gmra.mrb[6].mxu1 %vm158_vm1, %v681_v3  ;;  %v5837_v3 = vld [vmem:[%s8224_s23 + $0x18] sm:$0xff] }
 0x87c   :  { %6408 = vmatpush3.bf16.msra.mxu1 %v7199_v31  ;;  %6132 = vmatprep.mubr.msk.f32.mxu1 %vm7028_vm0, %v7027_v1 }
 0x87d   :  { %6412 = vmatprep.subr.bf16.mxu1 %v7030_v19 }
 0x94e   :  { %v755_v5 = vpop.f32.mrb[6].mxu1 }
 0x94f   :  { %v759_v6 = vadd.f32 %v755_v5, %v686_v4  ;;  %v6120_v8 = vpop.f32.mrb[7].mxu1  ;;  %v7354_v4 = vpack.c.bf16 %v5837_v3, %v5836_v2 }
 0x951   :  { %v760_v9 = vadd.f32 %v7228_v53, %v759_v6  ;;  %v1004_v6 = vld [vmem:[#allocation2 + $0xc] sm:$0x3] }
 0x953   :  { %6767 = vtanh.f32 %v760_v9  ;;  %v5827_v11 = vmul.f32 -1.442695, %v760_v9 }
 0x955   :  { %6769 = vpow2.f32 %v5827_v11 }
 0x95d   :  { %v6768_v10 = vpop.eup %6767 }
 0x95e   :  { %770 = vrot.lane.b32.xlu0 %v6768_v10, %s7032_s25 }
 0x95f   :  { %v6770_v12 = vpop.eup %6769 }
 0x960   :  { %v764_v13 = vadd.f32 1.0, %v6770_v12  ;;  %v7368_v12 = vld [vmem:[#allocation7 + $0x1] ss:$0 sm:$0xff] }
 0x962   :  { %6771 = vrcp.f32 %v764_v13  ;;  %v1221_v13 = vld [vmem:[#allocation3 + $0xe] sm:$0x3] }
 0x96c   :  { %v6772_v14 = vpop.eup %6771 }
 0x96d   :  { %v768_v17 = vmul.f32 %v6772_v14, %v672_v62 }
 0x9d0   :  { %v771_v15 = vpop.permute.xlu0 %770 }
 0x9d1   :  { %v773_v16 = vmul.f32 %v6772_v14, %v771_v15 }
 0x9d3   :  { %775 = vrot.lane.b32.xlu1 %v773_v16, %s7025_s3 }
 0xa45   :  { %v776_v18 = vpop.permute.xlu1 %775 }
 0xa46   :  { %v778_v20 = vadd.f32 %v776_v18, %v768_v17 }
 0xa48   :  { %6773 = vtanh.f32 %v778_v20 }
 0xa52   :  { %v6774_v21 = vpop.eup %6773 }
 0xa53   :  { %781 = vrot.lane.b32.xlu0 %v6774_v21, %s7033_s0 }
 0xac5   :  { %v782_v22 = vpop.permute.xlu0 %781 }
 0xac6   :  { %v784_v23 = vmul.f32 %v6772_v14, %v782_v22 }
 0xac8   :  { %786 = vrot.lane.b32.xlu1 %v784_v23, %s7034_s14 }
 0xb3a   :  { %v787_v24 = vpop.permute.xlu1 %786 }
 0xb3b   :  { %790 = vst.msk [vmem:[#allocation4 + $0x6] sm:$0x3] %vm471_vm3, %v787_v24  ;;  %6126 = vmatmul.mubr.msk.f32.vlgmr.msra.gmra.mrb[8].mxu0 %vm158_vm1, %v787_v24 }
 0xb3c   :  { %6411 = vmatpush3.bf16.msra.mxu0 %v7199_v31  ;;  %6139 = vmatprep.mubr.msk.f32.mxu0 %vm7028_vm0, %v7027_v1 }
 0xb3d   :  { %6415 = vmatprep.subr.bf16.mxu0 %v7030_v19 }
 0xc0e   :  { %v861_v26 = vpop.f32.mrb[8].mxu0 }
 0xc0f   :  { %v865_v27 = vadd.f32 %v861_v26, %v792_v25  ;;  %v6127_v28 = vpop.f32.mrb[9].mxu0 }
 0xc11   :  { %v866_v29 = vadd.f32 %v7228_v53, %v865_v27 }
 0xc13   :  { %6775 = vtanh.f32 %v866_v29  ;;  %v5829_v33 = vmul.f32 -1.442695, %v866_v29 }
 0xc15   :  { %6777 = vpow2.f32 %v5829_v33 }
 0xc1d   :  { %v6776_v30 = vpop.eup %6775 }
 0xc1e   :  { %876 = vrot.lane.b32.xlu0 %v6776_v30, %s7032_s25 }
 0xc1f   :  { %v6778_v34 = vpop.eup %6777 }
 0xc20   :  { %v870_v35 = vadd.f32 1.0, %v6778_v34 }
 0xc22   :  { %6779 = vrcp.f32 %v870_v35 }
 0xc2c   :  { %v6780_v37 = vpop.eup %6779 }
 0xc2d   :  { %v874_v40 = vmul.f32 %v6780_v37, %v778_v20 }
 0xc90   :  { %v877_v38 = vpop.permute.xlu0 %876 }
 0xc91   :  { %v879_v39 = vmul.f32 %v6780_v37, %v877_v38 }
 0xc93   :  { %881 = vrot.lane.b32.xlu1 %v879_v39, %s7025_s3 }
 0xd05   :  { %v882_v41 = vpop.permute.xlu1 %881 }
 0xd06   :  { %v884_v42 = vadd.f32 %v882_v41, %v874_v40 }
 0xd08   :  { %6781 = vtanh.f32 %v884_v42 }
 0xd12   :  { %v6782_v43 = vpop.eup %6781 }
 0xd13   :  { %887 = vrot.lane.b32.xlu0 %v6782_v43, %s7033_s0 }
 0xd85   :  { %v888_v44 = vpop.permute.xlu0 %887 }
 0xd86   :  { %v890_v45 = vmul.f32 %v6780_v37, %v888_v44 }
 0xd88   :  { %892 = vrot.lane.b32.xlu1 %v890_v45, %s7034_s14 }
 0xdfa   :  { %v893_v46 = vpop.permute.xlu1 %892 }
 0xdfb   :  { %896 = vst.msk [vmem:[#allocation4 + $0x8] sm:$0x3] %vm471_vm3, %v893_v46  ;;  %6133 = vmatmul.mubr.msk.f32.vlgmr.msra.gmra.mrb[8].mxu1 %vm158_vm1, %v893_v46 }
 0xdfc   :  { %6414 = vmatpush3.bf16.msra.mxu1 %v7199_v31  ;;  %6146 = vmatprep.mubr.msk.f32.mxu1 %vm7028_vm0, %v7027_v1 }
 0xdfd   :  { %6418 = vmatprep.subr.bf16.mxu1 %v7030_v19 }
 0xece   :  { %v967_v48 = vpop.f32.mrb[8].mxu1 }
 0xecf   :  { %v971_v49 = vadd.f32 %v967_v48, %v898_v47  ;;  %v6134_v50 = vpop.f32.mrb[9].mxu1 }
 0xed1   :  { %v972_v51 = vadd.f32 %v7228_v53, %v971_v49 }
 0xed3   :  { %6783 = vtanh.f32 %v972_v51  ;;  %v5831_v54 = vmul.f32 -1.442695, %v972_v51 }
 0xed5   :  { %6785 = vpow2.f32 %v5831_v54 }
 0xedd   :  { %v6784_v52 = vpop.eup %6783 }
 0xede   :  { %982 = vrot.lane.b32.xlu0 %v6784_v52, %s7032_s25  ;;  %v1331_v52 = vld [vmem:[#allocation3 + $0xc] sm:$0x3] }
 0xedf   :  { %v6786_v55 = vpop.eup %6785 }
 0xee0   :  { %v976_v56 = vadd.f32 1.0, %v6786_v55 }
 0xee2   :  { %6787 = vrcp.f32 %v976_v56 }
 0xeec   :  { %v6788_v31 = vpop.eup %6787 }
 0xeed   :  { %v980_v59 = vmul.f32 %v6788_v31, %v884_v42 }
 0xf50   :  { %v983_v57 = vpop.permute.xlu0 %982 }
 0xf51   :  { %v985_v58 = vmul.f32 %v6788_v31, %v983_v57 }
 0xf53   :  { %987 = vrot.lane.b32.xlu1 %v985_v58, %s7025_s3 }
 0xfc5   :  { %v988_v60 = vpop.permute.xlu1 %987 }
 0xfc6   :  { %v990_v61 = vadd.f32 %v988_v60, %v980_v59 }
 0xfc8   :  { %6789 = vtanh.f32 %v990_v61 }
 0xfd2   :  { %v6790_v62 = vpop.eup %6789 }
 0xfd3   :  { %993 = vrot.lane.b32.xlu0 %v6790_v62, %s7033_s0 }
0x1045   :  { %v994_v63 = vpop.permute.xlu0 %993 }
0x1046   :  { %v996_v0 = vmul.f32 %v6788_v31, %v994_v63 }
0x1048   :  { %998 = vrot.lane.b32.xlu1 %v996_v0, %s7034_s14 }
0x10ba   :  { %v999_v5 = vpop.permute.xlu1 %998 }
0x10bb   :  { %1002 = vst.msk [vmem:[#allocation4 + $0xa] sm:$0x3] %vm471_vm3, %v999_v5  ;;  %6140 = vmatmul.mubr.msk.f32.vlgmr.msra.gmra.mrb[10].mxu0 %vm158_vm1, %v999_v5 }
0x10bc   :  { %6417 = vmatpush3.bf16.msra.mxu0 %v7354_v4  ;;  %6153 = vmatprep.mubr.msk.f32.mxu0 %vm7028_vm0, %v7027_v1 }
0x10bd   :  { %6421 = vmatprep.subr.bf16.mxu0 %v7030_v19 }
0x10bf   :  { %6154 = vmatmul.mubr.f32.vlgmr.msra.gmra.mrb[12].mxu0 %v7027_v1 }
0x10c0   :  { %6423 = vmatpush3.bf16.msra.mxu0 %v7354_v4  ;;  %6167 = vmatprep.mubr.msk.f32.mxu0 %vm7028_vm0, %v7027_v1 }
0x10c1   :  { %6427 = vmatprep.subr.bf16.mxu0 %v7030_v19 }
0x118e   :  { %v1073_v8 = vpop.f32.mrb[10].mxu0 }
0x118f   :  { %v1077_v9 = vadd.f32 %v1073_v8, %v1004_v6  ;;  %v6141_v10 = vpop.f32.mrb[11].mxu0 }
0x1190   :  { %v1437_v10 = vld [vmem:[#allocation3 + $0xa] sm:$0x3] }
0x1191   :  { %v1078_v11 = vadd.f32 %v7228_v53, %v1077_v9 }
0x1192   :  { %v1288_v14 = vpop.f32.mrb[12].mxu0 }
0x1193   :  { %6791 = vtanh.f32 %v1078_v11  ;;  %v1292_v15 = vadd.f32 %v1288_v14, %v1221_v13  ;;  %v6155_v16 = vpop.f32.mrb[13].mxu0  ;;  %v5833_v21 = vmul.f32 -1.442695, %v1078_v11 }
0x1195   :  { %v1299_v17 = vadd.f32 %v7368_v12, %v1292_v15 }
0x1197   :  { %6793 = vtanh.f32 %v1299_v17  ;;  %v5839_v22 = vmul.f32 -1.442695, %v1299_v17 }
0x1198   :  { %6795 = vpow2.f32 %v5833_v21 }
0x1199   :  { %6797 = vpow2.f32 %v5839_v22 }
0x119d   :  { %v6792_v18 = vpop.eup %6791 }
0x119e   :  { %1088 = vrot.lane.b32.xlu0 %v6792_v18, %s7032_s25 }
0x11a1   :  { %v6794_v20 = vpop.eup %6793 }
0x11a2   :  { %1309 = vrot.lane.b32.xlu1 %v6794_v20, %s7032_s25  ;;  %v6796_v23 = vpop.eup %6795 }
0x11a3   :  { %v1082_v24 = vadd.f32 1.0, %v6796_v23  ;;  %v6798_v25 = vpop.eup %6797 }
0x11a4   :  { %v1303_v26 = vadd.f32 1.0, %v6798_v25 }
0x11a5   :  { %6799 = vrcp.f32 %v1082_v24 }
0x11a6   :  { %6801 = vrcp.f32 %v1303_v26 }
0x11af   :  { %v6800_v27 = vpop.eup %6799 }
0x11b0   :  { %v6802_v30 = vpop.eup %6801  ;;  %v1086_v35 = vmul.f32 %v6800_v27, %v990_v61 }
0x11b1   :  { %v1307_v39 = vmul.f32 0.0, %v6802_v30 }
0x1210   :  { %v1089_v28 = vpop.permute.xlu0 %1088 }
0x1211   :  { %v1091_v29 = vmul.f32 %v6800_v27, %v1089_v28 }
0x1213   :  { %1093 = vrot.lane.b32.xlu0 %v1091_v29, %s7025_s3 }
0x1214   :  { %v1310_v33 = vpop.permute.xlu1 %1309 }
0x1215   :  { %v1312_v34 = vmul.f32 %v6802_v30, %v1310_v33  ;;  %v1543_v33 = vld [vmem:[#allocation3 + $0x8] sm:$0x3] }
0x1217   :  { %1314 = vrot.lane.b32.xlu1 %v1312_v34, %s7025_s3 }
0x1285   :  { %v1094_v37 = vpop.permute.xlu0 %1093 }
0x1286   :  { %v7375_v38 = vadd.f32 %v1094_v37, %v1086_v35 }
0x1288   :  { %6803 = vtanh.f32 %v7375_v38 }
0x1289   :  { %v1315_v40 = vpop.permute.xlu1 %1314 }
0x128a   :  { %v1317_v41 = vadd.f32 %v1315_v40, %v1307_v39 }
0x128c   :  { %6805 = vtanh.f32 %v1317_v41 }
0x1292   :  { %v6804_v42 = vpop.eup %6803 }
0x1293   :  { %1099 = vrot.lane.b32.xlu0 %v6804_v42, %s7033_s0 }
0x1296   :  { %v6806_v43 = vpop.eup %6805 }
0x1297   :  { %1320 = vrot.lane.b32.xlu1 %v6806_v43, %s7033_s0 }
0x1305   :  { %v1100_v44 = vpop.permute.xlu0 %1099 }
0x1306   :  { %v1102_v45 = vmul.f32 %v6800_v27, %v1100_v44 }
0x1308   :  { %1104 = vrot.lane.b32.xlu0 %v1102_v45, %s7034_s14 }
0x1309   :  { %v1321_v46 = vpop.permute.xlu1 %1320 }
0x130a   :  { %v1323_v47 = vmul.f32 %v6802_v30, %v1321_v46 }
0x130c   :  { %1325 = vrot.lane.b32.xlu1 %v1323_v47, %s7034_s14 }
0x137a   :  { %v1105_v48 = vpop.permute.xlu0 %1104 }
0x137b   :  { %1108 = vst.msk [vmem:[#allocation4 + $0xc] sm:$0x3] %vm471_vm3, %v1105_v48  ;;  %6147 = vmatmul.mubr.msk.f32.vlgmr.msra.gmra.mrb[10].mxu1 %vm158_vm1, %v1105_v48 }
0x137c   :  { %6420 = vmatpush3.bf16.msra.mxu1 %v7354_v4  ;;  %6160 = vmatprep.mubr.msk.f32.mxu1 %vm7028_vm0, %v7027_v1 }
0x137d   :  { %6424 = vmatprep.subr.bf16.mxu1 %v7030_v19 }
0x137e   :  { %v1326_v49 = vpop.permute.xlu1 %1325 }
0x137f   :  { %1329 = vst.msk [vmem:[#allocation5 + $0xe] sm:$0x3] %vm471_vm3, %v1326_v49  ;;  %6161 = vmatmul.mubr.msk.f32.vlgmr.msra.gmra.mrb[12].mxu1 %vm158_vm1, %v1326_v49 }
0x1380   :  { %6426 = vmatpush3.bf16.msra.mxu1 %v7354_v4  ;;  %6174 = vmatprep.mubr.msk.f32.mxu1 %vm7028_vm0, %v7027_v1 }
0x1381   :  { %6430 = vmatprep.subr.bf16.mxu1 %v7030_v19 }
0x144e   :  { %v7394_v50 = vpop.f32.mrb[10].mxu1 }
0x144f   :  { %v6148_v51 = vpop.f32.mrb[11].mxu1 }
0x1452   :  { %v1400_v54 = vpop.f32.mrb[12].mxu1 }
0x1453   :  { %v1404_v55 = vadd.f32 %v1400_v54, %v1331_v52  ;;  %v6162_v56 = vpop.f32.mrb[13].mxu1 }
0x1454   :  { %v1649_v56 = vld [vmem:[#allocation3 + $0x6] sm:$0x3] }
0x1455   :  { %v1405_v31 = vadd.f32 %v7368_v12, %v1404_v55 }
0x1457   :  { %6807 = vtanh.f32 %v1405_v31  ;;  %v5841_v58 = vmul.f32 -1.442695, %v1405_v31 }
0x1459   :  { %6809 = vpow2.f32 %v5841_v58 }
0x1461   :  { %v6808_v57 = vpop.eup %6807 }
0x1462   :  { %1415 = vrot.lane.b32.xlu0 %v6808_v57, %s7032_s25 }
0x1463   :  { %v6810_v59 = vpop.eup %6809 }
0x1464   :  { %v1409_v60 = vadd.f32 1.0, %v6810_v59 }
0x1466   :  { %6811 = vrcp.f32 %v1409_v60 }
0x1470   :  { %v6812_v61 = vpop.eup %6811 }
0x1471   :  { %v1413_v0 = vmul.f32 %v6812_v61, %v1317_v41 }
0x14d4   :  { %v1416_v62 = vpop.permute.xlu0 %1415 }
0x14d5   :  { %v1418_v63 = vmul.f32 %v6812_v61, %v1416_v62 }
0x14d7   :  { %1420 = vrot.lane.b32.xlu1 %v1418_v63, %s7025_s3 }
0x1549   :  { %v1421_v2 = vpop.permute.xlu1 %1420 }
0x154a   :  { %v1423_v3 = vadd.f32 %v1421_v2, %v1413_v0 }
0x154c   :  { %6813 = vtanh.f32 %v1423_v3 }
0x1556   :  { %v6814_v5 = vpop.eup %6813 }
0x1557   :  { %1426 = vrot.lane.b32.xlu0 %v6814_v5, %s7033_s0 }
0x15c9   :  { %v1427_v6 = vpop.permute.xlu0 %1426 }
0x15ca   :  { %v1429_v8 = vmul.f32 %v6812_v61, %v1427_v6 }
0x15cc   :  { %1431 = vrot.lane.b32.xlu1 %v1429_v8, %s7034_s14 }
0x163e   :  { %v1432_v9 = vpop.permute.xlu1 %1431 }
0x163f   :  { %1435 = vst.msk [vmem:[#allocation5 + $0xc] sm:$0x3] %vm471_vm3, %v1432_v9  ;;  %6168 = vmatmul.mubr.msk.f32.vlgmr.msra.gmra.mrb[14].mxu0 %vm158_vm1, %v1432_v9 }
0x1640   :  { %6429 = vmatpush3.bf16.msra.mxu0 %v7354_v4  ;;  %6181 = vmatprep.mubr.msk.f32.mxu0 %vm7028_vm0, %v7027_v1 }
0x1641   :  { %6433 = vmatprep.subr.bf16.mxu0 %v7030_v19 }
0x1712   :  { %v1506_v11 = vpop.f32.mrb[14].mxu0 }
0x1713   :  { %v1510_v13 = vadd.f32 %v1506_v11, %v1437_v10  ;;  %v6169_v14 = vpop.f32.mrb[15].mxu0 }
0x1714   :  { %v1755_v14 = vld [vmem:[#allocation3 + $0x4] sm:$0x3] }
0x1715   :  { %v1511_v15 = vadd.f32 %v7368_v12, %v1510_v13 }
0x1717   :  { %6815 = vtanh.f32 %v1511_v15  ;;  %v5843_v17 = vmul.f32 -1.442695, %v1511_v15 }
0x1719   :  { %6817 = vpow2.f32 %v5843_v17 }
0x1721   :  { %v6816_v16 = vpop.eup %6815 }
0x1722   :  { %1521 = vrot.lane.b32.xlu0 %v6816_v16, %s7032_s25 }
0x1723   :  { %v6818_v18 = vpop.eup %6817 }
0x1724   :  { %v1515_v20 = vadd.f32 1.0, %v6818_v18 }
0x1726   :  { %6819 = vrcp.f32 %v1515_v20 }
0x1730   :  { %v6820_v21 = vpop.eup %6819 }
0x1731   :  { %v1519_v24 = vmul.f32 %v6820_v21, %v1423_v3 }
0x1794   :  { %v1522_v22 = vpop.permute.xlu0 %1521 }
0x1795   :  { %v1524_v23 = vmul.f32 %v6820_v21, %v1522_v22 }
0x1797   :  { %1526 = vrot.lane.b32.xlu1 %v1524_v23, %s7025_s3 }
0x1809   :  { %v1527_v25 = vpop.permute.xlu1 %1526 }
0x180a   :  { %v1529_v26 = vadd.f32 %v1527_v25, %v1519_v24 }
0x180c   :  { %6821 = vtanh.f32 %v1529_v26 }
0x1816   :  { %v6822_v27 = vpop.eup %6821 }
0x1817   :  { %1532 = vrot.lane.b32.xlu0 %v6822_v27, %s7033_s0 }
0x1889   :  { %v1533_v28 = vpop.permute.xlu0 %1532 }
0x188a   :  { %v1535_v29 = vmul.f32 %v6820_v21, %v1533_v28 }
0x188c   :  { %1537 = vrot.lane.b32.xlu1 %v1535_v29, %s7034_s14 }
0x18fe   :  { %v1538_v30 = vpop.permute.xlu1 %1537 }
0x18ff   :  { %1541 = vst.msk [vmem:[#allocation5 + $0xa] sm:$0x3] %vm471_vm3, %v1538_v30  ;;  %6175 = vmatmul.mubr.msk.f32.vlgmr.msra.gmra.mrb[14].mxu1 %vm158_vm1, %v1538_v30 }
0x1900   :  { %6432 = vmatpush3.bf16.msra.mxu1 %v7354_v4  ;;  %6188 = vmatprep.mubr.msk.f32.mxu1 %vm7028_vm0, %v7027_v1 }
0x1901   :  { %6436 = vmatprep.subr.bf16.mxu1 %v7030_v19 }
0x19d2   :  { %v1612_v34 = vpop.f32.mrb[14].mxu1 }
0x19d3   :  { %v1616_v35 = vadd.f32 %v1612_v34, %v1543_v33  ;;  %v6176_v37 = vpop.f32.mrb[15].mxu1 }
0x19d5   :  { %v1617_v39 = vadd.f32 %v7368_v12, %v1616_v35  ;;  %v1861_v35 = vld [vmem:[#allocation3 + $0x2] sm:$0x3] }
0x19d7   :  { %6823 = vtanh.f32 %v1617_v39  ;;  %v5845_v41 = vmul.f32 -1.442695, %v1617_v39 }
0x19d9   :  { %6825 = vpow2.f32 %v5845_v41 }
0x19e1   :  { %v6824_v40 = vpop.eup %6823 }
0x19e2   :  { %1627 = vrot.lane.b32.xlu0 %v6824_v40, %s7032_s25 }
0x19e3   :  { %v6826_v42 = vpop.eup %6825 }
0x19e4   :  { %v1621_v43 = vadd.f32 1.0, %v6826_v42 }
0x19e6   :  { %6827 = vrcp.f32 %v1621_v43 }
0x19f0   :  { %v6828_v44 = vpop.eup %6827 }
0x19f1   :  { %v1625_v47 = vmul.f32 %v6828_v44, %v1529_v26 }
0x1a54   :  { %v1628_v45 = vpop.permute.xlu0 %1627 }
0x1a55   :  { %v1630_v46 = vmul.f32 %v6828_v44, %v1628_v45 }
0x1a57   :  { %1632 = vrot.lane.b32.xlu1 %v1630_v46, %s7025_s3 }
0x1ac9   :  { %v1633_v48 = vpop.permute.xlu1 %1632 }
0x1aca   :  { %v1635_v49 = vadd.f32 %v1633_v48, %v1625_v47 }
0x1acc   :  { %6829 = vtanh.f32 %v1635_v49 }
0x1ad6   :  { %v6830_v51 = vpop.eup %6829 }
0x1ad7   :  { %1638 = vrot.lane.b32.xlu0 %v6830_v51, %s7033_s0 }
0x1b49   :  { %v1639_v52 = vpop.permute.xlu0 %1638 }
0x1b4a   :  { %v1641_v54 = vmul.f32 %v6828_v44, %v1639_v52 }
0x1b4c   :  { %1643 = vrot.lane.b32.xlu1 %v1641_v54, %s7034_s14 }
0x1bbe   :  { %v1644_v55 = vpop.permute.xlu1 %1643 }
0x1bbf   :  { %1647 = vst.msk [vmem:[#allocation5 + $0x8] sm:$0x3] %vm471_vm3, %v1644_v55  ;;  %6182 = vmatmul.mubr.msk.f32.vlgmr.msra.gmra.mrb[16].mxu0 %vm158_vm1, %v1644_v55  ;;  %v1110_v55 = vld [vmem:[#allocation2 + $0xe] sm:$0x3] }
0x1bc0   :  { %6435 = vmatpush3.bf16.msra.mxu0 %v7354_v4  ;;  %6195 = vmatprep.mubr.msk.f32.mxu0 %vm7028_vm0, %v7027_v1 }
0x1bc1   :  { %6205 = vmatprep.subr.bf16.mxu0 %v7027_v1 }
0x1c92   :  { %v1718_v31 = vpop.f32.mrb[16].mxu0 }
0x1c93   :  { %v1722_v57 = vadd.f32 %v1718_v31, %v1649_v56  ;;  %v6183_v58 = vpop.f32.mrb[17].mxu0  ;;  %v1183_v56 = vadd.f32 %v7394_v50, %v1110_v55 }
0x1c95   :  { %v1723_v59 = vadd.f32 %v7368_v12, %v1722_v57  ;;  %v1184_v31 = vadd.f32 %v7228_v53, %v1183_v56 }
0x1c97   :  { %6831 = vtanh.f32 %v1723_v59  ;;  %v5847_v61 = vmul.f32 -1.442695, %v1723_v59 }
0x1c99   :  { %6833 = vpow2.f32 %v5847_v61 }
0x1ca1   :  { %v6832_v60 = vpop.eup %6831 }
0x1ca2   :  { %1733 = vrot.lane.b32.xlu0 %v6832_v60, %s7032_s25  ;;  %v5835_v60 = vmul.f32 -1.442695, %v1184_v31 }
0x1ca3   :  { %v6834_v62 = vpop.eup %6833 }
0x1ca4   :  { %v1727_v63 = vadd.f32 1.0, %v6834_v62 }
0x1ca6   :  { %6835 = vrcp.f32 %v1727_v63 }
0x1cb0   :  { %v6836_v0 = vpop.eup %6835 }
0x1cb1   :  { %v1731_v5 = vmul.f32 %v6836_v0, %v1635_v49 }
0x1d14   :  { %v1734_v2 = vpop.permute.xlu0 %1733 }
0x1d15   :  { %v1736_v3 = vmul.f32 %v6836_v0, %v1734_v2 }
0x1d17   :  { %1738 = vrot.lane.b32.xlu1 %v1736_v3, %s7025_s3 }
0x1d89   :  { %v1739_v6 = vpop.permute.xlu1 %1738 }
0x1d8a   :  { %v1741_v8 = vadd.f32 %v1739_v6, %v1731_v5 }
0x1d8c   :  { %6837 = vtanh.f32 %v1741_v8 }
0x1d96   :  { %v6838_v9 = vpop.eup %6837 }
0x1d97   :  { %1744 = vrot.lane.b32.xlu0 %v6838_v9, %s7033_s0 }
0x1e09   :  { %v1745_v10 = vpop.permute.xlu0 %1744 }
0x1e0a   :  { %v1747_v11 = vmul.f32 %v6836_v0, %v1745_v10 }
0x1e0c   :  { %1749 = vrot.lane.b32.xlu1 %v1747_v11, %s7034_s14 }
0x1e7e   :  { %v1750_v13 = vpop.permute.xlu1 %1749 }
0x1e7f   :  { %1753 = vst.msk [vmem:[#allocation5 + $0x6] sm:$0x3] %vm471_vm3, %v1750_v13  ;;  %6189 = vmatmul.mubr.msk.f32.vlgmr.msra.gmra.mrb[16].mxu1 %vm158_vm1, %v1750_v13 }
0x1e80   :  { %6438 = vmatpush3.bf16.msra.mxu1 %v7354_v4  ;;  %6202 = vmatprep.mubr.msk.f32.mxu1 %vm7028_vm0, %v7027_v1 }
0x1e81   :  { %6213 = vmatprep.subr.bf16.mxu1 %v7027_v1 }
0x1f52   :  { %v1824_v15 = vpop.f32.mrb[16].mxu1 }
0x1f53   :  { %v1828_v16 = vadd.f32 %v1824_v15, %v1755_v14  ;;  %v6190_v17 = vpop.f32.mrb[17].mxu1 }
0x1f55   :  { %v1829_v18 = vadd.f32 %v7368_v12, %v1828_v16 }
0x1f57   :  { %6839 = vtanh.f32 %v1829_v18  ;;  %v5849_v21 = vmul.f32 -1.442695, %v1829_v18 }
0x1f59   :  { %6841 = vpow2.f32 %v5849_v21  ;;  %v2085_v21 = vld [vmem:[#allocation5 + $0xe] sm:$0x3] }
0x1f61   :  { %v6840_v20 = vpop.eup %6839 }
0x1f62   :  { %1839 = vrot.lane.b32.xlu0 %v6840_v20, %s7032_s25  ;;  %v2084_v20 = vld [vmem:[#allocation5 + $0xc] sm:$0x3] }
0x1f63   :  { %v6842_v22 = vpop.eup %6841 }
0x1f64   :  { %v1833_v23 = vadd.f32 1.0, %v6842_v22  ;;  %v6515_v22 = vpack.i.bf16 %v2085_v21, %v2084_v20 }
0x1f66   :  { %6843 = vrcp.f32 %v1833_v23 }
0x1f70   :  { %v6844_v4 = vpop.eup %6843 }
0x1f71   :  { %v1837_v26 = vmul.f32 %v6844_v4, %v1741_v8  ;;  %v1966_v8 = vld [vmem:[#allocation3] sm:$0x3] }
0x1fd4   :  { %v1840_v24 = vpop.permute.xlu0 %1839 }
0x1fd5   :  { %v1842_v25 = vmul.f32 %v6844_v4, %v1840_v24 }
0x1fd7   :  { %1844 = vrot.lane.b32.xlu1 %v1842_v25, %s7025_s3 }
0x2049   :  { %v1845_v27 = vpop.permute.xlu1 %1844 }
0x204a   :  { %v1847_v28 = vadd.f32 %v1845_v27, %v1837_v26 }
0x204c   :  { %6845 = vtanh.f32 %v1847_v28 }
0x2056   :  { %v6846_v29 = vpop.eup %6845 }
0x2057   :  { %1850 = vrot.lane.b32.xlu0 %v6846_v29, %s7033_s0 }
0x20c9   :  { %v1851_v30 = vpop.permute.xlu0 %1850 }
0x20ca   :  { %v1853_v33 = vmul.f32 %v6844_v4, %v1851_v30 }
0x20cc   :  { %1855 = vrot.lane.b32.xlu1 %v1853_v33, %s7034_s14 }
0x213e   :  { %v1856_v34 = vpop.permute.xlu1 %1855 }
0x213f   :  { %1859 = vst.msk [vmem:[#allocation5 + $0x4] sm:$0x3] %vm471_vm3, %v1856_v34  ;;  %6196 = vmatmul.mubr.msk.f32.vlgmr.msra.gmra.mrb[18].mxu0 %vm158_vm1, %v1856_v34 }
0x2140   :  { %6209 = vmatprep.mubr.msk.bf16.mxu0 %vm7028_vm0, %v7027_v1 }
0x2146   :  { %v2080_v17 = vld [vmem:[#allocation5 + $0x4] sm:$0x3] }
0x2212   :  { %v1930_v37 = vpop.f32.mrb[18].mxu0 }
0x2213   :  { %v1934_v39 = vadd.f32 %v1930_v37, %v1861_v35  ;;  %v6197_v40 = vpop.f32.mrb[19].mxu0 }
0x2214   :  { %v6723_v40 = vld [vmem:[%s8196_s4 + $0x10] sm:$0xff]  }
0x2215   :  { %v1935_v41 = vadd.f32 %v7368_v12, %v1934_v39  ;;  %v6722_v39 = vld [vmem:[%s8196_s4] sm:$0xff]  }
0x2216   :  { %6206 = vmatpush3.bf16.msra.mxu0 %v6722_v39 }
0x2217   :  { %6847 = vtanh.f32 %v1935_v41  ;;  %v5851_v43 = vmul.f32 -1.442695, %v1935_v41  ;;  %6207 = vmatprep.subr.bf16.mxu0 %v7027_v1 }
0x2219   :  { %6849 = vpow2.f32 %v5851_v43 }
0x2221   :  { %v6848_v42 = vpop.eup %6847 }
0x2222   :  { %1945 = vrot.lane.b32.xlu0 %v6848_v42, %s7032_s25 }
0x2223   :  { %v6850_v44 = vpop.eup %6849 }
0x2224   :  { %v1939_v45 = vadd.f32 1.0, %v6850_v44  ;;  %v6724_v44 = vld [vmem:[%s8196_s4 + $0x8] sm:$0xff]  }
0x2225   :  { %6208 = vmatpush3.bf16.msra.mxu0 %v6724_v44 }
0x2226   :  { %6851 = vrcp.f32 %v1939_v45  ;;  %v6725_v45 = vld [vmem:[%s8196_s4 + $0x18] sm:$0xff]   ;;  %6439 = vmatprep.subr.bf16.mxu0 %v7030_v19 }
0x2230   :  { %v6852_v46 = vpop.eup %6851 }
0x2231   :  { %v1943_v49 = vmul.f32 %v6852_v46, %v1847_v28 }
0x2294   :  { %v1946_v47 = vpop.permute.xlu0 %1945 }
0x2295   :  { %v1948_v48 = vmul.f32 %v6852_v46, %v1946_v47  ;;  %v2083_v47 = vld [vmem:[#allocation5 + $0xa] sm:$0x3] }
0x2297   :  { %1950 = vrot.lane.b32.xlu1 %v1948_v48, %s7025_s3 }
0x2309   :  { %v1951_v51 = vpop.permute.xlu1 %1950 }
0x230a   :  { %v1953_v52 = vadd.f32 %v1951_v51, %v1943_v49 }
0x230c   :  { %6853 = vtanh.f32 %v1953_v52 }
0x230d   :  { %6855 = vtanh.f32 %v1184_v31  ;;  %v2072_v31 = vld [vmem:[#allocation4 + $0x4] sm:$0x3] }
0x230e   :  { %6857 = vpow2.f32 %v5835_v60 }
0x2316   :  { %v6854_v54 = vpop.eup %6853 }
0x2317   :  { %1956 = vrot.lane.b32.xlu0 %v6854_v54, %s7033_s0  ;;  %v6856_v59 = vpop.eup %6855 }
0x2318   :  { %v6858_v61 = vpop.eup %6857 }
0x2319   :  { %v1188_v62 = vadd.f32 1.0, %v6858_v61  ;;  %v2070_v61 = vld [vmem:[#allocation4] sm:$0x3] }
0x231b   :  { %6859 = vrcp.f32 %v1188_v62 }
0x2325   :  { %v6860_v53 = vpop.eup %6859 }
0x2326   :  { %v1192_v2 = vmul.f32 %v6860_v53, %v7375_v38  ;;  %v2081_v38 = vld [vmem:[#allocation5 + $0x6] sm:$0x3] }
0x2327   :  { %v6500_v18 = vpack.i.bf16 %v2081_v38, %v2080_v17  ;;  %v2075_v17 = vld [vmem:[#allocation4 + $0xa] sm:$0x3] }
0x2389   :  { %v1957_v57 = vpop.permute.xlu0 %1956 }
0x238a   :  { %v1959_v58 = vmul.f32 %v6852_v46, %v1957_v57  ;;  %v2082_v46 = vld [vmem:[#allocation5 + $0x8] sm:$0x3]  ;;  %v2073_v57 = vld [vmem:[#allocation4 + $0x6] sm:$0x3] }
0x238b   :  { %v6510_v48 = vpack.i.bf16 %v2083_v47, %v2082_v46 }
0x238c   :  { %1961 = vrot.lane.b32.xlu1 %v1959_v58, %s7034_s14 }
0x2390   :  { %1194 = vrot.lane.b32.xlu1 %v6856_v59, %s7032_s25 }
0x23fe   :  { %v1962_v63 = vpop.permute.xlu1 %1961 }
0x23ff   :  { %1965 = vst.msk [vmem:[#allocation5 + $0x2] sm:$0x3] %vm471_vm3, %v1962_v63  ;;  %6203 = vmatmul.mubr.msk.f32.vlgmr.msra.gmra.mrb[18].mxu1 %vm158_vm1, %v1962_v63 }
0x2400   :  { %6217 = vmatprep.mubr.msk.bf16.mxu1 %vm7028_vm0, %v7027_v1  ;;  %6214 = vmatpush3.bf16.msra.mxu1 %v6723_v40 }
0x2401   :  { %6215 = vmatprep.subr.bf16.mxu1 %v7027_v1 }
0x2402   :  { %v1195_v50 = vpop.permute.xlu1 %1194 }
0x2403   :  { %v1197_v0 = vmul.f32 %v6860_v53, %v1195_v50 }
0x2404   :  { %6216 = vmatpush3.bf16.msra.mxu1 %v6725_v45 }
0x2405   :  { %1199 = vrot.lane.b32.xlu1 %v1197_v0, %s7025_s3  ;;  %6442 = vmatprep.subr.bf16.mxu1 %v7030_v19  ;;  %v2071_v0 = vld [vmem:[#allocation4 + $0x2] sm:$0x3] }
0x2406   :  { %v2079_v42 = vld [vmem:[#allocation5 + $0x2] sm:$0x3] }
0x2477   :  { %v1200_v3 = vpop.permute.xlu1 %1199 }
0x2478   :  { %v1202_v5 = vadd.f32 %v1200_v3, %v1192_v2 }
0x247a   :  { %6861 = vtanh.f32 %v1202_v5 }
0x2484   :  { %v6862_v6 = vpop.eup %6861 }
0x2485   :  { %1205 = vrot.lane.b32.xlu1 %v6862_v6, %s7033_s0 }
0x24d2   :  { %v2035_v9 = vpop.f32.mrb[18].mxu1 }
0x24d3   :  { %v2039_v10 = vadd.f32 %v2035_v9, %v1966_v8  ;;  %v6204_v11 = vpop.f32.mrb[19].mxu1 }
0x24d5   :  { %v2040_v13 = vadd.f32 %v7368_v12, %v2039_v10 }
0x24d7   :  { %6863 = vtanh.f32 %v2040_v13  ;;  %v5853_v23 = vmul.f32 -1.442695, %v2040_v13 }
0x24d9   :  { %6865 = vpow2.f32 %v5853_v23 }
0x24e1   :  { %v6864_v14 = vpop.eup %6863 }
0x24e2   :  { %2050 = vrot.lane.b32.xlu0 %v6864_v14, %s7032_s25 }
0x24e3   :  { %v6866_v12 = vpop.eup %6865 }
0x24e4   :  { %v2044_v4 = vadd.f32 1.0, %v6866_v12 }
0x24e6   :  { %6867 = vrcp.f32 %v2044_v4 }
0x24f0   :  { %v6868_v24 = vpop.eup %6867 }
0x24f1   :  { %v2048_v28 = vmul.f32 %v6868_v24, %v1953_v52 }
0x24f7   :  { %v1206_v15 = vpop.permute.xlu1 %1205 }
0x24f8   :  { %v1208_v16 = vmul.f32 %v6860_v53, %v1206_v15  ;;  %v2076_v53 = vld [vmem:[#allocation4 + $0xc] sm:$0x3] }
0x24fa   :  { %1210 = vrot.lane.b32.xlu1 %v1208_v16, %s7034_s14  ;;  %v2074_v16 = vld [vmem:[#allocation4 + $0x8] sm:$0x3] }
0x24fe   :  { %6501 = vrot.lane.b32.xlu1 %v6500_v18, %s7025_s3 }
0x2502   :  { %6516 = vrot.lane.b32.xlu1 %v6515_v22, %s7025_s3 }
0x2554   :  { %v2051_v25 = vpop.permute.xlu0 %2050 }
0x2555   :  { %v2053_v26 = vmul.f32 %v6868_v24, %v2051_v25  ;;  %v2415_v25 = vld [vmem:[%s8197_s5 + $0x8] sm:$0xff] }
0x2557   :  { %2055 = vrot.lane.b32.xlu0 %v2053_v26, %s7025_s3 }
0x256c   :  { %v1211_v27 = vpop.permute.xlu1 %1210 }
0x256d   :  { %1214 = vst.msk [vmem:[#allocation4 + $0xe] sm:$0x3] %vm471_vm3, %v1211_v27 }
0x2570   :  { %v6502_v49 = vpop.permute.xlu1 %6501 }
0x2571   :  { %v6504_v52 = vunpack.i.h.bf16 %v6502_v49  ;;  %v6503_v54 = vunpack.i.l.bf16 %v6502_v49 }
0x2573   :  { %v2121_v59 = vsel %vm158_vm1, %v2073_v57, %v6504_v52  ;;  %v2120_v60 = vsel %vm158_vm1, %v2072_v31, %v6503_v54 }
0x2574   :  { %v6517_v51 = vpop.permute.xlu1 %6516  ;;  %v2077_v50 = vld [vmem:[#allocation4 + $0xe] sm:$0x3]  ;;  %v5855_v8 = vpack.c.bf16 %v2121_v59, %v2120_v60 }
0x2575   :  { %v6519_v55 = vunpack.i.h.bf16 %v6517_v51  ;;  %v6518_v56 = vunpack.i.l.bf16 %v6517_v51 }
0x2576   :  { %v2163_v20 = vrot.slane %v5855_v8, %v7160_v7 }
0x2577   :  { %v2125_v2 = vsel %vm158_vm1, %v2077_v50, %v6519_v55  ;;  %v2124_v3 = vsel %vm158_vm1, %v2076_v53, %v6518_v56  ;;  %v7556_v50 = vld [vmem:[%s8198_s6] ss:$0 sm:$0xff] }
0x2578   :  { %v5857_v14 = vpack.c.bf16 %v2125_v2, %v2124_v3 }
0x257a   :  { %v2177_v22 = vrot.slane %v5857_v14, %v7160_v7 }
0x25c9   :  { %v2056_v29 = vpop.permute.xlu0 %2055 }
0x25ca   :  { %v2058_v30 = vadd.f32 %v2056_v29, %v2048_v28 }
0x25cc   :  { %6869 = vtanh.f32 %v2058_v30 }
0x25d6   :  { %v6870_v33 = vpop.eup %6869 }
0x25d7   :  { %2061 = vrot.lane.b32.xlu0 %v6870_v33, %s7033_s0 }
0x2649   :  { %v2062_v34 = vpop.permute.xlu0 %2061 }
0x264a   :  { %v2064_v35 = vmul.f32 %v6868_v24, %v2062_v34  ;;  %v2414_v24 = vld [vmem:[%s8197_s5] sm:$0xff] }
0x264b   :  { %v7512_v28 = vpack.c.bf16 %v2415_v25, %v2414_v24 }
0x264c   :  { %2066 = vrot.lane.b32.xlu0 %v2064_v35, %s7034_s14 }
0x26be   :  { %v2067_v37 = vpop.permute.xlu0 %2066 }
0x26bf   :  { %2069 = vst.msk [vmem:[#allocation5] sm:$0x3] %vm471_vm3, %v2067_v37 }
0x26c6   :  { %v2078_v41 = vld [vmem:[#allocation5] sm:$0x3] }
0x26c7   :  { %v6505_v43 = vpack.i.bf16 %v2079_v42, %v2078_v41 }
0x26c9   :  { %6506 = vrot.lane.b32.xlu0 %v6505_v43, %s7025_s3 }
0x26cd   :  { %6511 = vrot.lane.b32.xlu0 %v6510_v48, %s7025_s3 }
0x273b   :  { %v6507_v58 = vpop.permute.xlu0 %6506 }
0x273c   :  { %v6509_v62 = vunpack.i.h.bf16 %v6507_v58  ;;  %v6508_v63 = vunpack.i.l.bf16 %v6507_v58 }
0x273e   :  { %v2119_v5 = vsel %vm158_vm1, %v2071_v0, %v6509_v62  ;;  %v2118_v6 = vsel %vm158_vm1, %v2070_v61, %v6508_v63 }
0x273f   :  { %v5854_v9 = vpack.c.bf16 %v2119_v5, %v2118_v6  ;;  %v6512_v10 = vpop.permute.xlu0 %6511 }
0x2740   :  { %v6514_v11 = vunpack.i.h.bf16 %v6512_v10  ;;  %v6513_v13 = vunpack.i.l.bf16 %v6512_v10 }
0x2741   :  { %v2156_v15 = vrot.slane %v5854_v9, %v7160_v7 }
0x2742   :  { %v2123_v38 = vsel %vm158_vm1, %v2075_v17, %v6514_v11  ;;  %v2122_v18 = vsel %vm158_vm1, %v2074_v16, %v6513_v13 }
0x2743   :  { %v5856_v21 = vpack.c.bf16 %v2123_v38, %v2122_v18  ;;  %v2178_v23 = vcombine.low %v2156_v15, %v2163_v20 }
0x2745   :  { %v2170_v12 = vrot.slane %v5856_v21, %v7160_v7  ;;  %v2186_v26 = vrot.slane %v2178_v23, %v7160_v7 }
0x2747   :  { %v2179_v4 = vcombine.low %v2170_v12, %v2177_v22 }
0x2749   :  { %v2193_v27 = vrot.slane %v2179_v4, %v7160_v7 }
0x274b   :  { %v2194_v29 = vcombine.low %v2186_v26, %v2193_v27 }
0x274d   :  { %6210 = vmatmul.mubr.msk.bf16.vlgmr.msra.gmra.mrb[20].mxu0 %vm2207_vm4, %v2194_v29  ;;  %6218 = vmatmul.mubr.msk.bf16.vlgmr.msra.gmra.mrb[20].mxu1 %vm2207_vm4, %v2194_v29 }
0x274e   :  { %6441 = vmatpush3.bf16.msra.mxu0 %v7512_v28  ;;  %6225 = vmatprep.mubr.msk.f32.mxu0 %vm7028_vm0, %v7027_v1 }
0x274f   :  { %6444 = vmatpush3.bf16.msra.mxu1 %v7512_v28  ;;  %6232 = vmatprep.mubr.msk.f32.mxu1 %vm7028_vm0, %v7027_v1 }
0x2750   :  { %6445 = vmatprep.subr.bf16.mxu0 %v7030_v19  ;;  %6448 = vmatprep.subr.bf16.mxu1 %v7030_v19 }
0x2755   :  { %6226 = vmatmul.mubr.f32.vlgmr.msra.gmra.mrb[24].mxu0 %v7027_v1 }
0x2756   :  { %6447 = vmatpush3.bf16.msra.mxu0 %v7512_v28  ;;  %6239 = vmatprep.mubr.msk.f32.mxu0 %vm7028_vm0, %v7027_v1 }
0x2757   :  { %6451 = vmatprep.subr.bf16.mxu0 %v7030_v19 }
0x2820   :  { %v2245_v30 = vpop.f32.mrb[20].mxu0  ;;  %v2355_v33 = vpop.f32.mrb[20].mxu1 }
0x2821   :  { %v2254_v34 = vcombine.high %v2245_v30, %v2245_v30  ;;  %v2261_v35 = vrot.slane %v2245_v30, %v7214_v36  ;;  %v2364_v37 = vcombine.high %v2355_v33, %v2355_v33  ;;  %v2371_v39 = vrot.slane %v2355_v33, %v7214_v36  ;;  %v6211_v40 = vpop.f32.mrb[21].mxu0  ;;  %v6219_v41 = vpop.f32.mrb[21].mxu1 }
0x2822   :  { %v2248_v42 = vpop.f32.mrb[22].mxu0  ;;  %v2358_v43 = vpop.f32.mrb[22].mxu1 }
0x2823   :  { %v2268_v44 = vrot.slane %v2254_v34, %v7214_v36  ;;  %v2269_v45 = vcombine.high %v2261_v35, %v2261_v35  ;;  %2296 = vst.msk [vmem:[#allocation2] sm:$0x3] %vm247_vm2, %v2261_v35  ;;  %v2378_v46 = vrot.slane %v2364_v37, %v7214_v36  ;;  %v2379_v47 = vcombine.high %v2371_v39, %v2371_v39  ;;  %v6212_v48 = vpop.f32.mrb[23].mxu0  ;;  %v6220_v49 = vpop.f32.mrb[23].mxu1 }
0x2824   :  { %2406 = vst.msk [vmem:[#allocation3] sm:$0x3] %vm247_vm2, %v2371_v39  ;;  %v2271_v51 = vcombine.high %v2248_v42, %v2248_v42  ;;  %v2278_v52 = vrot.slane %v2248_v42, %v7214_v36  ;;  %v2381_v54 = vcombine.high %v2358_v43, %v2358_v43  ;;  %v2388_v55 = vrot.slane %v2358_v43, %v7214_v36 }
0x2825   :  { %v2270_v56 = vcombine.high %v2268_v44, %v2268_v44  ;;  %2297 = vst.msk [vmem:[#allocation2 + $0x2] sm:$0x3] %vm247_vm2, %v2269_v45  ;;  %2298 = vst.msk [vmem:[#allocation2 + $0x4] sm:$0x3] %vm247_vm2, %v2268_v44  ;;  %v2380_v31 = vcombine.high %v2378_v46, %v2378_v46 }
0x2826   :  { %2407 = vst.msk [vmem:[#allocation3 + $0x2] sm:$0x3] %vm247_vm2, %v2379_v47  ;;  %2408 = vst.msk [vmem:[#allocation3 + $0x4] sm:$0x3] %vm247_vm2, %v2378_v46  ;;  %v2285_v57 = vrot.slane %v2271_v51, %v7214_v36  ;;  %v2286_v58 = vcombine.high %v2278_v52, %v2278_v52  ;;  %v2395_v59 = vrot.slane %v2381_v54, %v7214_v36 }
0x2827   :  { %2300 = vst.msk [vmem:[#allocation2 + $0x8] sm:$0x3] %vm247_vm2, %v2278_v52  ;;  %v2396_v60 = vcombine.high %v2388_v55, %v2388_v55  ;;  %2410 = vst.msk [vmem:[#allocation3 + $0x8] sm:$0x3] %vm247_vm2, %v2388_v55 }
0x2828   :  { %2299 = vst.msk [vmem:[#allocation2 + $0x6] sm:$0x3] %vm247_vm2, %v2270_v56  ;;  %2409 = vst.msk [vmem:[#allocation3 + $0x6] sm:$0x3] %vm247_vm2, %v2380_v31  ;;  %v2287_v61 = vcombine.high %v2285_v57, %v2285_v57  ;;  %v2397_v62 = vcombine.high %v2395_v59, %v2395_v59  ;;  %v2484_v63 = vpop.f32.mrb[24].mxu0 }
0x2829   :  { %2301 = vst.msk [vmem:[#allocation2 + $0xa] sm:$0x3] %vm247_vm2, %v2286_v58  ;;  %2302 = vst.msk [vmem:[#allocation2 + $0xc] sm:$0x3] %vm247_vm2, %v2285_v57  ;;  %v6227_v53 = vpop.f32.mrb[25].mxu0 }
0x282a   :  { %2411 = vst.msk [vmem:[#allocation3 + $0xa] sm:$0x3] %vm247_vm2, %v2396_v60  ;;  %2412 = vst.msk [vmem:[#allocation3 + $0xc] sm:$0x3] %vm247_vm2, %v2395_v59  ;;  %v2417_v0 = vld [vmem:[#allocation2] sm:$0x3] }
0x282b   :  { %2303 = vst.msk [vmem:[#allocation2 + $0xe] sm:$0x3] %vm247_vm2, %v2287_v61  ;;  %2413 = vst.msk [vmem:[#allocation3 + $0xe] sm:$0x3] %vm247_vm2, %v2397_v62  ;;  %v2488_v2 = vadd.f32 %v2484_v63, %v2417_v0 }
0x282c   :  { %v2525_v21 = vld [vmem:[#allocation2 + $0x2] sm:$0x3]  ;;  %v2629_v43 = vld [vmem:[#allocation2 + $0x4] sm:$0x3] }
0x282d   :  { %v2495_v3 = vadd.f32 %v7556_v50, %v2488_v2 }
0x282f   :  { %6871 = vtanh.f32 %v2495_v3  ;;  %v5869_v6 = vmul.f32 -1.442695, %v2495_v3  ;;  %v2733_v63 = vld [vmem:[#allocation2 + $0x6] sm:$0x3] }
0x2831   :  { %6873 = vpow2.f32 %v5869_v6 }
0x2839   :  { %v6872_v5 = vpop.eup %6871 }
0x283a   :  { %2505 = vrot.lane.b32.xlu0 %v6872_v5, %s7032_s25 }
0x283b   :  { %v6874_v8 = vpop.eup %6873 }
0x283c   :  { %v2499_v9 = vadd.f32 1.0, %v6874_v8 }
0x283e   :  { %6875 = vrcp.f32 %v2499_v9 }
0x2848   :  { %v6876_v10 = vpop.eup %6875 }
0x2849   :  { %v2503_v14 = vmul.f32 0.0, %v6876_v10 }
0x28ac   :  { %v2506_v11 = vpop.permute.xlu0 %2505 }
0x28ad   :  { %v2508_v13 = vmul.f32 %v6876_v10, %v2506_v11 }
0x28af   :  { %2510 = vrot.lane.b32.xlu1 %v2508_v13, %s7025_s3 }
0x2921   :  { %v2511_v15 = vpop.permute.xlu1 %2510 }
0x2922   :  { %v2513_v16 = vadd.f32 %v2511_v15, %v2503_v14 }
0x2924   :  { %6877 = vtanh.f32 %v2513_v16 }
0x292e   :  { %v6878_v17 = vpop.eup %6877 }
0x292f   :  { %2516 = vrot.lane.b32.xlu0 %v6878_v17, %s7033_s0 }
0x29a1   :  { %v2517_v38 = vpop.permute.xlu0 %2516 }
0x29a2   :  { %v2519_v18 = vmul.f32 %v6876_v10, %v2517_v38 }
0x29a4   :  { %2521 = vrot.lane.b32.xlu1 %v2519_v18, %s7034_s14 }
0x2a16   :  { %v2522_v20 = vpop.permute.xlu1 %2521 }
0x2a17   :  { %2524 = vst.msk [vmem:[#allocation4] sm:$0x3] %vm471_vm3, %v2522_v20  ;;  %6233 = vmatmul.mubr.msk.f32.vlgmr.msra.gmra.mrb[24].mxu1 %vm158_vm1, %v2522_v20 }
0x2a18   :  { %6450 = vmatpush3.bf16.msra.mxu1 %v7512_v28  ;;  %6246 = vmatprep.mubr.msk.f32.mxu1 %vm7028_vm0, %v7027_v1 }
0x2a19   :  { %6454 = vmatprep.subr.bf16.mxu1 %v7030_v19 }
0x2aea   :  { %v2594_v22 = vpop.f32.mrb[24].mxu1 }
0x2aeb   :  { %v2598_v23 = vadd.f32 %v2594_v22, %v2525_v21  ;;  %v6234_v12 = vpop.f32.mrb[25].mxu1  ;;  %v2837_v21 = vld [vmem:[#allocation2 + $0x8] sm:$0x3] }
0x2aed   :  { %v2599_v4 = vadd.f32 %v7556_v50, %v2598_v23 }
0x2aef   :  { %6879 = vtanh.f32 %v2599_v4  ;;  %v5871_v25 = vmul.f32 -1.442695, %v2599_v4 }
0x2af1   :  { %6881 = vpow2.f32 %v5871_v25 }
0x2af9   :  { %v6880_v24 = vpop.eup %6879 }
0x2afa   :  { %2609 = vrot.lane.b32.xlu0 %v6880_v24, %s7032_s25 }
0x2afb   :  { %v6882_v26 = vpop.eup %6881 }
0x2afc   :  { %v2603_v27 = vadd.f32 1.0, %v6882_v26 }
0x2afe   :  { %6883 = vrcp.f32 %v2603_v27 }
0x2b08   :  { %v6884_v29 = vpop.eup %6883 }
0x2b09   :  { %v2607_v34 = vmul.f32 %v6884_v29, %v2513_v16 }
0x2b6c   :  { %v2610_v30 = vpop.permute.xlu0 %2609 }
0x2b6d   :  { %v2612_v33 = vmul.f32 %v6884_v29, %v2610_v30 }
0x2b6f   :  { %2614 = vrot.lane.b32.xlu1 %v2612_v33, %s7025_s3 }
0x2be1   :  { %v2615_v35 = vpop.permute.xlu1 %2614 }
0x2be2   :  { %v2617_v37 = vadd.f32 %v2615_v35, %v2607_v34 }
0x2be4   :  { %6885 = vtanh.f32 %v2617_v37 }
0x2bee   :  { %v6886_v39 = vpop.eup %6885 }
0x2bef   :  { %2620 = vrot.lane.b32.xlu0 %v6886_v39, %s7033_s0 }
0x2c61   :  { %v2621_v40 = vpop.permute.xlu0 %2620 }
0x2c62   :  { %v2623_v41 = vmul.f32 %v6884_v29, %v2621_v40 }
0x2c64   :  { %2625 = vrot.lane.b32.xlu1 %v2623_v41, %s7034_s14 }
0x2cd6   :  { %v2626_v42 = vpop.permute.xlu1 %2625 }
0x2cd7   :  { %2628 = vst.msk [vmem:[#allocation4 + $0x2] sm:$0x3] %vm471_vm3, %v2626_v42  ;;  %6240 = vmatmul.mubr.msk.f32.vlgmr.msra.gmra.mrb[26].mxu0 %vm158_vm1, %v2626_v42 }
0x2cd8   :  { %6453 = vmatpush3.bf16.msra.mxu0 %v7512_v28  ;;  %6253 = vmatprep.mubr.msk.f32.mxu0 %vm7028_vm0, %v7027_v1 }
0x2cd9   :  { %6457 = vmatprep.subr.bf16.mxu0 %v7030_v19 }
0x2daa   :  { %v2698_v44 = vpop.f32.mrb[26].mxu0 }
0x2dab   :  { %v2702_v45 = vadd.f32 %v2698_v44, %v2629_v43  ;;  %v6241_v46 = vpop.f32.mrb[27].mxu0  ;;  %v2941_v43 = vld [vmem:[#allocation2 + $0xa] sm:$0x3] }
0x2dad   :  { %v2703_v47 = vadd.f32 %v7556_v50, %v2702_v45 }
0x2daf   :  { %6887 = vtanh.f32 %v2703_v47  ;;  %v5873_v49 = vmul.f32 -1.442695, %v2703_v47 }
0x2db1   :  { %6889 = vpow2.f32 %v5873_v49 }
0x2db9   :  { %v6888_v48 = vpop.eup %6887 }
0x2dba   :  { %2713 = vrot.lane.b32.xlu0 %v6888_v48, %s7032_s25 }
0x2dbb   :  { %v6890_v51 = vpop.eup %6889 }
0x2dbc   :  { %v2707_v52 = vadd.f32 1.0, %v6890_v51 }
0x2dbe   :  { %6891 = vrcp.f32 %v2707_v52 }
0x2dc8   :  { %v6892_v54 = vpop.eup %6891 }
0x2dc9   :  { %v2711_v31 = vmul.f32 %v6892_v54, %v2617_v37 }
0x2e2c   :  { %v2714_v55 = vpop.permute.xlu0 %2713 }
0x2e2d   :  { %v2716_v56 = vmul.f32 %v6892_v54, %v2714_v55 }
0x2e2f   :  { %2718 = vrot.lane.b32.xlu1 %v2716_v56, %s7025_s3 }
0x2ea1   :  { %v2719_v57 = vpop.permute.xlu1 %2718 }
0x2ea2   :  { %v2721_v58 = vadd.f32 %v2719_v57, %v2711_v31 }
0x2ea4   :  { %6893 = vtanh.f32 %v2721_v58 }
0x2eae   :  { %v6894_v59 = vpop.eup %6893 }
0x2eaf   :  { %2724 = vrot.lane.b32.xlu0 %v6894_v59, %s7033_s0 }
0x2f21   :  { %v2725_v60 = vpop.permute.xlu0 %2724 }
0x2f22   :  { %v2727_v61 = vmul.f32 %v6892_v54, %v2725_v60 }
0x2f24   :  { %2729 = vrot.lane.b32.xlu1 %v2727_v61, %s7034_s14  ;;  %v5884_v61 = vld [vmem:[%s8197_s5 + $0x10] sm:$0xff] }
0x2f96   :  { %v2730_v62 = vpop.permute.xlu1 %2729 }
0x2f97   :  { %2732 = vst.msk [vmem:[#allocation4 + $0x4] sm:$0x3] %vm471_vm3, %v2730_v62  ;;  %6247 = vmatmul.mubr.msk.f32.vlgmr.msra.gmra.mrb[26].mxu1 %vm158_vm1, %v2730_v62  ;;  %v5885_v62 = vld [vmem:[%s8197_s5 + $0x18] sm:$0xff] }
0x2f98   :  { %6456 = vmatpush3.bf16.msra.mxu1 %v7512_v28  ;;  %6260 = vmatprep.mubr.msk.f32.mxu1 %vm7028_vm0, %v7027_v1 }
0x2f99   :  { %6460 = vmatprep.subr.bf16.mxu1 %v7030_v19 }
0x306a   :  { %v2802_v53 = vpop.f32.mrb[26].mxu1 }
0x306b   :  { %v2806_v0 = vadd.f32 %v2802_v53, %v2733_v63  ;;  %v6248_v2 = vpop.f32.mrb[27].mxu1  ;;  %v7624_v63 = vpack.c.bf16 %v5885_v62, %v5884_v61 }
0x306d   :  { %v2807_v3 = vadd.f32 %v7556_v50, %v2806_v0  ;;  %v3045_v0 = vld [vmem:[#allocation2 + $0xc] sm:$0x3] }
0x306f   :  { %6895 = vtanh.f32 %v2807_v3  ;;  %v5875_v6 = vmul.f32 -1.442695, %v2807_v3 }
0x3071   :  { %6897 = vpow2.f32 %v5875_v6 }
0x3079   :  { %v6896_v5 = vpop.eup %6895 }
0x307a   :  { %2817 = vrot.lane.b32.xlu0 %v6896_v5, %s7032_s25 }
0x307b   :  { %v6898_v8 = vpop.eup %6897 }
0x307c   :  { %v2811_v9 = vadd.f32 1.0, %v6898_v8  ;;  %v7641_v8 = vld [vmem:[%s8198_s6 + $0x1] ss:$0 sm:$0xff] }
0x307e   :  { %6899 = vrcp.f32 %v2811_v9  ;;  %v3258_v9 = vld [vmem:[#allocation3 + $0xe] sm:$0x3] }
0x3088   :  { %v6900_v10 = vpop.eup %6899 }
0x3089   :  { %v2815_v14 = vmul.f32 %v6900_v10, %v2721_v58 }
0x30ec   :  { %v2818_v11 = vpop.permute.xlu0 %2817 }
0x30ed   :  { %v2820_v13 = vmul.f32 %v6900_v10, %v2818_v11 }
0x30ef   :  { %2822 = vrot.lane.b32.xlu1 %v2820_v13, %s7025_s3 }
0x3161   :  { %v2823_v15 = vpop.permute.xlu1 %2822 }
0x3162   :  { %v2825_v16 = vadd.f32 %v2823_v15, %v2815_v14 }
0x3164   :  { %6901 = vtanh.f32 %v2825_v16 }
0x316e   :  { %v6902_v17 = vpop.eup %6901 }
0x316f   :  { %2828 = vrot.lane.b32.xlu0 %v6902_v17, %s7033_s0 }
0x31e1   :  { %v2829_v38 = vpop.permute.xlu0 %2828 }
0x31e2   :  { %v2831_v18 = vmul.f32 %v6900_v10, %v2829_v38 }
0x31e4   :  { %2833 = vrot.lane.b32.xlu1 %v2831_v18, %s7034_s14 }
0x3256   :  { %v2834_v20 = vpop.permute.xlu1 %2833 }
0x3257   :  { %2836 = vst.msk [vmem:[#allocation4 + $0x6] sm:$0x3] %vm471_vm3, %v2834_v20  ;;  %6254 = vmatmul.mubr.msk.f32.vlgmr.msra.gmra.mrb[28].mxu0 %vm158_vm1, %v2834_v20 }
0x3258   :  { %6459 = vmatpush3.bf16.msra.mxu0 %v7512_v28  ;;  %6267 = vmatprep.mubr.msk.f32.mxu0 %vm7028_vm0, %v7027_v1 }
0x3259   :  { %6463 = vmatprep.subr.bf16.mxu0 %v7030_v19 }
0x332a   :  { %v2906_v22 = vpop.f32.mrb[28].mxu0 }
0x332b   :  { %v2910_v23 = vadd.f32 %v2906_v22, %v2837_v21  ;;  %v6255_v12 = vpop.f32.mrb[29].mxu0 }
0x332d   :  { %v2911_v4 = vadd.f32 %v7556_v50, %v2910_v23 }
0x332f   :  { %6903 = vtanh.f32 %v2911_v4  ;;  %v5877_v25 = vmul.f32 -1.442695, %v2911_v4 }
0x3331   :  { %6905 = vpow2.f32 %v5877_v25 }
0x3339   :  { %v6904_v24 = vpop.eup %6903 }
0x333a   :  { %2921 = vrot.lane.b32.xlu0 %v6904_v24, %s7032_s25 }
0x333b   :  { %v6906_v26 = vpop.eup %6905 }
0x333c   :  { %v2915_v27 = vadd.f32 1.0, %v6906_v26 }
0x333e   :  { %6907 = vrcp.f32 %v2915_v27 }
0x3348   :  { %v6908_v29 = vpop.eup %6907 }
0x3349   :  { %v2919_v34 = vmul.f32 %v6908_v29, %v2825_v16 }
0x33ac   :  { %v2922_v30 = vpop.permute.xlu0 %2921 }
0x33ad   :  { %v2924_v33 = vmul.f32 %v6908_v29, %v2922_v30 }
0x33af   :  { %2926 = vrot.lane.b32.xlu1 %v2924_v33, %s7025_s3 }
0x3421   :  { %v2927_v35 = vpop.permute.xlu1 %2926 }
0x3422   :  { %v2929_v37 = vadd.f32 %v2927_v35, %v2919_v34 }
0x3424   :  { %6909 = vtanh.f32 %v2929_v37 }
0x342e   :  { %v6910_v39 = vpop.eup %6909 }
0x342f   :  { %2932 = vrot.lane.b32.xlu0 %v6910_v39, %s7033_s0 }
0x34a1   :  { %v2933_v40 = vpop.permute.xlu0 %2932 }
0x34a2   :  { %v2935_v41 = vmul.f32 %v6908_v29, %v2933_v40 }
0x34a4   :  { %2937 = vrot.lane.b32.xlu1 %v2935_v41, %s7034_s14 }
0x3516   :  { %v2938_v42 = vpop.permute.xlu1 %2937 }
0x3517   :  { %2940 = vst.msk [vmem:[#allocation4 + $0x8] sm:$0x3] %vm471_vm3, %v2938_v42  ;;  %6261 = vmatmul.mubr.msk.f32.vlgmr.msra.gmra.mrb[28].mxu1 %vm158_vm1, %v2938_v42 }
0x3518   :  { %6462 = vmatpush3.bf16.msra.mxu1 %v7512_v28  ;;  %6274 = vmatprep.mubr.msk.f32.mxu1 %vm7028_vm0, %v7027_v1 }
0x3519   :  { %6466 = vmatprep.subr.bf16.mxu1 %v7030_v19 }
0x35ea   :  { %v3010_v44 = vpop.f32.mrb[28].mxu1 }
0x35eb   :  { %v3014_v45 = vadd.f32 %v3010_v44, %v2941_v43  ;;  %v6262_v46 = vpop.f32.mrb[29].mxu1 }
0x35ed   :  { %v3015_v47 = vadd.f32 %v7556_v50, %v3014_v45 }
0x35ef   :  { %6911 = vtanh.f32 %v3015_v47  ;;  %v5879_v49 = vmul.f32 -1.442695, %v3015_v47  ;;  %v3366_v47 = vld [vmem:[#allocation3 + $0xc] sm:$0x3] }
0x35f1   :  { %6913 = vpow2.f32 %v5879_v49 }
0x35f9   :  { %v6912_v48 = vpop.eup %6911 }
0x35fa   :  { %3025 = vrot.lane.b32.xlu0 %v6912_v48, %s7032_s25 }
0x35fb   :  { %v6914_v51 = vpop.eup %6913 }
0x35fc   :  { %v3019_v52 = vadd.f32 1.0, %v6914_v51 }
0x35fe   :  { %6915 = vrcp.f32 %v3019_v52 }
0x3608   :  { %v6916_v28 = vpop.eup %6915 }
0x3609   :  { %v3023_v56 = vmul.f32 %v6916_v28, %v2929_v37 }
0x366c   :  { %v3026_v54 = vpop.permute.xlu0 %3025 }
0x366d   :  { %v3028_v55 = vmul.f32 %v6916_v28, %v3026_v54 }
0x366f   :  { %3030 = vrot.lane.b32.xlu1 %v3028_v55, %s7025_s3 }
0x36e1   :  { %v3031_v31 = vpop.permute.xlu1 %3030 }
0x36e2   :  { %v3033_v57 = vadd.f32 %v3031_v31, %v3023_v56 }
0x36e4   :  { %6917 = vtanh.f32 %v3033_v57 }
0x36ee   :  { %v6918_v58 = vpop.eup %6917 }
0x36ef   :  { %3036 = vrot.lane.b32.xlu0 %v6918_v58, %s7033_s0 }
0x3761   :  { %v3037_v59 = vpop.permute.xlu0 %3036 }
0x3762   :  { %v3039_v60 = vmul.f32 %v6916_v28, %v3037_v59 }
0x3764   :  { %3041 = vrot.lane.b32.xlu1 %v3039_v60, %s7034_s14 }
0x37d6   :  { %v3042_v53 = vpop.permute.xlu1 %3041 }
0x37d7   :  { %3044 = vst.msk [vmem:[#allocation4 + $0xa] sm:$0x3] %vm471_vm3, %v3042_v53  ;;  %6268 = vmatmul.mubr.msk.f32.vlgmr.msra.gmra.mrb[30].mxu0 %vm158_vm1, %v3042_v53 }
0x37d8   :  { %6465 = vmatpush3.bf16.msra.mxu0 %v7624_v63  ;;  %6281 = vmatprep.mubr.msk.f32.mxu0 %vm7028_vm0, %v7027_v1 }
0x37d9   :  { %6469 = vmatprep.subr.bf16.mxu0 %v7030_v19 }
0x37db   :  { %6282 = vmatmul.mubr.f32.vlgmr.msra.gmra.mrb[32].mxu0 %v7027_v1 }
0x37dc   :  { %6471 = vmatpush3.bf16.msra.mxu0 %v7624_v63  ;;  %6295 = vmatprep.mubr.msk.f32.mxu0 %vm7028_vm0, %v7027_v1 }
0x37dd   :  { %6475 = vmatprep.subr.bf16.mxu0 %v7030_v19 }
0x38aa   :  { %v3114_v2 = vpop.f32.mrb[30].mxu0 }
0x38ab   :  { %v3118_v3 = vadd.f32 %v3114_v2, %v3045_v0  ;;  %v6269_v5 = vpop.f32.mrb[31].mxu0 }
0x38ad   :  { %v3119_v6 = vadd.f32 %v7556_v50, %v3118_v3  ;;  %v3470_v3 = vld [vmem:[#allocation3 + $0xa] sm:$0x3] }
0x38ae   :  { %v3325_v10 = vpop.f32.mrb[32].mxu0 }
0x38af   :  { %6919 = vtanh.f32 %v3119_v6  ;;  %v3329_v11 = vadd.f32 %v3325_v10, %v3258_v9  ;;  %v6283_v13 = vpop.f32.mrb[33].mxu0  ;;  %v5881_v50 = vmul.f32 -1.442695, %v3119_v6 }
0x38b1   :  { %v3336_v14 = vadd.f32 %v7641_v8, %v3329_v11 }
0x38b3   :  { %6921 = vtanh.f32 %v3336_v14  ;;  %v5888_v17 = vmul.f32 -1.442695, %v3336_v14 }
0x38b4   :  { %6923 = vpow2.f32 %v5881_v50 }
0x38b5   :  { %6925 = vpow2.f32 %v5888_v17 }
0x38b9   :  { %v6920_v15 = vpop.eup %6919 }
0x38ba   :  { %3129 = vrot.lane.b32.xlu0 %v6920_v15, %s7032_s25 }
0x38bd   :  { %v6922_v16 = vpop.eup %6921 }
0x38be   :  { %3346 = vrot.lane.b32.xlu1 %v6922_v16, %s7032_s25  ;;  %v6924_v38 = vpop.eup %6923 }
0x38bf   :  { %v3123_v18 = vadd.f32 1.0, %v6924_v38  ;;  %v6926_v20 = vpop.eup %6925 }
0x38c0   :  { %v3340_v21 = vadd.f32 1.0, %v6926_v20 }
0x38c1   :  { %6927 = vrcp.f32 %v3123_v18 }
0x38c2   :  { %6929 = vrcp.f32 %v3340_v21 }
0x38cb   :  { %v6928_v22 = vpop.eup %6927 }
0x38cc   :  { %v6930_v4 = vpop.eup %6929  ;;  %v3127_v26 = vmul.f32 %v6928_v22, %v3033_v57 }
0x38cd   :  { %v3344_v30 = vmul.f32 0.0, %v6930_v4 }
0x392c   :  { %v3130_v23 = vpop.permute.xlu0 %3129 }
0x392d   :  { %v3132_v12 = vmul.f32 %v6928_v22, %v3130_v23 }
0x392f   :  { %3134 = vrot.lane.b32.xlu0 %v3132_v12, %s7025_s3 }
0x3930   :  { %v3347_v24 = vpop.permute.xlu1 %3346 }
0x3931   :  { %v3349_v25 = vmul.f32 %v6930_v4, %v3347_v24 }
0x3933   :  { %3351 = vrot.lane.b32.xlu1 %v3349_v25, %s7025_s3 }
0x39a1   :  { %v3135_v27 = vpop.permute.xlu0 %3134 }
0x39a2   :  { %v7648_v29 = vadd.f32 %v3135_v27, %v3127_v26 }
0x39a4   :  { %6931 = vtanh.f32 %v7648_v29 }
0x39a5   :  { %v3352_v33 = vpop.permute.xlu1 %3351 }
0x39a6   :  { %v3354_v34 = vadd.f32 %v3352_v33, %v3344_v30 }
0x39a8   :  { %6933 = vtanh.f32 %v3354_v34 }
0x39ae   :  { %v6932_v35 = vpop.eup %6931 }
0x39af   :  { %3140 = vrot.lane.b32.xlu0 %v6932_v35, %s7033_s0 }
0x39b2   :  { %v6934_v37 = vpop.eup %6933 }
0x39b3   :  { %3357 = vrot.lane.b32.xlu1 %v6934_v37, %s7033_s0 }
0x3a21   :  { %v3141_v39 = vpop.permute.xlu0 %3140 }
0x3a22   :  { %v3143_v40 = vmul.f32 %v6928_v22, %v3141_v39 }
0x3a24   :  { %3145 = vrot.lane.b32.xlu0 %v3143_v40, %s7034_s14 }
0x3a25   :  { %v3358_v41 = vpop.permute.xlu1 %3357 }
0x3a26   :  { %v3360_v42 = vmul.f32 %v6930_v4, %v3358_v41  ;;  %v3574_v4 = vld [vmem:[#allocation3 + $0x8] sm:$0x3] }
0x3a28   :  { %3362 = vrot.lane.b32.xlu1 %v3360_v42, %s7034_s14 }
0x3a96   :  { %v3146_v43 = vpop.permute.xlu0 %3145 }
0x3a97   :  { %3148 = vst.msk [vmem:[#allocation4 + $0xc] sm:$0x3] %vm471_vm3, %v3146_v43  ;;  %6275 = vmatmul.mubr.msk.f32.vlgmr.msra.gmra.mrb[30].mxu1 %vm158_vm1, %v3146_v43 }
0x3a98   :  { %6468 = vmatpush3.bf16.msra.mxu1 %v7624_v63  ;;  %6288 = vmatprep.mubr.msk.f32.mxu1 %vm7028_vm0, %v7027_v1 }
0x3a99   :  { %6472 = vmatprep.subr.bf16.mxu1 %v7030_v19 }
0x3a9a   :  { %v3363_v44 = vpop.permute.xlu1 %3362 }
0x3a9b   :  { %3365 = vst.msk [vmem:[#allocation5 + $0xe] sm:$0x3] %vm471_vm3, %v3363_v44  ;;  %6289 = vmatmul.mubr.msk.f32.vlgmr.msra.gmra.mrb[32].mxu1 %vm158_vm1, %v3363_v44 }
0x3a9c   :  { %6474 = vmatpush3.bf16.msra.mxu1 %v7624_v63  ;;  %6302 = vmatprep.mubr.msk.f32.mxu1 %vm7028_vm0, %v7027_v1 }
0x3a9d   :  { %6478 = vmatprep.subr.bf16.mxu1 %v7030_v19 }
0x3b6a   :  { %v7667_v45 = vpop.f32.mrb[30].mxu1 }
0x3b6b   :  { %v6276_v46 = vpop.f32.mrb[31].mxu1 }
0x3b6e   :  { %v3435_v48 = vpop.f32.mrb[32].mxu1 }
0x3b6f   :  { %v3439_v49 = vadd.f32 %v3435_v48, %v3366_v47  ;;  %v6290_v51 = vpop.f32.mrb[33].mxu1  ;;  %v3678_v48 = vld [vmem:[#allocation3 + $0x6] sm:$0x3] }
0x3b71   :  { %v3440_v52 = vadd.f32 %v7641_v8, %v3439_v49 }
0x3b73   :  { %6935 = vtanh.f32 %v3440_v52  ;;  %v5890_v54 = vmul.f32 -1.442695, %v3440_v52 }
0x3b75   :  { %6937 = vpow2.f32 %v5890_v54 }
0x3b7d   :  { %v6936_v28 = vpop.eup %6935 }
0x3b7e   :  { %3450 = vrot.lane.b32.xlu0 %v6936_v28, %s7032_s25 }
0x3b7f   :  { %v6938_v55 = vpop.eup %6937 }
0x3b80   :  { %v3444_v56 = vadd.f32 1.0, %v6938_v55 }
0x3b82   :  { %6939 = vrcp.f32 %v3444_v56 }
0x3b8c   :  { %v6940_v31 = vpop.eup %6939 }
0x3b8d   :  { %v3448_v59 = vmul.f32 %v6940_v31, %v3354_v34 }
0x3bf0   :  { %v3451_v57 = vpop.permute.xlu0 %3450 }
0x3bf1   :  { %v3453_v58 = vmul.f32 %v6940_v31, %v3451_v57 }
0x3bf3   :  { %3455 = vrot.lane.b32.xlu1 %v3453_v58, %s7025_s3 }
0x3c65   :  { %v3456_v60 = vpop.permute.xlu1 %3455 }
0x3c66   :  { %v3458_v61 = vadd.f32 %v3456_v60, %v3448_v59 }
0x3c68   :  { %6941 = vtanh.f32 %v3458_v61 }
0x3c72   :  { %v6942_v62 = vpop.eup %6941 }
0x3c73   :  { %3461 = vrot.lane.b32.xlu0 %v6942_v62, %s7033_s0 }
0x3ce5   :  { %v3462_v53 = vpop.permute.xlu0 %3461 }
0x3ce6   :  { %v3464_v0 = vmul.f32 %v6940_v31, %v3462_v53 }
0x3ce8   :  { %3466 = vrot.lane.b32.xlu1 %v3464_v0, %s7034_s14 }
0x3d5a   :  { %v3467_v2 = vpop.permute.xlu1 %3466 }
0x3d5b   :  { %3469 = vst.msk [vmem:[#allocation5 + $0xc] sm:$0x3] %vm471_vm3, %v3467_v2  ;;  %6296 = vmatmul.mubr.msk.f32.vlgmr.msra.gmra.mrb[34].mxu0 %vm158_vm1, %v3467_v2 }
0x3d5c   :  { %6477 = vmatpush3.bf16.msra.mxu0 %v7624_v63  ;;  %6309 = vmatprep.mubr.msk.f32.mxu0 %vm7028_vm0, %v7027_v1 }
0x3d5d   :  { %6481 = vmatprep.subr.bf16.mxu0 %v7030_v19 }
0x3e2e   :  { %v3539_v5 = vpop.f32.mrb[34].mxu0 }
0x3e2f   :  { %v3543_v6 = vadd.f32 %v3539_v5, %v3470_v3  ;;  %v6297_v9 = vpop.f32.mrb[35].mxu0  ;;  %v3782_v5 = vld [vmem:[#allocation3 + $0x4] sm:$0x3] }
0x3e31   :  { %v3544_v10 = vadd.f32 %v7641_v8, %v3543_v6 }
0x3e33   :  { %6943 = vtanh.f32 %v3544_v10  ;;  %v5892_v13 = vmul.f32 -1.442695, %v3544_v10 }
0x3e35   :  { %6945 = vpow2.f32 %v5892_v13 }
0x3e3d   :  { %v6944_v11 = vpop.eup %6943 }
0x3e3e   :  { %3554 = vrot.lane.b32.xlu0 %v6944_v11, %s7032_s25 }
0x3e3f   :  { %v6946_v14 = vpop.eup %6945 }
0x3e40   :  { %v3548_v15 = vadd.f32 1.0, %v6946_v14 }
0x3e42   :  { %6947 = vrcp.f32 %v3548_v15 }
0x3e4c   :  { %v6948_v16 = vpop.eup %6947 }
0x3e4d   :  { %v3552_v38 = vmul.f32 %v6948_v16, %v3458_v61 }
0x3eb0   :  { %v3555_v50 = vpop.permute.xlu0 %3554 }
0x3eb1   :  { %v3557_v17 = vmul.f32 %v6948_v16, %v3555_v50 }
0x3eb3   :  { %3559 = vrot.lane.b32.xlu1 %v3557_v17, %s7025_s3 }
0x3f25   :  { %v3560_v18 = vpop.permute.xlu1 %3559 }
0x3f26   :  { %v3562_v20 = vadd.f32 %v3560_v18, %v3552_v38 }
0x3f28   :  { %6949 = vtanh.f32 %v3562_v20 }
0x3f32   :  { %v6950_v21 = vpop.eup %6949 }
0x3f33   :  { %3565 = vrot.lane.b32.xlu0 %v6950_v21, %s7033_s0 }
0x3fa5   :  { %v3566_v22 = vpop.permute.xlu0 %3565 }
0x3fa6   :  { %v3568_v23 = vmul.f32 %v6948_v16, %v3566_v22 }
0x3fa8   :  { %3570 = vrot.lane.b32.xlu1 %v3568_v23, %s7034_s14 }
0x401a   :  { %v3571_v12 = vpop.permute.xlu1 %3570 }
0x401b   :  { %3573 = vst.msk [vmem:[#allocation5 + $0xa] sm:$0x3] %vm471_vm3, %v3571_v12  ;;  %6303 = vmatmul.mubr.msk.f32.vlgmr.msra.gmra.mrb[34].mxu1 %vm158_vm1, %v3571_v12 }
0x401c   :  { %6480 = vmatpush3.bf16.msra.mxu1 %v7624_v63  ;;  %6316 = vmatprep.mubr.msk.f32.mxu1 %vm7028_vm0, %v7027_v1 }
0x401d   :  { %6484 = vmatprep.subr.bf16.mxu1 %v7030_v19 }
0x40ee   :  { %v3643_v24 = vpop.f32.mrb[34].mxu1 }
0x40ef   :  { %v3647_v25 = vadd.f32 %v3643_v24, %v3574_v4  ;;  %v6304_v26 = vpop.f32.mrb[35].mxu1  ;;  %v6726_v4 = vld [vmem:[%s8199_s7] sm:$0xff]   ;;  %v3886_v24 = vld [vmem:[#allocation3 + $0x2] sm:$0x3] }
0x40f1   :  { %v3648_v27 = vadd.f32 %v7641_v8, %v3647_v25 }
0x40f3   :  { %6951 = vtanh.f32 %v3648_v27  ;;  %v5894_v33 = vmul.f32 -1.442695, %v3648_v27 }
0x40f5   :  { %6953 = vpow2.f32 %v5894_v33 }
0x40fd   :  { %v6952_v30 = vpop.eup %6951 }
0x40fe   :  { %3658 = vrot.lane.b32.xlu0 %v6952_v30, %s7032_s25 }
0x40ff   :  { %v6954_v34 = vpop.eup %6953 }
0x4100   :  { %v3652_v35 = vadd.f32 1.0, %v6954_v34  ;;  %v5903_v34 = vld [vmem:[%s8200_s8] ss:$0 sm:$0xff] }
0x4102   :  { %6955 = vrcp.f32 %v3652_v35  ;;  %v4164_v35 = vcombine.low %v5903_v34, %v5903_v34 }
0x410c   :  { %v6956_v37 = vpop.eup %6955 }
0x410d   :  { %v3656_v19 = vmul.f32 %v6956_v37, %v3562_v20 }
0x4170   :  { %v3659_v39 = vpop.permute.xlu0 %3658 }
0x4171   :  { %v3661_v40 = vmul.f32 %v6956_v37, %v3659_v39 }
0x4173   :  { %3663 = vrot.lane.b32.xlu1 %v3661_v40, %s7025_s3 }
0x41e5   :  { %v3664_v41 = vpop.permute.xlu1 %3663 }
0x41e6   :  { %v3666_v42 = vadd.f32 %v3664_v41, %v3656_v19 }
0x41e8   :  { %6957 = vtanh.f32 %v3666_v42 }
0x41f2   :  { %v6958_v43 = vpop.eup %6957 }
0x41f3   :  { %3669 = vrot.lane.b32.xlu0 %v6958_v43, %s7033_s0 }
0x4265   :  { %v3670_v44 = vpop.permute.xlu0 %3669 }
0x4266   :  { %v3672_v46 = vmul.f32 %v6956_v37, %v3670_v44 }
0x4268   :  { %3674 = vrot.lane.b32.xlu1 %v3672_v46, %s7034_s14 }
0x42da   :  { %v3675_v47 = vpop.permute.xlu1 %3674 }
0x42db   :  { %3677 = vst.msk [vmem:[#allocation5 + $0x8] sm:$0x3] %vm471_vm3, %v3675_v47  ;;  %6310 = vmatmul.mubr.msk.f32.vlgmr.msra.gmra.mrb[36].mxu0 %vm158_vm1, %v3675_v47 }
0x42dc   :  { %6483 = vmatpush3.bf16.msra.mxu0 %v7624_v63  ;;  %6323 = vmatprep.mubr.msk.f32.mxu0 %vm7028_vm0, %v7027_v1 }
0x42dd   :  { %6333 = vmatprep.subr.bf16.mxu0 %v7027_v1 }
0x43ae   :  { %v3747_v49 = vpop.f32.mrb[36].mxu0 }
0x43af   :  { %v3751_v51 = vadd.f32 %v3747_v49, %v3678_v48  ;;  %v6311_v52 = vpop.f32.mrb[37].mxu0 }
0x43b1   :  { %v3752_v28 = vadd.f32 %v7641_v8, %v3751_v51 }
0x43b3   :  { %6959 = vtanh.f32 %v3752_v28  ;;  %v5896_v55 = vmul.f32 -1.442695, %v3752_v28 }
0x43b5   :  { %6961 = vpow2.f32 %v5896_v55 }
0x43bd   :  { %v6960_v54 = vpop.eup %6959 }
0x43be   :  { %3762 = vrot.lane.b32.xlu0 %v6960_v54, %s7032_s25 }
0x43bf   :  { %v6962_v56 = vpop.eup %6961 }
0x43c0   :  { %v3756_v31 = vadd.f32 1.0, %v6962_v56 }
0x43c2   :  { %6963 = vrcp.f32 %v3756_v31 }
0x43cc   :  { %v6964_v57 = vpop.eup %6963 }
0x43cd   :  { %v3760_v60 = vmul.f32 %v6964_v57, %v3666_v42 }
0x4430   :  { %v3763_v58 = vpop.permute.xlu0 %3762 }
0x4431   :  { %v3765_v59 = vmul.f32 %v6964_v57, %v3763_v58 }
0x4433   :  { %3767 = vrot.lane.b32.xlu1 %v3765_v59, %s7025_s3 }
0x44a5   :  { %v3768_v61 = vpop.permute.xlu1 %3767 }
0x44a6   :  { %v3770_v62 = vadd.f32 %v3768_v61, %v3760_v60 }
0x44a8   :  { %6965 = vtanh.f32 %v3770_v62 }
0x44b2   :  { %v6966_v53 = vpop.eup %6965 }
0x44b3   :  { %3773 = vrot.lane.b32.xlu0 %v6966_v53, %s7033_s0 }
0x4525   :  { %v3774_v0 = vpop.permute.xlu0 %3773 }
0x4526   :  { %v3776_v2 = vmul.f32 %v6964_v57, %v3774_v0 }
0x4528   :  { %3778 = vrot.lane.b32.xlu1 %v3776_v2, %s7034_s14 }
0x459a   :  { %v3779_v3 = vpop.permute.xlu1 %3778 }
0x459b   :  { %3781 = vst.msk [vmem:[#allocation5 + $0x6] sm:$0x3] %vm471_vm3, %v3779_v3  ;;  %6317 = vmatmul.mubr.msk.f32.vlgmr.msra.gmra.mrb[36].mxu1 %vm158_vm1, %v3779_v3 }
0x459c   :  { %6486 = vmatpush3.bf16.msra.mxu1 %v7624_v63  ;;  %6330 = vmatprep.mubr.msk.f32.mxu1 %vm7028_vm0, %v7027_v1 }
0x459d   :  { %6339 = vmatprep.subr.bf16.mxu1 %v7027_v1 }
0x466e   :  { %v3851_v6 = vpop.f32.mrb[36].mxu1 }
0x466f   :  { %v3855_v9 = vadd.f32 %v3851_v6, %v3782_v5  ;;  %v6318_v10 = vpop.f32.mrb[37].mxu1 }
0x4671   :  { %v3856_v11 = vadd.f32 %v7641_v8, %v3855_v9 }
0x4673   :  { %6967 = vtanh.f32 %v3856_v11  ;;  %v5898_v14 = vmul.f32 -1.442695, %v3856_v11 }
0x4675   :  { %6969 = vpow2.f32 %v5898_v14 }
0x467d   :  { %v6968_v13 = vpop.eup %6967 }
0x467e   :  { %3866 = vrot.lane.b32.xlu0 %v6968_v13, %s7032_s25 }
0x467f   :  { %v6970_v15 = vpop.eup %6969 }
0x4680   :  { %v3860_v16 = vadd.f32 1.0, %v6970_v15 }
0x4682   :  { %6971 = vrcp.f32 %v3860_v16 }
0x468c   :  { %v6972_v63 = vpop.eup %6971 }
0x468d   :  { %v3864_v38 = vmul.f32 %v6972_v63, %v3770_v62 }
0x46f0   :  { %v3867_v50 = vpop.permute.xlu0 %3866 }
0x46f1   :  { %v3869_v17 = vmul.f32 %v6972_v63, %v3867_v50 }
0x46f3   :  { %3871 = vrot.lane.b32.xlu1 %v3869_v17, %s7025_s3 }
0x4765   :  { %v3872_v18 = vpop.permute.xlu1 %3871 }
0x4766   :  { %v7716_v20 = vadd.f32 %v3872_v18, %v3864_v38  ;;  %v4289_v38 = vld [vmem:[#allocation6 + $0x2] sm:$0x3] }
0x4767   :  { %4597 = vst.msk [vmem:[#allocation6 + $0x2] sm:$0x3] %vm471_vm3, %v7027_v1 }
0x4768   :  { %6973 = vtanh.f32 %v7716_v20 }
0x4772   :  { %v6974_v21 = vpop.eup %6973 }
0x4773   :  { %3877 = vrot.lane.b32.xlu0 %v6974_v21, %s7033_s0 }
0x47e5   :  { %v3878_v22 = vpop.permute.xlu0 %3877 }
0x47e6   :  { %v3880_v23 = vmul.f32 %v6972_v63, %v3878_v22 }
0x47e8   :  { %3882 = vrot.lane.b32.xlu1 %v3880_v23, %s7034_s14 }
0x485a   :  { %v3883_v12 = vpop.permute.xlu1 %3882 }
0x485b   :  { %3885 = vst.msk [vmem:[#allocation5 + $0x4] sm:$0x3] %vm471_vm3, %v3883_v12  ;;  %6324 = vmatmul.mubr.msk.f32.vlgmr.msra.gmra.mrb[38].mxu0 %vm158_vm1, %v3883_v12 }
0x485c   :  { %6335 = vmatprep.mubr.msk.bf16.mxu0 %vm7028_vm0, %v7027_v1  ;;  %6334 = vmatpush3.bf16.msra.mxu0 %v6726_v4 }
0x485d   :  { %6349 = vmatprep.subr.bf16.mxu0 %v7027_v1 }
0x485f   :  { %6336 = vmatmul.mubr.msk.bf16.vlgmr.msra.gmra.mrb[40].mxu0 %vm158_vm1, %v7201_v32  ;;  %v4171_v32 = vrot.slane %v4164_v35, %v7214_v36 }
0x4860   :  { %6355 = vmatprep.mubr.msk.bf16.mxu0 %vm7028_vm0, %v7027_v1 }
0x4861   :  { %v4172_v37 = vcombine.low %v4171_v32, %v4171_v32 }
0x492e   :  { %v3955_v25 = vpop.f32.mrb[38].mxu0 }
0x492f   :  { %v3959_v26 = vadd.f32 %v3955_v25, %v3886_v24  ;;  %v6325_v27 = vpop.f32.mrb[39].mxu0 }
0x4931   :  { %v3960_v30 = vadd.f32 %v7641_v8, %v3959_v26 }
0x4932   :  { %v4208_v39 = vpop.f32.mrb[40].mxu0 }
0x4933   :  { %6975 = vtanh.f32 %v3960_v30  ;;  %v4209_v40 = vadd.f32 %v4208_v39, %v4172_v37  ;;  %v6337_v19 = vpop.f32.mrb[41].mxu0  ;;  %v5900_v41 = vmul.f32 -1.442695, %v3960_v30 }
0x4934   :  { %v4211_v42 = vpop.f32.mrb[42].mxu0 }
0x4935   :  { %v4217_v43 = vcombine.high %v4209_v40, %v4209_v40  ;;  %v4224_v44 = vrot.slane %v4209_v40, %v7214_v36  ;;  %v4212_v46 = vadd.f32 %v4211_v42, %v4172_v37  ;;  %v6338_v47 = vpop.f32.mrb[43].mxu0  ;;  %6977 = vpow2.f32 %v5900_v41  ;;  %v4313_v37 = vld [vmem:[#allocation6 + $0x14] sm:$0x3] }
0x4936   :  { %4606 = vst.msk [vmem:[#allocation6 + $0x14] sm:$0x3] %vm471_vm3, %v7027_v1 }
0x4937   :  { %v4231_v48 = vrot.slane %v4217_v43, %v7214_v36  ;;  %v4232_v49 = vcombine.high %v4224_v44, %v4224_v44  ;;  %v4259_v51 = vmax.f32 %v4224_v44, 0.0  ;;  %v4234_v52 = vcombine.high %v4212_v46, %v4212_v46 }
0x4938   :  { %v4241_v28 = vrot.slane %v4212_v46, %v7214_v36 }
0x4939   :  { %v4233_v54 = vcombine.high %v4231_v48, %v4231_v48  ;;  %v4260_v55 = vmax.f32 %v4232_v49, 0.0  ;;  %v4261_v56 = vmax.f32 %v4231_v48, 0.0  ;;  %4280 = vst.msk [vmem:[#allocation6 + $0x4] sm:$0x3] %vm471_vm3, %v4259_v51  ;;  %v4248_v31 = vrot.slane %v4234_v52, %v7214_v36 }
0x493a   :  { %v4249_v57 = vcombine.high %v4241_v28, %v4241_v28  ;;  %v4263_v58 = vmax.f32 %v4241_v28, 0.0 }
0x493b   :  { %v4262_v59 = vmax.f32 %v4233_v54, 0.0  ;;  %4281 = vst.msk [vmem:[#allocation6 + $0x6] sm:$0x3] %vm471_vm3, %v4260_v55  ;;  %4282 = vst.msk [vmem:[#allocation6 + $0x8] sm:$0x3] %vm471_vm3, %v4261_v56  ;;  %v4250_v60 = vcombine.high %v4248_v31, %v4248_v31  ;;  %v4265_v61 = vmax.f32 %v4248_v31, 0.0 }
0x493c   :  { %v4264_v62 = vmax.f32 %v4249_v57, 0.0  ;;  %4284 = vst.msk [vmem:[#allocation6 + $0xc] sm:$0x3] %vm471_vm3, %v4263_v58 }
0x493d   :  { %v6976_v33 = vpop.eup %6975  ;;  %4283 = vst.msk [vmem:[#allocation6 + $0xa] sm:$0x3] %vm471_vm3, %v4262_v59  ;;  %v4266_v53 = vmax.f32 %v4250_v60, 0.0  ;;  %4286 = vst.msk [vmem:[#allocation6 + $0x10] sm:$0x3] %vm471_vm3, %v4265_v61 }
0x493e   :  { %3970 = vrot.lane.b32.xlu0 %v6976_v33, %s7032_s25  ;;  %4285 = vst.msk [vmem:[#allocation6 + $0xe] sm:$0x3] %vm471_vm3, %v4264_v62 }
0x493f   :  { %4287 = vst.msk [vmem:[#allocation6 + $0x12] sm:$0x3] %vm471_vm3, %v4266_v53  ;;  %v6978_v0 = vpop.eup %6977 }
0x4940   :  { %v3964_v2 = vadd.f32 1.0, %v6978_v0  ;;  %v4297_v6 = vld [vmem:[#allocation6 + $0x4] sm:$0x3] }
0x4941   :  { %v7755_v18 = vld [vmem:[#allocation6 + $0x4] sm:$0x3] }
0x4942   :  { %6979 = vrcp.f32 %v3964_v2  ;;  %v4298_v9 = vld [vmem:[#allocation6 + $0x6] sm:$0x3]  ;;  %4598 = vst.msk [vmem:[#allocation6 + $0x4] sm:$0x3] %vm471_vm3, %v7027_v1  ;;  %v4299_v23 = vld [vmem:[#allocation6 + $0x8] sm:$0x3] }
0x4943   :  { %v6520_v11 = vpack.i.bf16 %v4298_v9, %v4297_v6  ;;  %v4301_v13 = vld [vmem:[#allocation6 + $0xc] sm:$0x3]  ;;  %v4306_v12 = vld [vmem:[#allocation6 + $0x6] sm:$0x3]  ;;  %v4307_v4 = vld [vmem:[#allocation6 + $0x8] sm:$0x3] }
0x4944   :  { %v4308_v16 = vld [vmem:[#allocation6 + $0xa] sm:$0x3]  ;;  %v4309_v63 = vld [vmem:[#allocation6 + $0xc] sm:$0x3]  ;;  %v4291_v25 = vld [vmem:[#allocation6 + $0x6] sm:$0x3]  ;;  %v6540_v44 = vpack.i.bf16 %v4307_v4, %v4306_v12 }
0x4945   :  { %v4302_v14 = vld [vmem:[#allocation6 + $0xe] sm:$0x3]  ;;  %v6545_v50 = vpack.i.bf16 %v4309_v63, %v4308_v16  ;;  %v4300_v17 = vld [vmem:[#allocation6 + $0xa] sm:$0x3]  ;;  %v7763_v22 = vld [vmem:[#allocation6 + $0xc] sm:$0x3] }
0x4946   :  { %v6530_v15 = vpack.i.bf16 %v4302_v14, %v4301_v13  ;;  %v7757_v21 = vld [vmem:[#allocation6 + $0xa] sm:$0x3]  ;;  %4602 = vst.msk [vmem:[#allocation6 + $0xc] sm:$0x3] %vm471_vm3, %v7027_v1  ;;  %v4310_v24 = vld [vmem:[#allocation6 + $0xe] sm:$0x3]  ;;  %v6525_v42 = vpack.i.bf16 %v4300_v17, %v4299_v23 }
0x4947   :  { %4601 = vst.msk [vmem:[#allocation6 + $0xa] sm:$0x3] %vm471_vm3, %v7027_v1  ;;  %v4292_v26 = vld [vmem:[#allocation6 + $0x8] sm:$0x3]  ;;  %v7769_v27 = vld [vmem:[#allocation6 + $0xe] sm:$0x3] }
0x4948   :  { %v4303_v30 = vld [vmem:[#allocation6 + $0x10] sm:$0x3]  ;;  %4599 = vst.msk [vmem:[#allocation6 + $0x6] sm:$0x3] %vm471_vm3, %v7027_v1  ;;  %4600 = vst.msk [vmem:[#allocation6 + $0x8] sm:$0x3] %vm471_vm3, %v7027_v1 }
0x4949   :  { %v4311_v33 = vld [vmem:[#allocation6 + $0x10] sm:$0x3]  ;;  %4603 = vst.msk [vmem:[#allocation6 + $0xe] sm:$0x3] %vm471_vm3, %v7027_v1  ;;  %v4304_v35 = vld [vmem:[#allocation6 + $0x12] sm:$0x3] }
0x494a   :  { %v7775_v34 = vld [vmem:[#allocation6 + $0x10] sm:$0x3]  ;;  %v4312_v32 = vld [vmem:[#allocation6 + $0x12] sm:$0x3]  ;;  %v6535_v43 = vpack.i.bf16 %v4304_v35, %v4303_v30  ;;  %v6550_v46 = vpack.i.bf16 %v4311_v33, %v4310_v24  ;;  %v6728_v4 = vld [vmem:[%s8201_s9 + $0x8] sm:$0xff]  }
0x494b   :  { %4604 = vst.msk [vmem:[#allocation6 + $0x10] sm:$0x3] %vm471_vm3, %v7027_v1  ;;  %4605 = vst.msk [vmem:[#allocation6 + $0x12] sm:$0x3] %vm471_vm3, %v7027_v1  ;;  %v6555_v48 = vpack.i.bf16 %v4313_v37, %v4312_v32 }
0x494c   :  { %v6980_v3 = vpop.eup %6979 }
0x494d   :  { %v3968_v39 = vmul.f32 %v6980_v3, %v7716_v20 }
0x49b0   :  { %v3971_v5 = vpop.permute.xlu0 %3970 }
0x49b1   :  { %v3973_v10 = vmul.f32 %v6980_v3, %v3971_v5 }
0x49b3   :  { %3975 = vrot.lane.b32.xlu1 %v3973_v10, %s7025_s3  ;;  %v6727_v10 = vld [vmem:[%s8201_s9] sm:$0xff]  }
0x49b7   :  { %6521 = vrot.lane.b32.xlu1 %v6520_v11, %s7025_s3 }
0x49bb   :  { %6531 = vrot.lane.b32.xlu1 %v6530_v15, %s7025_s3 }
0x49bf   :  { %6546 = vrot.lane.b32.xlu1 %v6545_v50, %s7033_s0 }
0x4a25   :  { %v3976_v40 = vpop.permute.xlu1 %3975 }
0x4a26   :  { %v7786_v19 = vadd.f32 %v3976_v40, %v3968_v39  ;;  %v6729_v39 = vld [vmem:[%s8201_s9 + $0x10] sm:$0xff]  }
0x4a28   :  { %6981 = vtanh.f32 %v7786_v19 }
0x4a29   :  { %v6522_v51 = vpop.permute.xlu1 %6521 }
0x4a2a   :  { %v6523_v55 = vunpack.i.l.bf16 %v6522_v51  ;;  %v6524_v56 = vunpack.i.h.bf16 %v6522_v51  ;;  %v7846_v51 = vld [vmem:[#allocation6 + $0x2] sm:$0x3] }
0x4a2b   :  { %4922 = vst.msk [vmem:[#allocation6 + $0x2] sm:$0x3] %vm471_vm3, %v7027_v1 }
0x4a2c   :  { %v4378_v61 = vsel %vm158_vm1, %v4289_v38, %v6523_v55 }
0x4a2d   :  { %v6532_v28 = vpop.permute.xlu1 %6531 }
0x4a2e   :  { %v6534_v53 = vunpack.i.h.bf16 %v6532_v28  ;;  %v6533_v5 = vunpack.i.l.bf16 %v6532_v28 }
0x4a30   :  { %v4383_v63 = vsel %vm158_vm1, %v7763_v22, %v6534_v53  ;;  %v4382_v38 = vsel %vm158_vm1, %v7757_v21, %v6533_v5 }
0x4a31   :  { %v6547_v58 = vpop.permute.xlu1 %6546 }
0x4a32   :  { %v6982_v41 = vpop.eup %6981  ;;  %v6549_v0 = vunpack.i.h.bf16 %v6547_v58  ;;  %v6548_v2 = vunpack.i.l.bf16 %v6547_v58 }
0x4a33   :  { %3981 = vrot.lane.b32.xlu0 %v6982_v41, %s7033_s0 }
0x4a37   :  { %6526 = vrot.lane.b32.xlu0 %v6525_v42, %s7025_s3 }
0x4a3b   :  { %6536 = vrot.lane.b32.xlu0 %v6535_v43, %s7025_s3 }
0x4a3f   :  { %6541 = vrot.lane.b32.xlu0 %v6540_v44, %s7033_s0 }
0x4a43   :  { %6551 = vrot.lane.b32.xlu0 %v6550_v46, %s7033_s0 }
0x4aa5   :  { %v3982_v20 = vpop.permute.xlu0 %3981 }
0x4aa6   :  { %v3984_v47 = vmul.f32 %v6980_v3, %v3982_v20  ;;  %v4379_v3 = vsel %vm158_vm1, %v7755_v18, %v6524_v56 }
0x4aa8   :  { %3986 = vrot.lane.b32.xlu1 %v3984_v47, %s7034_s14 }
0x4aa9   :  { %v6527_v49 = vpop.permute.xlu0 %6526 }
0x4aaa   :  { %v6529_v31 = vunpack.i.h.bf16 %v6527_v49  ;;  %v6528_v57 = vunpack.i.l.bf16 %v6527_v49  ;;  %v7842_v49 = vld [vmem:[#allocation6 + $0x14] sm:$0x3] }
0x4aab   :  { %4931 = vst.msk [vmem:[#allocation6 + $0x14] sm:$0x3] %vm471_vm3, %v7027_v1 }
0x4aac   :  { %6556 = vrot.lane.b32.xlu1 %v6555_v48, %s7033_s0  ;;  %v4381_v6 = vsel %vm158_vm1, %v4292_v26, %v6529_v31  ;;  %v4380_v9 = vsel %vm158_vm1, %v4291_v25, %v6528_v57 }
0x4aad   :  { %v6537_v52 = vpop.permute.xlu0 %6536  ;;  %v4389_v50 = vsel %vm2207_vm4, %v4381_v6, %v6549_v0  ;;  %v4388_v17 = vsel %vm2207_vm4, %v4380_v9, %v6548_v2 }
0x4aae   :  { %v6539_v18 = vunpack.i.h.bf16 %v6537_v52  ;;  %v6538_v23 = vunpack.i.l.bf16 %v6537_v52  ;;  %v5908_v25 = vpack.c.bf16 %v4389_v50, %v4388_v17 }
0x4ab0   :  { %v4385_v33 = vsel %vm158_vm1, %v7775_v34, %v6539_v18  ;;  %v4384_v35 = vsel %vm158_vm1, %v7769_v27, %v6538_v23  ;;  %v4439_v42 = vrot.slane %v5908_v25, %v7160_v7  ;;  %v3149_v25 = vld [vmem:[#allocation2 + $0xe] sm:$0x3] }
0x4ab1   :  { %v6542_v54 = vpop.permute.xlu0 %6541 }
0x4ab2   :  { %v6544_v59 = vunpack.i.h.bf16 %v6542_v54  ;;  %v6543_v60 = vunpack.i.l.bf16 %v6542_v54  ;;  %v5906_v54 = vld [vmem:[%s8202_s10] ss:$0 sm:$0xff] }
0x4ab3   :  { %v4489_v55 = vcombine.low %v5906_v54, %v5906_v54 }
0x4ab4   :  { %v4387_v11 = vsel %vm2207_vm4, %v4379_v3, %v6544_v59  ;;  %v4386_v13 = vsel %vm2207_vm4, %v4378_v61, %v6543_v60 }
0x4ab5   :  { %v6552_v62 = vpop.permute.xlu0 %6551  ;;  %v5907_v12 = vpack.c.bf16 %v4387_v11, %v4386_v13  ;;  %v4496_v56 = vrot.slane %v4489_v55, %v7214_v36 }
0x4ab6   :  { %v6554_v14 = vunpack.i.h.bf16 %v6552_v62  ;;  %v6553_v15 = vunpack.i.l.bf16 %v6552_v62 }
0x4ab7   :  { %v4432_v32 = vrot.slane %v5907_v12, %v7160_v7  ;;  %v4497_v31 = vcombine.low %v4496_v56, %v4496_v56 }
0x4ab8   :  { %v4391_v22 = vsel %vm2207_vm4, %v4383_v63, %v6554_v14  ;;  %v4390_v24 = vsel %vm2207_vm4, %v4382_v38, %v6553_v15 }
0x4ab9   :  { %v5909_v37 = vpack.c.bf16 %v4391_v22, %v4390_v24  ;;  %v4454_v43 = vcombine.low %v4432_v32, %v4439_v42 }
0x4abb   :  { %v4446_v27 = vrot.slane %v5909_v37, %v7160_v7  ;;  %v4462_v20 = vrot.slane %v4454_v43, %v7160_v7 }
0x4b1a   :  { %v3987_v16 = vpop.permute.xlu1 %3986 }
0x4b1b   :  { %3989 = vst.msk [vmem:[#allocation5 + $0x2] sm:$0x3] %vm471_vm3, %v3987_v16  ;;  %6331 = vmatmul.mubr.msk.f32.vlgmr.msra.gmra.mrb[38].mxu1 %vm158_vm1, %v3987_v16 }
0x4b1c   :  { %6340 = vmatpush3.bf16.msra.mxu1 %v6727_v10  ;;  %6345 = vmatprep.mubr.msk.bf16.mxu1 %vm7028_vm0, %v7027_v1 }
0x4b1d   :  { %6341 = vmatprep.subr.bf16.mxu1 %v7027_v1 }
0x4b1e   :  { %v6557_v26 = vpop.permute.xlu1 %6556 }
0x4b1f   :  { %v6559_v21 = vunpack.i.h.bf16 %v6557_v26  ;;  %v6558_v30 = vunpack.i.l.bf16 %v6557_v26 }
0x4b20   :  { %6342 = vmatpush3.bf16.msra.mxu1 %v6728_v4  ;;  %v3990_v4 = vld [vmem:[#allocation3] sm:$0x3] }
0x4b21   :  { %v4392_v40 = vsel %vm2207_vm4, %v4384_v35, %v6558_v30  ;;  %v4393_v41 = vsel %vm2207_vm4, %v4385_v33, %v6559_v21  ;;  %6343 = vmatprep.subr.bf16.mxu1 %v7027_v1  ;;  %v3222_v30 = vadd.f32 %v7667_v45, %v3149_v25 }
0x4b22   :  { %v5910_v34 = vpack.c.bf16 %v4393_v41, %v4392_v40 }
0x4b24   :  { %v4453_v44 = vrot.slane %v5910_v34, %v7160_v7  ;;  %6344 = vmatpush3.bf16.msra.mxu1 %v6729_v39 }
0x4b25   :  { %6359 = vmatprep.subr.bf16.mxu1 %v7027_v1 }
0x4b26   :  { %v4455_v46 = vcombine.low %v4446_v27, %v4453_v44 }
0x4b28   :  { %v4469_v47 = vrot.slane %v4455_v46, %v7160_v7 }
0x4b2a   :  { %v4470_v48 = vcombine.low %v4462_v20, %v4469_v47 }
0x4b2c   :  { %6346 = vmatmul.mubr.msk.bf16.vlgmr.msra.gmra.mrb[40].mxu1 %vm4499_vm5, %v4470_v48 }
0x4b2d   :  { %6369 = vmatprep.mubr.msk.bf16.mxu1 %vm7028_vm0, %v7027_v1 }
0x4bee   :  { %v4059_v52 = vpop.f32.mrb[38].mxu1 }
0x4bef   :  { %v6332_v28 = vpop.f32.mrb[39].mxu1  ;;  %v4063_v22 = vadd.f32 %v4059_v52, %v3990_v4  ;;  %v6999_v52 = vld [vmem:[%s8198_s6] ss:$0 sm:$0xff] }
0x4bf0   :  { %v7887_v28 = vadd.f32 %v6999_v52, %v3222_v30 }
0x4bf1   :  { %v4064_v42 = vadd.f32 %v7641_v8, %v4063_v22 }
0x4bf3   :  { %6983 = vtanh.f32 %v4064_v42 }
0x4bf4   :  { %6985 = vtanh.f32 %v7887_v28 }
0x4bff   :  { %v4537_v57 = vpop.f32.mrb[40].mxu1 }
0x4c00   :  { %v4538_v58 = vadd.f32 %v4537_v57, %v4497_v31  ;;  %v6347_v59 = vpop.f32.mrb[41].mxu1 }
0x4c01   :  { %v4540_v60 = vpop.f32.mrb[42].mxu1 }
0x4c02   :  { %v4546_v61 = vcombine.high %v4538_v58, %v4538_v58  ;;  %v4553_v62 = vrot.slane %v4538_v58, %v7214_v36  ;;  %v4541_v53 = vadd.f32 %v4540_v60, %v4497_v31  ;;  %v6348_v0 = vpop.f32.mrb[43].mxu1  ;;  %v6730_v58 = vld [vmem:[%s8203_s11] sm:$0xff]  }
0x4c03   :  { %6350 = vmatpush3.bf16.msra.mxu0 %v6730_v58  ;;  %v6984_v0 = vpop.eup %6983 }
0x4c04   :  { %v4560_v2 = vrot.slane %v4546_v61, %v7214_v36  ;;  %v4561_v3 = vcombine.high %v4553_v62, %v4553_v62  ;;  %v4588_v5 = vmax.f32 %v4553_v62, 0.0  ;;  %v4563_v6 = vcombine.high %v4541_v53, %v4541_v53  ;;  %6351 = vmatprep.subr.bf16.mxu0 %v7027_v1  ;;  %v6731_v61 = vld [vmem:[%s8203_s11 + $0x8] sm:$0xff]  }
0x4c05   :  { %v4570_v9 = vrot.slane %v4541_v53, %v7214_v36  ;;  %v6732_v53 = vld [vmem:[%s8203_s11 + $0x10] sm:$0xff]  }
0x4c06   :  { %v4562_v10 = vcombine.high %v4560_v2, %v4560_v2  ;;  %v4589_v11 = vmax.f32 %v4561_v3, 0.0  ;;  %v4590_v13 = vmax.f32 %v4560_v2, 0.0  ;;  %4608 = vst.msk [vmem:[#allocation6 + $0x4] sm:$0x3] %vm471_vm3, %v4588_v5  ;;  %v4577_v14 = vrot.slane %v4563_v6, %v7214_v36  ;;  %v6986_v2 = vpop.eup %6985 }
0x4c07   :  { %v4578_v15 = vcombine.high %v4570_v9, %v4570_v9  ;;  %v4592_v16 = vmax.f32 %v4570_v9, 0.0  ;;  %6352 = vmatpush3.bf16.msra.mxu0 %v6731_v61  ;;  %v5902_v3 = vmul.f32 -1.442695, %v4064_v42 }
0x4c08   :  { %v4591_v63 = vmax.f32 %v4562_v10, 0.0  ;;  %4609 = vst.msk [vmem:[#allocation6 + $0x6] sm:$0x3] %vm471_vm3, %v4589_v11  ;;  %4610 = vst.msk [vmem:[#allocation6 + $0x8] sm:$0x3] %vm471_vm3, %v4590_v13  ;;  %v4579_v50 = vcombine.high %v4577_v14, %v4577_v14  ;;  %v4594_v17 = vmax.f32 %v4577_v14, 0.0  ;;  %6353 = vmatprep.subr.bf16.mxu0 %v7027_v1 }
0x4c09   :  { %v4593_v38 = vmax.f32 %v4578_v15, 0.0  ;;  %4612 = vst.msk [vmem:[#allocation6 + $0xc] sm:$0x3] %vm471_vm3, %v4592_v16  ;;  %6987 = vpow2.f32 %v5902_v3 }
0x4c0a   :  { %4611 = vst.msk [vmem:[#allocation6 + $0xa] sm:$0x3] %vm471_vm3, %v4591_v63  ;;  %v4595_v18 = vmax.f32 %v4579_v50, 0.0  ;;  %4614 = vst.msk [vmem:[#allocation6 + $0x10] sm:$0x3] %vm471_vm3, %v4594_v17 }
0x4c0b   :  { %4613 = vst.msk [vmem:[#allocation6 + $0xe] sm:$0x3] %vm471_vm3, %v4593_v38  ;;  %6354 = vmatpush3.bf16.msra.mxu0 %v6732_v53 }
0x4c0c   :  { %4615 = vst.msk [vmem:[#allocation6 + $0x12] sm:$0x3] %vm471_vm3, %v4595_v18  ;;  %6373 = vmatprep.subr.bf16.mxu0 %v7027_v1 }
0x4c0d   :  { %v4624_v23 = vld [vmem:[#allocation6 + $0x4] sm:$0x3] }
0x4c0e   :  { %v7866_v12 = vld [vmem:[#allocation6 + $0x4] sm:$0x3] }
0x4c0f   :  { %4923 = vst.msk [vmem:[#allocation6 + $0x4] sm:$0x3] %vm471_vm3, %v7027_v1  ;;  %v4625_v24 = vld [vmem:[#allocation6 + $0x6] sm:$0x3]  ;;  %v4626_v21 = vld [vmem:[#allocation6 + $0x8] sm:$0x3] }
0x4c10   :  { %v6560_v26 = vpack.i.bf16 %v4625_v24, %v4624_v23  ;;  %v4632_v35 = vld [vmem:[#allocation6 + $0x6] sm:$0x3]  ;;  %v4633_v32 = vld [vmem:[#allocation6 + $0x8] sm:$0x3]  ;;  %v4635_v40 = vld [vmem:[#allocation6 + $0xc] sm:$0x3] }
0x4c11   :  { %v4627_v33 = vld [vmem:[#allocation6 + $0xa] sm:$0x3]  ;;  %v4628_v41 = vld [vmem:[#allocation6 + $0xc] sm:$0x3]  ;;  %v4630_v43 = vld [vmem:[#allocation6 + $0x10] sm:$0x3]  ;;  %v6565_v45 = vpack.i.bf16 %v4633_v32, %v4632_v35 }
0x4c12   :  { %6561 = vrot.lane.b32.xlu0 %v6560_v26, %s7025_s3  ;;  %v6570_v37 = vpack.i.bf16 %v4627_v33, %v4626_v21  ;;  %v4634_v39 = vld [vmem:[#allocation6 + $0xa] sm:$0x3]  ;;  %v4629_v34 = vld [vmem:[#allocation6 + $0xe] sm:$0x3]  ;;  %v7873_v20 = vld [vmem:[#allocation6 + $0x6] sm:$0x3] }
0x4c13   :  { %v4631_v27 = vld [vmem:[#allocation6 + $0x12] sm:$0x3]  ;;  %v4636_v44 = vld [vmem:[#allocation6 + $0xe] sm:$0x3]  ;;  %v4619_v47 = vld [vmem:[#allocation6 + $0x8] sm:$0x3]  ;;  %v6580_v31 = vpack.i.bf16 %v4635_v40, %v4634_v39  ;;  %v6575_v57 = vpack.i.bf16 %v4629_v34, %v4628_v41 }
0x4c14   :  { %v4638_v46 = vld [vmem:[#allocation6 + $0x12] sm:$0x3]  ;;  %6571 = vrot.lane.b32.xlu1 %v6570_v37, %s7025_s3  ;;  %4924 = vst.msk [vmem:[#allocation6 + $0x6] sm:$0x3] %vm471_vm3, %v7027_v1  ;;  %v7880_v48 = vld [vmem:[#allocation6 + $0xa] sm:$0x3]  ;;  %v6590_v59 = vpack.i.bf16 %v4631_v27, %v4630_v43 }
0x4c15   :  { %4930 = vst.msk [vmem:[#allocation6 + $0x12] sm:$0x3] %vm471_vm3, %v7027_v1  ;;  %v7882_v8 = vld [vmem:[#allocation6 + $0xc] sm:$0x3]  ;;  %v4637_v54 = vld [vmem:[#allocation6 + $0x10] sm:$0x3]  ;;  %v6595_v62 = vpack.i.bf16 %v7842_v49, %v4638_v46  ;;  %v6988_v49 = vpop.eup %6987 }
0x4c16   :  { %4925 = vst.msk [vmem:[#allocation6 + $0x8] sm:$0x3] %vm471_vm3, %v7027_v1  ;;  %4926 = vst.msk [vmem:[#allocation6 + $0xa] sm:$0x3] %vm471_vm3, %v7027_v1  ;;  %v7895_v55 = vld [vmem:[#allocation6 + $0xe] sm:$0x3]  ;;  %6566 = vrot.lane.b32.xlu0 %v6565_v45, %s7033_s0  ;;  %v6585_v60 = vpack.i.bf16 %v4637_v54, %v4636_v44 }
0x4c17   :  { %4927 = vst.msk [vmem:[#allocation6 + $0xc] sm:$0x3] %vm471_vm3, %v7027_v1  ;;  %v7897_v56 = vld [vmem:[#allocation6 + $0x10] sm:$0x3]  ;;  %4928 = vst.msk [vmem:[#allocation6 + $0xe] sm:$0x3] %vm471_vm3, %v7027_v1 }
0x4c18   :  { %4929 = vst.msk [vmem:[#allocation6 + $0x10] sm:$0x3] %vm471_vm3, %v7027_v1  ;;  %6581 = vrot.lane.b32.xlu1 %v6580_v31, %s7033_s0  ;;  %v4068_v6 = vadd.f32 1.0, %v6988_v49  ;;  %v5915_v49 = vld [vmem:[%s8204_s12] ss:$0 sm:$0xff]  ;;  %s7035_s12 = smov 48  }
0x4c1a   :  { %6576 = vrot.lane.b32.xlu0 %v6575_v57, %s7025_s3  ;;  %6989 = vrcp.f32 %v4068_v6 }
0x4c1c   :  { %6591 = vrot.lane.b32.xlu1 %v6590_v59, %s7025_s3 }
0x4c1e   :  { %6586 = vrot.lane.b32.xlu0 %v6585_v60, %s7033_s0 }
0x4c20   :  { %6596 = vrot.lane.b32.xlu1 %v6595_v62, %s7033_s0 }
0x4c22   :  { %4074 = vrot.lane.b32.xlu0 %v6984_v0, %s7032_s25 }
0x4c24   :  { %3233 = vrot.lane.b32.xlu1 %v6986_v2, %s7032_s25 }
0x4c84   :  { %v6562_v5 = vpop.permute.xlu0 %6561 }
0x4c85   :  { %v6564_v14 = vunpack.i.h.bf16 %v6562_v5  ;;  %v6563_v15 = vunpack.i.l.bf16 %v6562_v5  ;;  %v4815_v5 = vcombine.low %v5915_v49, %v5915_v49 }
0x4c86   :  { %v6572_v9 = vpop.permute.xlu1 %6571 }
0x4c87   :  { %v6574_v10 = vunpack.i.h.bf16 %v6572_v9  ;;  %v6573_v11 = vunpack.i.l.bf16 %v6572_v9  ;;  %v4705_v25 = vsel %vm158_vm1, %v7866_v12, %v6564_v14  ;;  %v4704_v26 = vsel %vm158_vm1, %v7846_v51, %v6563_v15 }
0x4c88   :  { %v6567_v13 = vpop.permute.xlu0 %6566  ;;  %v4822_v6 = vrot.slane %v4815_v5, %v7214_v36 }
0x4c89   :  { %v6569_v63 = vunpack.i.h.bf16 %v6567_v13  ;;  %v6568_v50 = vunpack.i.l.bf16 %v6567_v13  ;;  %v4707_v18 = vsel %vm158_vm1, %v4619_v47, %v6574_v10  ;;  %v4706_v23 = vsel %vm158_vm1, %v7873_v20, %v6573_v11  ;;  %v7942_v47 = vpop.eup %6989 }
0x4c8a   :  { %v6582_v16 = vpop.permute.xlu1 %6581  ;;  %v4823_v9 = vcombine.low %v4822_v6, %v4822_v6 }
0x4c8b   :  { %v6584_v17 = vunpack.i.h.bf16 %v6582_v16  ;;  %v6583_v38 = vunpack.i.l.bf16 %v6582_v16  ;;  %v4713_v35 = vsel %vm2207_vm4, %v4705_v25, %v6569_v63  ;;  %v4712_v32 = vsel %vm2207_vm4, %v4704_v26, %v6568_v50 }
0x4c8c   :  { %v6577_v4 = vpop.permute.xlu0 %6576  ;;  %v5916_v43 = vpack.c.bf16 %v4713_v35, %v4712_v32 }
0x4c8d   :  { %v4715_v22 = vsel %vm2207_vm4, %v4707_v18, %v6584_v17  ;;  %v4714_v24 = vsel %vm2207_vm4, %v4706_v23, %v6583_v38  ;;  %v6579_v21 = vunpack.i.h.bf16 %v6577_v4  ;;  %v6578_v30 = vunpack.i.l.bf16 %v6577_v4 }
0x4c8e   :  { %v6592_v33 = vpop.permute.xlu1 %6591  ;;  %v5917_v37 = vpack.c.bf16 %v4715_v22, %v4714_v24  ;;  %v4758_v60 = vrot.slane %v5916_v43, %v7160_v7 }
0x4c8f   :  { %v6594_v39 = vunpack.i.h.bf16 %v6592_v33  ;;  %v6593_v40 = vunpack.i.l.bf16 %v6592_v33  ;;  %v4709_v12 = vsel %vm158_vm1, %v7882_v8, %v6579_v21  ;;  %v4708_v51 = vsel %vm158_vm1, %v7880_v48, %v6578_v30 }
0x4c90   :  { %v6587_v41 = vpop.permute.xlu0 %6586  ;;  %v4765_v52 = vrot.slane %v5917_v37, %v7160_v7 }
0x4c91   :  { %v6589_v42 = vunpack.i.h.bf16 %v6587_v41  ;;  %v6588_v34 = vunpack.i.l.bf16 %v6587_v41  ;;  %v4711_v54 = vsel %vm158_vm1, %v7897_v56, %v6594_v39  ;;  %v4710_v8 = vsel %vm158_vm1, %v7895_v55, %v6593_v40  ;;  %v4949_v40 = vld [vmem:[#allocation6 + $0x2] sm:$0x3] }
0x4c92   :  { %v6597_v27 = vpop.permute.xlu1 %6596  ;;  %v4780_v62 = vcombine.low %v4758_v60, %v4765_v52  ;;  %v5883_v41 = vmul.f32 -1.442695, %v7887_v28 }
0x4c93   :  { %v4717_v44 = vsel %vm2207_vm4, %v4709_v12, %v6589_v42  ;;  %v4716_v46 = vsel %vm2207_vm4, %v4708_v51, %v6588_v34  ;;  %v6599_v20 = vunpack.i.h.bf16 %v6597_v27  ;;  %v6598_v45 = vunpack.i.l.bf16 %v6597_v27 }
0x4c94   :  { %v5918_v31 = vpack.c.bf16 %v4717_v44, %v4716_v46  ;;  %v4075_v57 = vpop.permute.xlu0 %4074  ;;  %v4788_v55 = vrot.slane %v4780_v62, %v7160_v7  ;;  %6991 = vpow2.f32 %v5883_v41 }
0x4c95   :  { %v4718_v48 = vsel %vm2207_vm4, %v4710_v8, %v6598_v45  ;;  %v4719_v58 = vsel %vm2207_vm4, %v4711_v54, %v6599_v20  ;;  %v4077_v59 = vmul.f32 %v7942_v47, %v4075_v57 }
0x4c96   :  { %v5919_v61 = vpack.c.bf16 %v4719_v58, %v4718_v48  ;;  %v4772_v53 = vrot.slane %v5918_v31, %v7160_v7 }
0x4c97   :  { %4079 = vrot.lane.b32.xlu0 %v4077_v59, %s7025_s3 }
0x4c98   :  { %v4779_v56 = vrot.slane %v5919_v61, %v7160_v7 }
0x4c9a   :  { %v4781_v0 = vcombine.low %v4772_v53, %v4779_v56 }
0x4c9c   :  { %v4795_v2 = vrot.slane %v4781_v0, %v7160_v7 }
0x4c9e   :  { %v4796_v3 = vcombine.low %v4788_v55, %v4795_v2  ;;  %v6992_v62 = vpop.eup %6991 }
0x4ca0   :  { %6356 = vmatmul.mubr.msk.bf16.vlgmr.msra.gmra.mrb[44].mxu0 %vm4499_vm5, %v4796_v3  ;;  %v3227_v3 = vadd.f32 1.0, %v6992_v62 }
0x4ca1   :  { %6379 = vmatprep.mubr.msk.bf16.mxu0 %vm7028_vm0, %v7027_v1 }
0x4ca2   :  { %6993 = vrcp.f32 %v3227_v3 }
0x4d73   :  { %v4862_v10 = vpop.f32.mrb[44].mxu0 }
0x4d74   :  { %v4863_v11 = vadd.f32 %v4862_v10, %v4823_v9  ;;  %v6357_v13 = vpop.f32.mrb[45].mxu0  ;;  %v4080_v10 = vpop.permute.xlu0 %4079 }
0x4d75   :  { %v4865_v14 = vpop.f32.mrb[46].mxu0  ;;  %v4072_v13 = vmul.f32 %v7942_v47, %v7786_v19  ;;  %v6734_v19 = vld [vmem:[%s8205_s13 + $0x8] sm:$0xff]  }
0x4d76   :  { %v4871_v15 = vcombine.high %v4863_v11, %v4863_v11  ;;  %v4878_v16 = vrot.slane %v4863_v11, %v7214_v36  ;;  %v4866_v63 = vadd.f32 %v4865_v14, %v4823_v9  ;;  %v6358_v50 = vpop.f32.mrb[47].mxu0 }
0x4d78   :  { %v4885_v17 = vrot.slane %v4871_v15, %v7214_v36  ;;  %v4886_v38 = vcombine.high %v4878_v16, %v4878_v16  ;;  %v4913_v18 = vmax.f32 %v4878_v16, 0.0  ;;  %v4888_v23 = vcombine.high %v4866_v63, %v4866_v63  ;;  %v6733_v16 = vld [vmem:[%s8205_s13] sm:$0xff]  }
0x4d79   :  { %v4895_v4 = vrot.slane %v4866_v63, %v7214_v36  ;;  %v4082_v63 = vadd.f32 %v4080_v10, %v4072_v13  ;;  %6360 = vmatpush3.bf16.msra.mxu1 %v6733_v16 }
0x4d7a   :  { %v4887_v22 = vcombine.high %v4885_v17, %v4885_v17  ;;  %v4914_v24 = vmax.f32 %v4886_v38, 0.0  ;;  %v4915_v25 = vmax.f32 %v4885_v17, 0.0  ;;  %4933 = vst.msk [vmem:[#allocation6 + $0x4] sm:$0x3] %vm471_vm3, %v4913_v18  ;;  %v4902_v26 = vrot.slane %v4888_v23, %v7214_v36  ;;  %6361 = vmatprep.subr.bf16.mxu1 %v7027_v1 }
0x4d7b   :  { %v4903_v21 = vcombine.high %v4895_v4, %v4895_v4  ;;  %v4917_v30 = vmax.f32 %v4895_v4, 0.0  ;;  %v4972_v4 = vld [vmem:[#allocation6 + $0x14] sm:$0x3]  ;;  %6995 = vtanh.f32 %v4082_v63 }
0x4d7c   :  { %v4916_v33 = vmax.f32 %v4887_v22, 0.0  ;;  %4934 = vst.msk [vmem:[#allocation6 + $0x6] sm:$0x3] %vm471_vm3, %v4914_v24  ;;  %4935 = vst.msk [vmem:[#allocation6 + $0x8] sm:$0x3] %vm471_vm3, %v4915_v25  ;;  %v4904_v35 = vcombine.high %v4902_v26, %v4902_v26  ;;  %v4919_v32 = vmax.f32 %v4902_v26, 0.0 }
0x4d7d   :  { %v4918_v37 = vmax.f32 %v4903_v21, 0.0  ;;  %4937 = vst.msk [vmem:[#allocation6 + $0xc] sm:$0x3] %vm471_vm3, %v4917_v30  ;;  %v4980_v25 = vld [vmem:[#allocation6 + $0x14] sm:$0x3]  ;;  %6362 = vmatpush3.bf16.msra.mxu1 %v6734_v19 }
0x4d7e   :  { %4936 = vst.msk [vmem:[#allocation6 + $0xa] sm:$0x3] %vm471_vm3, %v4916_v33  ;;  %v4920_v39 = vmax.f32 %v4904_v35, 0.0  ;;  %4939 = vst.msk [vmem:[#allocation6 + $0x10] sm:$0x3] %vm471_vm3, %v4919_v32  ;;  %6363 = vmatprep.subr.bf16.mxu1 %v7027_v1  ;;  %v6735_v32 = vld [vmem:[%s8205_s13 + $0x10] sm:$0xff]  }
0x4d7f   :  { %4938 = vst.msk [vmem:[#allocation6 + $0xe] sm:$0x3] %vm471_vm3, %v4918_v37  ;;  %v4981_v26 = vld [vmem:[#allocation6 + $0x16] sm:$0x3]  ;;  %v3234_v37 = vpop.permute.xlu1 %3233 }
0x4d80   :  { %4940 = vst.msk [vmem:[#allocation6 + $0x12] sm:$0x3] %vm471_vm3, %v4920_v39  ;;  %v6675_v35 = vpack.i.bf16 %v4981_v26, %v4980_v25  ;;  %v6736_v39 = vld [vmem:[%s8205_s13 + $0x18] sm:$0xff]  }
0x4d81   :  { %v4950_v42 = vld [vmem:[#allocation6 + $0x4] sm:$0x3]  ;;  %6364 = vmatpush3.bf16.msra.mxu1 %v6735_v32 }
0x4d82   :  { %v6600_v34 = vpack.i.bf16 %v4950_v42, %v4949_v40  ;;  %v4957_v44 = vld [vmem:[#allocation6 + $0x4] sm:$0x3]  ;;  %v8009_v40 = vpop.eup %6993  ;;  %6365 = vmatprep.subr.bf16.mxu1 %v7027_v1 }
0x4d83   :  { %v4951_v43 = vld [vmem:[#allocation6 + $0x6] sm:$0x3]  ;;  %v4952_v12 = vld [vmem:[#allocation6 + $0x8] sm:$0x3]  ;;  %v3236_v41 = vmul.f32 %v8009_v40, %v3234_v37  ;;  %v4943_v3 = vld [vmem:[#allocation6 + $0x4] sm:$0x3] }
0x4d84   :  { %v4958_v51 = vld [vmem:[#allocation6 + $0x6] sm:$0x3]  ;;  %6601 = vrot.lane.b32.xlu1 %v6600_v34, %s7025_s3  ;;  %v6605_v27 = vpack.i.bf16 %v4952_v12, %v4951_v43  ;;  %v4966_v54 = vld [vmem:[#allocation6 + $0x8] sm:$0x3]  ;;  %v4954_v59 = vld [vmem:[#allocation6 + $0xc] sm:$0x3] }
0x4d85   :  { %v4956_v46 = vld [vmem:[#allocation6 + $0x10] sm:$0x3]  ;;  %v6610_v20 = vpack.i.bf16 %v4958_v51, %v4957_v44  ;;  %v4965_v52 = vld [vmem:[#allocation6 + $0x6] sm:$0x3]  ;;  %v4960_v8 = vld [vmem:[#allocation6 + $0xa] sm:$0x3]  ;;  %6366 = vmatpush3.bf16.msra.mxu1 %v6736_v39  ;;  %v6996_v34 = vpop.eup %6995 }
0x4d86   :  { %6606 = vrot.lane.b32.xlu0 %v6605_v27, %s7025_s3  ;;  %v4955_v45 = vld [vmem:[#allocation6 + $0xe] sm:$0x3]  ;;  %v6615_v31 = vpack.i.bf16 %v4966_v54, %v4965_v52  ;;  %v4959_v57 = vld [vmem:[#allocation6 + $0x8] sm:$0x3]  ;;  %v4953_v48 = vld [vmem:[#allocation6 + $0xa] sm:$0x3]  ;;  %6367 = vmatprep.subr.bf16.mxu1 %v7027_v1 }
0x4d87   :  { %v6625_v28 = vpack.i.bf16 %v4956_v46, %v4955_v45  ;;  %v6630_v58 = vpack.i.bf16 %v4960_v8, %v4959_v57  ;;  %v4967_v60 = vld [vmem:[#allocation6 + $0xa] sm:$0x3]  ;;  %v6620_v61 = vpack.i.bf16 %v4954_v59, %v4953_v48  ;;  %v4968_v53 = vld [vmem:[#allocation6 + $0xc] sm:$0x3]  ;;  %v4962_v56 = vld [vmem:[#allocation6 + $0xe] sm:$0x3] }
0x4d88   :  { %6611 = vrot.lane.b32.xlu1 %v6610_v20, %s7033_s0  ;;  %v6640_v0 = vpack.i.bf16 %v4968_v53, %v4967_v60  ;;  %v4961_v55 = vld [vmem:[#allocation6 + $0xc] sm:$0x3]  ;;  %v4977_v2 = vld [vmem:[#allocation6 + $0xe] sm:$0x3]  ;;  %v4970_v9 = vld [vmem:[#allocation6 + $0x10] sm:$0x3]  ;;  %v8026_v60 = vmul.f32 %v8009_v40, %v7648_v29 }
0x4d89   :  { %v6635_v49 = vpack.i.bf16 %v4962_v56, %v4961_v55  ;;  %v4976_v5 = vld [vmem:[#allocation6 + $0xc] sm:$0x3]  ;;  %v4969_v6 = vld [vmem:[#allocation6 + $0xe] sm:$0x3]  ;;  %v4964_v14 = vld [vmem:[#allocation6 + $0x12] sm:$0x3] }
0x4d8a   :  { %6626 = vrot.lane.b32.xlu0 %v6625_v28, %s7025_s3  ;;  %v6655_v11 = vpack.i.bf16 %v4977_v2, %v4976_v5  ;;  %v6645_v15 = vpack.i.bf16 %v4970_v9, %v4969_v6  ;;  %v4963_v50 = vld [vmem:[#allocation6 + $0x10] sm:$0x3]  ;;  %v4975_v17 = vld [vmem:[#allocation6 + $0xa] sm:$0x3]  ;;  %v4974_v18 = vld [vmem:[#allocation6 + $0x8] sm:$0x3] }
0x4d8b   :  { %v6660_v38 = vpack.i.bf16 %v4964_v14, %v4963_v50  ;;  %v4971_v23 = vld [vmem:[#allocation6 + $0x12] sm:$0x3]  ;;  %v6650_v22 = vpack.i.bf16 %v4975_v17, %v4974_v18  ;;  %v4978_v30 = vld [vmem:[#allocation6 + $0x10] sm:$0x3]  ;;  %v6737_v42 = vld [vmem:[%s8205_s13 + $0x20] sm:$0xff]  }
0x4d8c   :  { %6616 = vrot.lane.b32.xlu1 %v6615_v31, %s7035_s12  ;;  %v4979_v24 = vld [vmem:[#allocation6 + $0x12] sm:$0x3]  ;;  %v6665_v21 = vpack.i.bf16 %v4972_v4, %v4971_v23  ;;  %6368 = vmatpush3.bf16.msra.mxu1 %v6737_v42  ;;  %v4941_v28 = vld [vmem:[#allocation6] sm:$0x3]  ;;  %v4942_v8 = vld [vmem:[#allocation6 + $0x2] sm:$0x3] }
0x4d8d   :  { %v6670_v33 = vpack.i.bf16 %v4979_v24, %v4978_v30  ;;  %v4947_v16 = vld [vmem:[#allocation6 + $0xc] sm:$0x3]  ;;  %v4948_v63 = vld [vmem:[#allocation6 + $0xe] sm:$0x3] }
0x4d8e   :  { %6631 = vrot.lane.b32.xlu0 %v6630_v58, %s7033_s0 }
0x4d90   :  { %6621 = vrot.lane.b32.xlu1 %v6620_v61, %s7025_s3 }
0x4d92   :  { %6641 = vrot.lane.b32.xlu0 %v6640_v0, %s7035_s12 }
0x4d94   :  { %6636 = vrot.lane.b32.xlu1 %v6635_v49, %s7033_s0  ;;  %v4944_v49 = vld [vmem:[#allocation6 + $0x6] sm:$0x3] }
0x4d96   :  { %6656 = vrot.lane.b32.xlu0 %v6655_v11, %s7036_s27 }
0x4d98   :  { %6646 = vrot.lane.b32.xlu1 %v6645_v15, %s7035_s12 }
0x4d9a   :  { %6661 = vrot.lane.b32.xlu0 %v6660_v38, %s7033_s0 }
0x4d9c   :  { %6651 = vrot.lane.b32.xlu1 %v6650_v22, %s7036_s27 }
0x4d9e   :  { %6666 = vrot.lane.b32.xlu0 %v6665_v21, %s7035_s12 }
0x4da0   :  { %6671 = vrot.lane.b32.xlu1 %v6670_v33, %s7036_s27 }
0x4da2   :  { %6676 = vrot.lane.b32.xlu0 %v6675_v35, %s7036_s27 }
0x4da4   :  { %3238 = vrot.lane.b32.xlu1 %v3236_v41, %s7025_s3 }
0x4da6   :  { %4085 = vrot.lane.b32.xlu0 %v6996_v34, %s7033_s0  ;;  %v4945_v34 = vld [vmem:[#allocation6 + $0x8] sm:$0x3] }
0x4df6   :  { %v6602_v43 = vpop.permute.xlu1 %6601 }
0x4df7   :  { %v6604_v52 = vunpack.i.h.bf16 %v6602_v43  ;;  %v6603_v54 = vunpack.i.l.bf16 %v6602_v43  ;;  %v4946_v43 = vld [vmem:[#allocation6 + $0xa] sm:$0x3] }
0x4df8   :  { %v6607_v12 = vpop.permute.xlu0 %6606 }
0x4df9   :  { %v6609_v31 = vunpack.i.h.bf16 %v6607_v12  ;;  %v6608_v57 = vunpack.i.l.bf16 %v6607_v12  ;;  %v5111_v55 = vsel %vm158_vm1, %v4942_v8, %v6604_v52  ;;  %v5110_v2 = vsel %vm158_vm1, %v4941_v28, %v6603_v54 }
0x4dfa   :  { %v6612_v51 = vpop.permute.xlu1 %6611 }
0x4dfb   :  { %v6614_v58 = vunpack.i.h.bf16 %v6612_v51  ;;  %v6613_v59 = vunpack.i.l.bf16 %v6612_v51  ;;  %v5113_v9 = vsel %vm158_vm1, %v4944_v49, %v6609_v31  ;;  %v5112_v10 = vsel %vm158_vm1, %v4943_v3, %v6608_v57 }
0x4dfc   :  { %v6627_v27 = vpop.permute.xlu0 %6626 }
0x4dfd   :  { %v6629_v61 = vunpack.i.h.bf16 %v6627_v27  ;;  %v6628_v62 = vunpack.i.l.bf16 %v6627_v27  ;;  %v5119_v14 = vsel %vm2207_vm4, %v5111_v55, %v6614_v58  ;;  %v5118_v15 = vsel %vm2207_vm4, %v5110_v2, %v6613_v59 }
0x4dfe   :  { %v6617_v44 = vpop.permute.xlu1 %6616 }
0x4dff   :  { %v6619_v53 = vunpack.i.h.bf16 %v6617_v44  ;;  %v6618_v56 = vunpack.i.l.bf16 %v6617_v44  ;;  %v5117_v38 = vsel %vm158_vm1, %v4948_v63, %v6629_v61  ;;  %v5116_v19 = vsel %vm158_vm1, %v4947_v16, %v6628_v62 }
0x4e00   :  { %v6632_v46 = vpop.permute.xlu0 %6631 }
0x4e01   :  { %v6634_v5 = vunpack.i.h.bf16 %v6632_v46  ;;  %v6633_v6 = vunpack.i.l.bf16 %v6632_v46  ;;  %v5127_v18 = vsel %vm4499_vm5, %v5119_v14, %v6619_v53  ;;  %v5126_v23 = vsel %vm4499_vm5, %v5118_v15, %v6618_v56 }
0x4e02   :  { %v8020_v20 = vpop.permute.xlu1 %6621 }
0x4e03   :  { %v5121_v22 = vsel %vm2207_vm4, %v5113_v9, %v6634_v5  ;;  %v5120_v24 = vsel %vm2207_vm4, %v5112_v10, %v6633_v6  ;;  %v6624_v25 = vunpack.i.h.bf16 %v8020_v20  ;;  %v6623_v26 = vunpack.i.l.bf16 %v8020_v20 }
0x4e04   :  { %v6642_v45 = vpop.permute.xlu0 %6641 }
0x4e05   :  { %v6644_v11 = vunpack.i.h.bf16 %v6642_v45  ;;  %v6643_v29 = vunpack.i.l.bf16 %v6642_v45  ;;  %v5115_v20 = vsel %vm158_vm1, %v4946_v43, %v6624_v25  ;;  %v5114_v45 = vsel %vm158_vm1, %v4945_v34, %v6623_v26  ;;  %v4108_v43 = vld [vmem:[#allocation5 + $0xc] sm:$0x3] }
0x4e06   :  { %v8022_v48 = vpop.permute.xlu1 %6636 }
0x4e07   :  { %v5128_v21 = vsel %vm4499_vm5, %v5120_v24, %v6643_v29  ;;  %v5129_v30 = vsel %vm4499_vm5, %v5121_v22, %v6644_v11  ;;  %v6639_v33 = vunpack.i.h.bf16 %v8022_v48  ;;  %v6638_v35 = vunpack.i.l.bf16 %v8022_v48 }
0x4e08   :  { %v6657_v0 = vpop.permute.xlu0 %6656 }
0x4e09   :  { %v6659_v50 = vunpack.i.h.bf16 %v6657_v0  ;;  %v6658_v17 = vunpack.i.l.bf16 %v6657_v0  ;;  %v5123_v28 = vsel %vm2207_vm4, %v5115_v20, %v6639_v33  ;;  %v5122_v58 = vsel %vm2207_vm4, %v5114_v45, %v6638_v35 }
0x4e0a   :  { %v6647_v13 = vpop.permute.xlu1 %6646 }
0x4e0b   :  { %v5137_v37 = vsel %vm5134_vm6, %v5128_v21, %v6658_v17  ;;  %v5138_v39 = vsel %vm5134_vm6, %v5129_v30, %v6659_v50  ;;  %v6649_v12 = vunpack.i.h.bf16 %v6647_v13  ;;  %v6648_v51 = vunpack.i.l.bf16 %v6647_v13  ;;  %v4103_v21 = vld [vmem:[#allocation5 + $0x2] sm:$0x3] }
0x4e0c   :  { %v6662_v4 = vpop.permute.xlu0 %6661  ;;  %v5926_v59 = vpack.c.bf16 %v5138_v39, %v5137_v37  ;;  %v4104_v37 = vld [vmem:[#allocation5 + $0x4] sm:$0x3]  ;;  %v4107_v39 = vld [vmem:[#allocation5 + $0xa] sm:$0x3] }
0x4e0d   :  { %v6664_v27 = vunpack.i.h.bf16 %v6662_v4  ;;  %v6663_v44 = vunpack.i.l.bf16 %v6662_v4  ;;  %v5131_v53 = vsel %vm4499_vm5, %v5123_v28, %v6649_v12  ;;  %v5130_v56 = vsel %vm4499_vm5, %v5122_v58, %v6648_v51  ;;  %v4109_v12 = vld [vmem:[#allocation5 + $0xe] sm:$0x3]  ;;  %v4094_v28 = vld [vmem:[#allocation4] sm:$0x3] }
0x4e0e   :  { %v6652_v32 = vpop.permute.xlu1 %6651  ;;  %v5192_v63 = vrot.slane %v5926_v59, %v7160_v7  ;;  %v6695_v51 = vpack.i.bf16 %v4109_v12, %v4108_v43 }
0x4e0f   :  { %v6654_v41 = vunpack.i.h.bf16 %v6652_v32  ;;  %v6653_v42 = vunpack.i.l.bf16 %v6652_v32  ;;  %v5125_v0 = vsel %vm2207_vm4, %v5117_v38, %v6664_v27  ;;  %v5124_v55 = vsel %vm2207_vm4, %v5116_v19, %v6663_v44  ;;  %v4106_v32 = vld [vmem:[#allocation5 + $0x8] sm:$0x3] }
0x4e10   :  { %v6667_v46 = vpop.permute.xlu0 %6666 }
0x4e11   :  { %v5136_v52 = vsel %vm5134_vm6, %v5127_v18, %v6654_v41  ;;  %v5135_v54 = vsel %vm5134_vm6, %v5126_v23, %v6653_v42  ;;  %v6669_v31 = vunpack.i.h.bf16 %v6667_v46  ;;  %v6668_v57 = vunpack.i.l.bf16 %v6667_v46  ;;  %v4105_v42 = vld [vmem:[#allocation5 + $0x6] sm:$0x3] }
0x4e12   :  { %v5925_v8 = vpack.c.bf16 %v5136_v52, %v5135_v54  ;;  %v6672_v48 = vpop.permute.xlu1 %6671  ;;  %v6690_v41 = vpack.i.bf16 %v4107_v39, %v4106_v32  ;;  %v6680_v34 = vpack.i.bf16 %v4105_v42, %v4104_v37 }
0x4e13   :  { %v6674_v61 = vunpack.i.h.bf16 %v6672_v48  ;;  %v6673_v62 = vunpack.i.l.bf16 %v6672_v48  ;;  %v5132_v10 = vsel %vm4499_vm5, %v5124_v55, %v6668_v57  ;;  %v5133_v11 = vsel %vm4499_vm5, %v5125_v0, %v6669_v31  ;;  %v4098_v0 = vld [vmem:[#allocation4 + $0x8] sm:$0x3]  ;;  %v4099_v55 = vld [vmem:[#allocation4 + $0xa] sm:$0x3] }
0x4e14   :  { %v6677_v2 = vpop.permute.xlu0 %6676  ;;  %v5185_v9 = vrot.slane %v5925_v8, %v7160_v7  ;;  %v4095_v8 = vld [vmem:[#allocation4 + $0x2] sm:$0x3] }
0x4e15   :  { %v5140_v3 = vsel %vm5134_vm6, %v5131_v53, %v6674_v61  ;;  %v5139_v49 = vsel %vm5134_vm6, %v5130_v56, %v6673_v62  ;;  %v6679_v5 = vunpack.i.h.bf16 %v6677_v2  ;;  %v6678_v6 = vunpack.i.l.bf16 %v6677_v2 }
0x4e16   :  { %v5927_v29 = vpack.c.bf16 %v5140_v3, %v5139_v49  ;;  %v3239_v13 = vpop.permute.xlu1 %3238  ;;  %v5207_v19 = vcombine.low %v5185_v9, %v5192_v63  ;;  %v4096_v49 = vld [vmem:[#allocation4 + $0x4] sm:$0x3] }
0x4e17   :  { %v5141_v14 = vsel %vm5134_vm6, %v5132_v10, %v6678_v6  ;;  %v5142_v15 = vsel %vm5134_vm6, %v5133_v11, %v6679_v5  ;;  %v3241_v16 = vadd.f32 %v3239_v13, %v8026_v60  ;;  %v4097_v5 = vld [vmem:[#allocation4 + $0x6] sm:$0x3] }
0x4e18   :  { %v5928_v50 = vpack.c.bf16 %v5142_v15, %v5141_v14  ;;  %v4086_v17 = vpop.permute.xlu0 %4085  ;;  %v5199_v18 = vrot.slane %v5927_v29, %v7160_v7  ;;  %v5215_v22 = vrot.slane %v5207_v19, %v7160_v7  ;;  %v4100_v15 = vld [vmem:[#allocation4 + $0xc] sm:$0x3] }
0x4e19   :  { %6997 = vtanh.f32 %v3241_v16  ;;  %v4088_v38 = vmul.f32 %v7942_v47, %v4086_v17  ;;  %v6739_v19 = vld [vmem:[%s8207_s15 + $0x8] sm:$0xff]  }
0x4e1a   :  { %v5206_v23 = vrot.slane %v5928_v50, %v7160_v7 }
0x4e1b   :  { %4090 = vrot.lane.b32.xlu0 %v4088_v38, %s7034_s14  ;;  %v6738_v38 = vld [vmem:[%s8207_s15] sm:$0xff]  }
0x4e1c   :  { %v5208_v4 = vcombine.low %v5199_v18, %v5206_v23  ;;  %6374 = vmatpush3.bf16.msra.mxu0 %v6738_v38  ;;  %v6740_v18 = vld [vmem:[%s8207_s15 + $0x10] sm:$0xff]  }
0x4e1d   :  { %6375 = vmatprep.subr.bf16.mxu0 %v7027_v1 }
0x4e1e   :  { %v5222_v24 = vrot.slane %v5208_v4, %v7160_v7 }
0x4e20   :  { %v5223_v60 = vcombine.low %v5215_v22, %v5222_v24  ;;  %6376 = vmatpush3.bf16.msra.mxu0 %v6739_v19 }
0x4e21   :  { %6377 = vmatprep.subr.bf16.mxu0 %v7027_v1 }
0x4e22   :  { %6370 = vmatmul.mubr.msk.bf16.vlgmr.msra.gmra.mrb[44].mxu1 %vm5264_vm7, %v5223_v60 }
0x4e23   :  { %v6998_v25 = vpop.eup %6997 }
0x4e24   :  { %3244 = vrot.lane.b32.xlu1 %v6998_v25, %s7033_s0  ;;  %6378 = vmatpush3.bf16.msra.mxu0 %v6740_v18 }
0x4e25   :  { %6383 = vmatprep.subr.bf16.mxu0 %v7027_v1 }
0x4e8d   :  { %v4091_v26 = vpop.permute.xlu0 %4090 }
0x4e8e   :  { %4093 = vst.msk [vmem:[#allocation5] sm:$0x3] %vm471_vm3, %v4091_v26 }
0x4e95   :  { %v4102_v47 = vld [vmem:[#allocation5] sm:$0x3] }
0x4e96   :  { %v3245_v30 = vpop.permute.xlu1 %3244  ;;  %v6685_v33 = vpack.i.bf16 %v4103_v21, %v4102_v47 }
0x4e97   :  { %v3247_v35 = vmul.f32 %v8009_v40, %v3245_v30 }
0x4e98   :  { %6686 = vrot.lane.b32.xlu0 %v6685_v33, %s7025_s3 }
0x4e99   :  { %3249 = vrot.lane.b32.xlu1 %v3247_v35, %s7034_s14 }
0x4e9c   :  { %6691 = vrot.lane.b32.xlu0 %v6690_v41, %s7025_s3 }
0x4e9d   :  { %6681 = vrot.lane.b32.xlu1 %v6680_v34, %s7025_s3 }
0x4ea1   :  { %6696 = vrot.lane.b32.xlu1 %v6695_v51, %s7025_s3 }
0x4ef5   :  { %v5302_v40 = vpop.f32.mrb[44].mxu1 }
0x4ef6   :  { %v6371_v27 = vpop.f32.mrb[45].mxu1 }
0x4ef7   :  { %v5305_v44 = vpop.f32.mrb[46].mxu1 }
0x4ef8   :  { %v6372_v46 = vpop.f32.mrb[47].mxu1 }
0x4f0a   :  { %v6687_v20 = vpop.permute.xlu0 %6686 }
0x4f0b   :  { %v6689_v45 = vunpack.i.h.bf16 %v6687_v20  ;;  %v6688_v52 = vunpack.i.l.bf16 %v6687_v20  ;;  %v3250_v54 = vpop.permute.xlu1 %3249 }
0x4f0c   :  { %3252 = vst.msk [vmem:[#allocation4 + $0xe] sm:$0x3] %vm471_vm3, %v3250_v54 }
0x4f0d   :  { %v4142_v31 = vsel %vm158_vm1, %v4094_v28, %v6688_v52  ;;  %v4143_v57 = vsel %vm158_vm1, %v4095_v8, %v6689_v45 }
0x4f0e   :  { %v6692_v48 = vpop.permute.xlu0 %6691  ;;  %v6705_v58 = vpack.i.bf16 %v4143_v57, %v4142_v31 }
0x4f0f   :  { %v6694_v59 = vunpack.i.h.bf16 %v6692_v48  ;;  %v6693_v61 = vunpack.i.l.bf16 %v6692_v48  ;;  %v6682_v62 = vpop.permute.xlu1 %6681 }
0x4f10   :  { %v6684_v53 = vunpack.i.h.bf16 %v6682_v62  ;;  %v6683_v56 = vunpack.i.l.bf16 %v6682_v62  ;;  %6706 = vrot.lane.b32.xlu0 %v6705_v58, %s7025_s3 }
0x4f11   :  { %v4146_v2 = vsel %vm158_vm1, %v4098_v0, %v6693_v61  ;;  %v4147_v3 = vsel %vm158_vm1, %v4099_v55, %v6694_v59 }
0x4f12   :  { %v6710_v6 = vpack.i.bf16 %v4147_v3, %v4146_v2  ;;  %v4144_v9 = vsel %vm158_vm1, %v4096_v49, %v6683_v56  ;;  %v4145_v10 = vsel %vm158_vm1, %v4097_v5, %v6684_v53 }
0x4f13   :  { %v6697_v11 = vpop.permute.xlu1 %6696  ;;  %v6700_v29 = vpack.i.bf16 %v4145_v10, %v4144_v9  ;;  %v4101_v16 = vld [vmem:[#allocation4 + $0xe] sm:$0x3] }
0x4f14   :  { %v6699_v13 = vunpack.i.h.bf16 %v6697_v11  ;;  %v6698_v14 = vunpack.i.l.bf16 %v6697_v11  ;;  %6711 = vrot.lane.b32.xlu0 %v6710_v6, %s7025_s3 }
0x4f15   :  { %6701 = vrot.lane.b32.xlu1 %v6700_v29, %s7025_s3 }
0x4f16   :  { %v4148_v63 = vsel %vm158_vm1, %v4100_v15, %v6698_v14  ;;  %v4149_v50 = vsel %vm158_vm1, %v4101_v16, %v6699_v13 }
0x4f17   :  { %v6715_v17 = vpack.i.bf16 %v4149_v50, %v4148_v63 }
0x4f19   :  { %6716 = vrot.lane.b32.xlu1 %v6715_v17, %s7025_s3  ;;  %s8225_s3 = sld [smem:[#allocation14_spill]] }
0x4f1f   :  { %v5924_v23 = vld [vmem:[%s8225_s3] ss:$0 sm:$0xff] }
0x4f20   :  { %v5254_v4 = vcombine.low %v5924_v23, %v5924_v23 }
0x4f22   :  { %v5261_v22 = vrot.slane %v5254_v4, %v7214_v36 }
0x4f24   :  { %v5262_v24 = vcombine.low %v5261_v22, %v5261_v22 }
0x4f26   :  { %v5303_v60 = vadd.f32 %v5302_v40, %v5262_v24  ;;  %v5306_v25 = vadd.f32 %v5305_v44, %v5262_v24 }
0x4f28   :  { %v5311_v26 = vcombine.high %v5303_v60, %v5303_v60  ;;  %v5318_v47 = vrot.slane %v5303_v60, %v7214_v36  ;;  %v5335_v21 = vrot.slane %v5306_v25, %v7214_v36  ;;  %v5328_v35 = vcombine.high %v5306_v25, %v5306_v25  ;;  %v6741_v60 = vld [vmem:[%s8209_s17] sm:$0xff]   ;;  %v6742_v25 = vld [vmem:[%s8209_s17 + $0x8] ss:$0 sps:$4 sm:$0xff]  }
0x4f2a   :  { %v5325_v30 = vrot.slane %v5311_v26, %v7214_v36  ;;  %v5326_v33 = vcombine.high %v5318_v47, %v5318_v47  ;;  %v5343_v37 = vcombine.high %v5335_v21, %v5335_v21  ;;  %v5353_v34 = vmax.f32 %v5318_v47, 0.0  ;;  %v5935_v47 = vld [vmem:[%s8208_s16] ss:$0 sm:$0xff] }
0x4f2b   :  { %v5342_v12 = vrot.slane %v5328_v35, %v7214_v36  ;;  %v5357_v46 = vmax.f32 %v5335_v21, 0.0  ;;  %v5709_v26 = vsel %vm5707_vm8, %v6742_v25, 0  ;;  %v5504_v21 = vcombine.low %v5935_v47, %v5935_v47 }
0x4f2c   :  { %v5327_v42 = vcombine.high %v5325_v30, %v5325_v30  ;;  %v5354_v43 = vmax.f32 %v5326_v33, 0.0  ;;  %v5355_v51 = vmax.f32 %v5325_v30, 0.0  ;;  %v5358_v20 = vmax.f32 %v5343_v37, 0.0 }
0x4f2d   :  { %v5344_v8 = vcombine.high %v5342_v12, %v5342_v12  ;;  %v5359_v62 = vmax.f32 %v5342_v12, 0.0  ;;  %v5511_v30 = vrot.slane %v5504_v21, %v7214_v36 }
0x4f2e   :  { %v5356_v28 = vmax.f32 %v5327_v42, 0.0 }
0x4f2f   :  { %v5360_v49 = vmax.f32 %v5344_v8, 0.0  ;;  %v5512_v33 = vcombine.low %v5511_v30, %v5511_v30 }
0x4f82   :  { %v6707_v32 = vpop.permute.xlu0 %6706 }
0x4f83   :  { %v6709_v39 = vunpack.i.h.bf16 %v6707_v32  ;;  %v6708_v41 = vunpack.i.l.bf16 %v6707_v32 }
0x4f85   :  { %v5393_v40 = vsel %vm158_vm1, %v5353_v34, %v6708_v41  ;;  %v5394_v27 = vsel %vm158_vm1, %v5354_v43, %v6709_v39 }
0x4f86   :  { %v6712_v44 = vpop.permute.xlu0 %6711  ;;  %v5401_v48 = vmax.f32 %v5393_v40, 0.0  ;;  %v5402_v58 = vmax.f32 %v5394_v27, 0.0 }
0x4f87   :  { %v6714_v45 = vunpack.i.h.bf16 %v6712_v44  ;;  %v6713_v52 = vunpack.i.l.bf16 %v6712_v44  ;;  %v6702_v54 = vpop.permute.xlu1 %6701 }
0x4f88   :  { %v6704_v31 = vunpack.i.h.bf16 %v6702_v54  ;;  %v6703_v57 = vunpack.i.l.bf16 %v6702_v54  ;;  %v5936_v10 = vpack.c.bf16 %v5402_v58, %v5401_v48 }
0x4f89   :  { %v5397_v59 = vsel %vm158_vm1, %v5357_v46, %v6713_v52  ;;  %v5398_v61 = vsel %vm158_vm1, %v5358_v20, %v6714_v45 }
0x4f8a   :  { %v5395_v53 = vsel %vm158_vm1, %v5355_v51, %v6703_v57  ;;  %v5405_v56 = vmax.f32 %v5397_v59, 0.0  ;;  %v5406_v0 = vmax.f32 %v5398_v61, 0.0  ;;  %v5396_v55 = vsel %vm158_vm1, %v5356_v28, %v6704_v31 }
0x4f8b   :  { %v5403_v2 = vmax.f32 %v5395_v53, 0.0  ;;  %v6717_v3 = vpop.permute.xlu1 %6716  ;;  %v5404_v5 = vmax.f32 %v5396_v55, 0.0  ;;  %v5447_v50 = vrot.slane %v5936_v10, %v7160_v7 }
0x4f8c   :  { %v6719_v6 = vunpack.i.h.bf16 %v6717_v3  ;;  %v6718_v9 = vunpack.i.l.bf16 %v6717_v3  ;;  %v5938_v14 = vpack.c.bf16 %v5406_v0, %v5405_v56 }
0x4f8d   :  { %v5937_v11 = vpack.c.bf16 %v5404_v5, %v5403_v2 }
0x4f8e   :  { %v5399_v29 = vsel %vm158_vm1, %v5359_v62, %v6718_v9  ;;  %v5400_v13 = vsel %vm158_vm1, %v5360_v49, %v6719_v6  ;;  %v5461_v38 = vrot.slane %v5938_v14, %v7160_v7  ;;  %v5944_v9 = vld [vmem:[%s8210_s18] ss:$0 sm:$0xff] }
0x4f8f   :  { %v5407_v15 = vmax.f32 %v5399_v29, 0.0  ;;  %v5408_v16 = vmax.f32 %v5400_v13, 0.0  ;;  %v5454_v63 = vrot.slane %v5937_v11, %v7160_v7  ;;  %v5693_v10 = vcombine.low %v5944_v9, %v5944_v9 }
0x4f91   :  { %v5939_v17 = vpack.c.bf16 %v5408_v16, %v5407_v15  ;;  %v5469_v19 = vcombine.low %v5447_v50, %v5454_v63  ;;  %v5700_v11 = vrot.slane %v5693_v10, %v7214_v36 }
0x4f93   :  { %v5468_v18 = vrot.slane %v5939_v17, %v7160_v7  ;;  %v5477_v22 = vrot.slane %v5469_v19, %v7160_v7  ;;  %v5701_v29 = vcombine.low %v5700_v11, %v5700_v11 }
0x4f95   :  { %v5470_v23 = vcombine.low %v5461_v38, %v5468_v18 }
0x4f97   :  { %v5484_v4 = vrot.slane %v5470_v23, %v7160_v7 }
0x4f99   :  { %v5485_v24 = vcombine.low %v5477_v22, %v5484_v4 }
0x4f9b   :  { %6380 = vmatmul.mubr.msk.bf16.vlgmr.msra.gmra.mrb[48].mxu0 %vm4499_vm5, %v5485_v24 }
0x4f9c   :  { %6387 = vmatprep.mubr.msk.bf16.mxu0 %vm7028_vm0, %v7027_v1  ;;  %6384 = vmatpush3.bf16.msra.mxu0 %v6741_v60 }
0x4f9d   :  { %6385 = vmatprep.subr.bf16.mxu0 %v7027_v1 }
0x4fa0   :  { %6386 = vmatpush3.bf16.msra.mxu0 %v5709_v26 }
0x506e   :  { %v5551_v35 = vpop.f32.mrb[48].mxu0 }
0x506f   :  { %v5552_v32 = vadd.f32 %v5551_v35, %v5512_v33  ;;  %v6381_v37 = vpop.f32.mrb[49].mxu0 }
0x5070   :  { %v5554_v39 = vpop.f32.mrb[50].mxu0 }
0x5071   :  { %v5560_v41 = vcombine.high %v5552_v32, %v5552_v32  ;;  %v5567_v42 = vrot.slane %v5552_v32, %v7214_v36  ;;  %v5555_v34 = vadd.f32 %v5554_v39, %v5512_v33  ;;  %v6382_v43 = vpop.f32.mrb[51].mxu0 }
0x5073   :  { %v5574_v1 = vrot.slane %v5560_v41, %v7214_v36  ;;  %v5575_v12 = vcombine.high %v5567_v42, %v5567_v42  ;;  %v5577_v51 = vcombine.high %v5555_v34, %v5555_v34  ;;  %v5584_v40 = vrot.slane %v5555_v34, %v7214_v36 }
0x5074   :  { %v5602_v44 = vmax.f32 %v5567_v42, 0.0 }
0x5075   :  { %v5576_v27 = vcombine.high %v5574_v1, %v5574_v1  ;;  %v5603_v46 = vmax.f32 %v5575_v12, 0.0  ;;  %v5591_v20 = vrot.slane %v5577_v51, %v7214_v36  ;;  %v5592_v45 = vcombine.high %v5584_v40, %v5584_v40 }
0x5076   :  { %v5604_v52 = vmax.f32 %v5574_v1, 0.0  ;;  %v5606_v31 = vmax.f32 %v5584_v40, 0.0 }
0x5077   :  { %v5605_v54 = vmax.f32 %v5576_v27, 0.0  ;;  %v5945_v28 = vpack.c.bf16 %v5603_v46, %v5602_v44  ;;  %v5593_v8 = vcombine.high %v5591_v20, %v5591_v20  ;;  %v5607_v57 = vmax.f32 %v5592_v45, 0.0 }
0x5078   :  { %v5608_v58 = vmax.f32 %v5591_v20, 0.0 }
0x5079   :  { %v5946_v48 = vpack.c.bf16 %v5605_v54, %v5604_v52  ;;  %v5609_v59 = vmax.f32 %v5593_v8, 0.0  ;;  %v5947_v61 = vpack.c.bf16 %v5607_v57, %v5606_v31  ;;  %v5645_v62 = vrot.slane %v5945_v28, %v7160_v7 }
0x507b   :  { %v5652_v53 = vrot.slane %v5946_v48, %v7160_v7  ;;  %v5948_v56 = vpack.c.bf16 %v5609_v59, %v5608_v58  ;;  %v5659_v55 = vrot.slane %v5947_v61, %v7160_v7 }
0x507d   :  { %v5667_v0 = vcombine.low %v5645_v62, %v5652_v53  ;;  %v5666_v2 = vrot.slane %v5948_v56, %v7160_v7 }
0x507f   :  { %v5668_v3 = vcombine.low %v5659_v55, %v5666_v2  ;;  %v5675_v49 = vrot.slane %v5667_v0, %v7160_v7 }
0x5081   :  { %v5682_v5 = vrot.slane %v5668_v3, %v7160_v7 }
0x5083   :  { %v5683_v6 = vcombine.low %v5675_v49, %v5682_v5 }
0x5085   :  { %6388 = vmatmul.mubr.msk.bf16.vlgmr.msra.gmra.mrb[52].mxu0 %vm5703_vm9, %v5683_v6 }
0x5158   :  { %v5745_v13 = vpop.f32.mrb[52].mxu0 }
0x5159   :  { %v5746_v14 = vadd.f32 %v5745_v13, %v5701_v29  ;;  %v6389_v15 = vpop.f32.mrb[53].mxu0 }
0x515a   :  { %v5748_v16 = vpop.f32.mrb[54].mxu0 }
0x515b   :  { %v5754_v63 = vcombine.high %v5746_v14, %v5746_v14  ;;  %v5761_v50 = vrot.slane %v5746_v14, %v7214_v36  ;;  %v5749_v7 = vadd.f32 %v5748_v16, %v5701_v29  ;;  %v6390_v17 = vpop.f32.mrb[55].mxu0 }
0x515d   :  { %v5768_v38 = vrot.slane %v5754_v63, %v7214_v36  ;;  %v5769_v19 = vcombine.high %v5761_v50, %v5761_v50  ;;  %5797 = vst.msk [vmem:[%s8211_s19] sm:$0x3] %vm5796_vm10, %v5761_v50  ;;  %v5771_v18 = vcombine.high %v5749_v7, %v5749_v7  ;;  %v5778_v23 = vrot.slane %v5749_v7, %v7214_v36 }
0x515f   :  { %v5770_v4 = vcombine.high %v5768_v38, %v5768_v38  ;;  %5798 = vst.msk [vmem:[%s8211_s19 + $0x2] sm:$0x3] %vm5796_vm10, %v5769_v19  ;;  %5799 = vst.msk [vmem:[%s8211_s19 + $0x4] sm:$0x3] %vm5796_vm10, %v5768_v38  ;;  %v5785_v22 = vrot.slane %v5771_v18, %v7214_v36  ;;  %v5786_v24 = vcombine.high %v5778_v23, %v5778_v23 }
0x5160   :  { %5801 = vst.msk [vmem:[%s8211_s19 + $0x8] sm:$0x3] %vm5796_vm10, %v5778_v23 }
0x5161   :  { %5800 = vst.msk [vmem:[%s8211_s19 + $0x6] sm:$0x3] %vm5796_vm10, %v5770_v4  ;;  %v5787_v60 = vcombine.high %v5785_v22, %v5785_v22  ;;  %5802 = vst.msk [vmem:[%s8211_s19 + $0xa] sm:$0x3] %vm5796_vm10, %v5786_v24 }
0x5162   :  { %5803 = vst.msk [vmem:[%s8211_s19 + $0xc] sm:$0x3] %vm5796_vm10, %v5785_v22 }
0x5163   :  { %5804 = vst.msk [vmem:[%s8211_s19 + $0xe] sm:$0x3] %vm5796_vm10, %v5787_v60 }
0x5164   :  { %5809 = vsyncpa [#allocation8], 1 }

</bundles_post_ra>
